<compile_context>
chip_gen: v7x
topology: tpu7x:2x2x1
jax: 0.10.0
libtpu: 0.0.40
codegen_flags: <defaults>
</compile_context>

<pallas_src>
import numpy as np
import jax
import jax.numpy as jnp
from jax.experimental import pallas as pl
from jax.experimental.pallas import tpu as pltpu


# ----------------------------- Pallas kernel --------------------------------

def _mlpnet_kernel(x_ref, w1_ref, b1_ref, w2_ref, b2_ref, w3_ref, b3_ref,
                   w4_ref, b4_ref, code_ref, logits_ref):
    """Fused 4-layer MLP forward for one batch-row tile.

    x_ref:       (bt, D)    bf16 flattened input tile
    w1..w4:      bf16 weights (w4 zero-padded to 128 output lanes)
    b1..b4:      f32 biases  (b4 zero-padded to 128 lanes)
    code_ref:    (bt, 128)  f32 encoder output (pre-classifier), lane-dense
    logits_ref:  (bt, 128)  f32 padded logits (first n_classes columns valid)
    """
    x = x_ref[...]                                   # bf16

    h = jnp.dot(x, w1_ref[...],
                preferred_element_type=jnp.float32) + b1_ref[...]
    h = jnp.maximum(h, 0.0)

    h = jnp.dot(h.astype(jnp.bfloat16), w2_ref[...],
                preferred_element_type=jnp.float32) + b2_ref[...]
    h = jnp.maximum(h, 0.0)

    code = jnp.dot(h.astype(jnp.bfloat16), w3_ref[...],
                   preferred_element_type=jnp.float32) + b3_ref[...]
    code = jnp.maximum(code, 0.0)
    code_ref[...] = code.astype(code_ref.dtype)

    logits_ref[...] = (jnp.dot(code.astype(jnp.bfloat16), w4_ref[...],
                               preferred_element_type=jnp.float32)
                       + b4_ref[...]).astype(logits_ref.dtype)


# ------------------------------- Wrapper -------------------------------------

def mlpnet_forward(x_nchw, params):
    """Returns (code, logits) exactly like MLPNet.forward (bf16 matmul inputs,
    f32 accumulation)."""
    B = x_nchw.shape[0]
    # PyTorch Reshape(): xs.reshape(B, -1) — same row-major flatten order here.
    x2 = x_nchw.reshape(B, -1)
    D = x2.shape[1]

    w1, b1, w2, b2, w3, b3, w4, b4 = params
    H1 = w1.shape[1]
    H2 = w2.shape[1]
    HC = w3.shape[1]          # code dim (128)
    NC = w4.shape[1]          # n_classes
    NCp = max(128, ((NC + 127) // 128) * 128)        # lane-dense padded width

    # bf16 MXU operands (accumulation stays f32 inside the kernel).
    x2b = x2.astype(jnp.bfloat16)
    w1b = w1.astype(jnp.bfloat16)
    w2b = w2.astype(jnp.bfloat16)
    w3b = w3.astype(jnp.bfloat16)
    # Zero-pad the classifier to a 128-wide (lane-dense) output.
    w4b = jnp.pad(w4, ((0, 0), (0, NCp - NC))).astype(jnp.bfloat16)
    b4p = jnp.pad(b4, ((0, 0), (0, NCp - NC)))

    # Batch-row tiling: pad B up to a multiple of 8, tile at up to 512 rows.
    # Tiny batches stay a single tile (weight-traffic bound: don't split);
    # large batches get >=2 "parallel" steps so v7x can use both TensorCores.
    Bp8 = ((B + 7) // 8) * 8
    bt = min(Bp8, 512)
    n_tiles = pl.cdiv(Bp8, bt)
    Bp = n_tiles * bt
    if Bp > B:
        x2b = jnp.pad(x2b, ((0, Bp - B), (0, 0)))
    grid = (n_tiles,)

    flops = 2 * Bp * (D * H1 + H1 * H2 + H2 * HC + HC * NCp)
    bytes_accessed = (
        2 * (D * H1 + H1 * H2 + H2 * HC + HC * NCp)      # bf16 weights
        + 4 * (H1 + H2 + HC + NCp)                       # f32 biases
        + 2 * Bp * D                                     # bf16 input
        + 4 * Bp * (HC + NCp))                           # f32 outputs
    cost = pl.CostEstimate(flops=int(flops), transcendentals=0,
                           bytes_accessed=int(bytes_accessed))

    resident = lambda i: (0, 0)   # grid-invariant weights/biases

    code, logits_pad = pl.pallas_call(
        _mlpnet_kernel,
        out_shape=(jax.ShapeDtypeStruct((Bp, HC), jnp.float32),
                   jax.ShapeDtypeStruct((Bp, NCp), jnp.float32)),
        grid_spec=pltpu.PrefetchScalarGridSpec(
            num_scalar_prefetch=0,
            grid=grid,
            in_specs=[
                pl.BlockSpec((bt, D), lambda i: (i, 0)),                 # x tile
                pl.BlockSpec((D, H1), resident,
                             pipeline_mode=pl.Buffered(1)),              # w1
                pl.BlockSpec((1, H1), resident,
                             pipeline_mode=pl.Buffered(1)),              # b1
                pl.BlockSpec((H1, H2), resident,
                             pipeline_mode=pl.Buffered(1)),              # w2
                pl.BlockSpec((1, H2), resident,
                             pipeline_mode=pl.Buffered(1)),              # b2
                pl.BlockSpec((H2, HC), resident,
                             pipeline_mode=pl.Buffered(1)),              # w3
                pl.BlockSpec((1, HC), resident,
                             pipeline_mode=pl.Buffered(1)),              # b3
                pl.BlockSpec((HC, NCp), resident,
                             pipeline_mode=pl.Buffered(1)),              # w4 (padded)
                pl.BlockSpec((1, NCp), resident,
                             pipeline_mode=pl.Buffered(1)),              # b4 (padded)
            ],
            out_specs=[
                pl.BlockSpec((bt, HC), lambda i: (i, 0)),   # code (lane-dense 128)
                pl.BlockSpec((bt, NCp), lambda i: (i, 0)),  # padded logits (128)
            ],
        ),
        compiler_params=pltpu.CompilerParams(
            dimension_semantics=("parallel",),
            # bf16 weights single-buffered (~4.3 MiB) + bt<=512 activations
            # comfortably fit; stays within v7x's 64 MiB VMEM with headroom.
            vmem_limit_bytes=32 * 1024 * 1024,
        ),
        cost_estimate=cost,
    )(x2b, w1b, b1, w2b, b2, w3b, b3, w4b, b4p)

    # Drop batch padding and the logits lane padding outside the kernel.
    return code[:B], logits_pad[:B, :NC]


# ------------------------ deterministic parameter init ----------------------

def init_params(key, input_dim, n_classes):
    ks = jax.random.split(key, 8)

    def lin(kw, kb, din, dout):
        w = jax.random.normal(kw, (din, dout), jnp.float32) / jnp.sqrt(
            jnp.asarray(din, jnp.float32))
        b = jax.random.normal(kb, (1, dout), jnp.float32) * 0.01
        return w, b

    w1, b1 = lin(ks[0], ks[1], input_dim, 1024)
    w2, b2 = lin(ks[2], ks[3], 1024, 1024)
    w3, b3 = lin(ks[4], ks[5], 1024, 128)
    w4, b4 = lin(ks[6], ks[7], 128, n_classes)
    return (w1, b1, w2, b2, w3, b3, w4, b4)


# ------------------------------ pure-JAX references --------------------------

def reference_forward_f32(x_nchw, params):
    B = x_nchw.shape[0]
    x2 = x_nchw.reshape(B, -1)
    w1, b1, w2, b2, w3, b3, w4, b4 = params
    h = jnp.maximum(x2 @ w1 + b1, 0.0)
    h = jnp.maximum(h @ w2 + b2, 0.0)
    code = jnp.maximum(h @ w3 + b3, 0.0)
    logits = code @ w4 + b4
    return code, logits


def reference_forward_bf16(x_nchw, params):
    """Mirrors the kernel's bf16-operand / f32-accumulate arithmetic."""
    B = x_nchw.shape[0]
    x2 = x_nchw.reshape(B, -1).astype(jnp.bfloat16)
    w1, b1, w2, b2, w3, b3, w4, b4 = params
    dot = lambda a, w: jnp.dot(a.astype(jnp.bfloat16), w.astype(jnp.bfloat16),
                               preferred_element_type=jnp.float32)
    h = jnp.maximum(dot(x2, w1) + b1, 0.0)
    h = jnp.maximum(dot(h, w2) + b2, 0.0)
    code = jnp.maximum(dot(h, w3) + b3, 0.0)
    logits = dot(code, w4) + b4
    return code, logits


# ----------------------------------- main ------------------------------------

if __name__ == "__main__":
    key = jax.random.PRNGKey(0)
    kx, kp = jax.random.split(key)

    batch, channels, spatial = 2, 4, 16
    n_classes = 10
    input_dim = channels * spatial * spatial          # 4 * 16 * 16 = 1024

    x = jax.random.normal(kx, (batch, channels, spatial, spatial), jnp.float32)
    params = init_params(kp, input_dim, n_classes)

    code, logits = jax.jit(mlpnet_forward)(x, params)
    code = jax.block_until_ready(code)
    logits = jax.block_until_ready(logits)
    assert code.shape == (batch, 128)
    assert logits.shape == (batch, n_classes)

    # Tight check vs a bf16-matched reference (same arithmetic as the kernel).
    code_bf, logits_bf = reference_forward_bf16(x, params)
    np.testing.assert_allclose(np.asarray(code), np.asarray(code_bf),
                               rtol=1e-2, atol=1e-2)
    np.testing.assert_allclose(np.asarray(logits), np.asarray(logits_bf),
                               rtol=1e-2, atol=1e-2)

    # Loose sanity check vs the exact f32 reference (bf16 weight quantization).
    code_f32, logits_f32 = reference_forward_f32(x, params)
    np.testing.assert_allclose(np.asarray(code), np.asarray(code_f32),
                               rtol=5e-2, atol=5e-2)
    np.testing.assert_allclose(np.asarray(logits), np.asarray(logits_f32),
                               rtol=5e-2, atol=5e-2)

    print("KERNEL_OK")
</pallas_src>

<mosaic_0001>
module attributes {stable_mosaic.version = 11 : i64} {
  func.func @_mlpnet_kernel(%arg0: i32, %arg1: memref<8x1024xbf16, #tpu.memory_space<vmem>>, %arg2: memref<1024x1024xbf16, #tpu.memory_space<vmem>>, %arg3: memref<1x1024xf32, #tpu.memory_space<vmem>>, %arg4: memref<1024x1024xbf16, #tpu.memory_space<vmem>>, %arg5: memref<1x1024xf32, #tpu.memory_space<vmem>>, %arg6: memref<1024x128xbf16, #tpu.memory_space<vmem>>, %arg7: memref<1x128xf32, #tpu.memory_space<vmem>>, %arg8: memref<128x128xbf16, #tpu.memory_space<vmem>>, %arg9: memref<1x128xf32, #tpu.memory_space<vmem>>, %arg10: memref<8x128xf32, #tpu.memory_space<vmem>>, %arg11: memref<8x128xf32, #tpu.memory_space<vmem>>) attributes {dimension_semantics = [#tpu.dimension_semantics<parallel>], iteration_bounds = array<i64: 1>, scalar_prefetch = 0 : i64, scratch_operands = 0 : i64, tpu.core_type = #tpu.core_type<tc>, window_params = [{transform_indices = @transform_0, window_bounds = array<i64: 8, 1024>}, {pipeline_mode = #tpu.pipeline_mode<synchronous>, transform_indices = @transform_1, window_bounds = array<i64: 1024, 1024>}, {pipeline_mode = #tpu.pipeline_mode<synchronous>, transform_indices = @transform_2, window_bounds = array<i64: 1, 1024>}, {pipeline_mode = #tpu.pipeline_mode<synchronous>, transform_indices = @transform_3, window_bounds = array<i64: 1024, 1024>}, {pipeline_mode = #tpu.pipeline_mode<synchronous>, transform_indices = @transform_4, window_bounds = array<i64: 1, 1024>}, {pipeline_mode = #tpu.pipeline_mode<synchronous>, transform_indices = @transform_5, window_bounds = array<i64: 1024, 128>}, {pipeline_mode = #tpu.pipeline_mode<synchronous>, transform_indices = @transform_6, window_bounds = array<i64: 1, 128>}, {pipeline_mode = #tpu.pipeline_mode<synchronous>, transform_indices = @transform_7, window_bounds = array<i64: 128, 128>}, {pipeline_mode = #tpu.pipeline_mode<synchronous>, transform_indices = @transform_8, window_bounds = array<i64: 1, 128>}, {transform_indices = @transform_9, window_bounds = array<i64: 8, 128>}, {transform_indices = @transform_10, window_bounds = array<i64: 8, 128>}]} {
    %c0 = arith.constant 0 : index
    %c0_0 = arith.constant 0 : index
    %0 = vector.load %arg1[%c0, %c0_0] : memref<8x1024xbf16, #tpu.memory_space<vmem>>, vector<8x1024xbf16>
    %c0_1 = arith.constant 0 : index
    %c0_2 = arith.constant 0 : index
    %1 = vector.load %arg2[%c0_1, %c0_2] : memref<1024x1024xbf16, #tpu.memory_space<vmem>>, vector<1024x1024xbf16>
    %cst = arith.constant dense<0.000000e+00> : vector<8x1024xf32>
    %2 = tpu.matmul %0, %1, %cst {dimension_numbers = #tpu.dot_dimension_numbers<[1], [0], [0], [1], [0, 0, 1, 1], [], []>} : vector<8x1024xbf16>, vector<1024x1024xbf16>, vector<8x1024xf32> -> vector<8x1024xf32>
    %c0_3 = arith.constant 0 : index
    %c0_4 = arith.constant 0 : index
    %3 = vector.load %arg3[%c0_3, %c0_4] : memref<1x1024xf32, #tpu.memory_space<vmem>>, vector<1x1024xf32>
    %4 = vector.broadcast %3 : vector<1x1024xf32> to vector<8x1024xf32>
    %5 = arith.addf %2, %4 : vector<8x1024xf32>
    %cst_5 = arith.constant 0.000000e+00 : f32
    %6 = vector.broadcast %cst_5 : f32 to vector<8x1024xf32>
    %7 = arith.maximumf %5, %6 : vector<8x1024xf32>
    %8 = arith.truncf %7 : vector<8x1024xf32> to vector<8x1024xbf16>
    %c0_6 = arith.constant 0 : index
    %c0_7 = arith.constant 0 : index
    %9 = vector.load %arg4[%c0_6, %c0_7] : memref<1024x1024xbf16, #tpu.memory_space<vmem>>, vector<1024x1024xbf16>
    %cst_8 = arith.constant dense<0.000000e+00> : vector<8x1024xf32>
    %10 = tpu.matmul %8, %9, %cst_8 {dimension_numbers = #tpu.dot_dimension_numbers<[1], [0], [0], [1], [0, 0, 1, 1], [], []>} : vector<8x1024xbf16>, vector<1024x1024xbf16>, vector<8x1024xf32> -> vector<8x1024xf32>
    %c0_9 = arith.constant 0 : index
    %c0_10 = arith.constant 0 : index
    %11 = vector.load %arg5[%c0_9, %c0_10] : memref<1x1024xf32, #tpu.memory_space<vmem>>, vector<1x1024xf32>
    %12 = vector.broadcast %11 : vector<1x1024xf32> to vector<8x1024xf32>
    %13 = arith.addf %10, %12 : vector<8x1024xf32>
    %cst_11 = arith.constant 0.000000e+00 : f32
    %14 = vector.broadcast %cst_11 : f32 to vector<8x1024xf32>
    %15 = arith.maximumf %13, %14 : vector<8x1024xf32>
    %16 = arith.truncf %15 : vector<8x1024xf32> to vector<8x1024xbf16>
    %c0_12 = arith.constant 0 : index
    %c0_13 = arith.constant 0 : index
    %17 = vector.load %arg6[%c0_12, %c0_13] : memref<1024x128xbf16, #tpu.memory_space<vmem>>, vector<1024x128xbf16>
    %cst_14 = arith.constant dense<0.000000e+00> : vector<8x128xf32>
    %18 = tpu.matmul %16, %17, %cst_14 {dimension_numbers = #tpu.dot_dimension_numbers<[1], [0], [0], [1], [0, 0, 1, 1], [], []>} : vector<8x1024xbf16>, vector<1024x128xbf16>, vector<8x128xf32> -> vector<8x128xf32>
    %c0_15 = arith.constant 0 : index
    %c0_16 = arith.constant 0 : index
    %19 = vector.load %arg7[%c0_15, %c0_16] : memref<1x128xf32, #tpu.memory_space<vmem>>, vector<1x128xf32>
    %20 = vector.broadcast %19 : vector<1x128xf32> to vector<8x128xf32>
    %21 = arith.addf %18, %20 : vector<8x128xf32>
    %cst_17 = arith.constant 0.000000e+00 : f32
    %22 = vector.broadcast %cst_17 : f32 to vector<8x128xf32>
    %23 = arith.maximumf %21, %22 : vector<8x128xf32>
    %c0_18 = arith.constant 0 : index
    %c0_19 = arith.constant 0 : index
    %24 = vector.load %arg10[%c0_18, %c0_19] : memref<8x128xf32, #tpu.memory_space<vmem>>, vector<8x128xf32>
    tpu.vector_store %arg10[%c0_18, %c0_19], %23 {strides = array<i32>} : memref<8x128xf32, #tpu.memory_space<vmem>>, vector<8x128xf32>,
    %25 = arith.truncf %23 : vector<8x128xf32> to vector<8x128xbf16>
    %c0_20 = arith.constant 0 : index
    %c0_21 = arith.constant 0 : index
    %26 = vector.load %arg8[%c0_20, %c0_21] : memref<128x128xbf16, #tpu.memory_space<vmem>>, vector<128x128xbf16>
    %cst_22 = arith.constant dense<0.000000e+00> : vector<8x128xf32>
    %27 = tpu.matmul %25, %26, %cst_22 {dimension_numbers = #tpu.dot_dimension_numbers<[1], [0], [0], [1], [0, 0, 1, 1], [], []>} : vector<8x128xbf16>, vector<128x128xbf16>, vector<8x128xf32> -> vector<8x128xf32>
    %c0_23 = arith.constant 0 : index
    %c0_24 = arith.constant 0 : index
    %28 = vector.load %arg9[%c0_23, %c0_24] : memref<1x128xf32, #tpu.memory_space<vmem>>, vector<1x128xf32>
    %29 = vector.broadcast %28 : vector<1x128xf32> to vector<8x128xf32>
    %30 = arith.addf %27, %29 : vector<8x128xf32>
    %c0_25 = arith.constant 0 : index
    %c0_26 = arith.constant 0 : index
    %31 = vector.load %arg11[%c0_25, %c0_26] : memref<8x128xf32, #tpu.memory_space<vmem>>, vector<8x128xf32>
    tpu.vector_store %arg11[%c0_25, %c0_26], %30 {strides = array<i32>} : memref<8x128xf32, #tpu.memory_space<vmem>>, vector<8x128xf32>,
    return
  }
  func.func @transform_0(%arg0: i32) -> (i32, i32) {
    %c0_i32 = arith.constant 0 : i32
    %c0_i32_0 = arith.constant 0 : i32
    return %arg0, %c0_i32 : i32, i32
  }
  func.func @transform_1(%arg0: i32) -> (i32, i32) {
    %c0_i32 = arith.constant 0 : i32
    %c0_i32_0 = arith.constant 0 : i32
    %c0_i32_1 = arith.constant 0 : i32
    return %c0_i32, %c0_i32_0 : i32, i32
  }
  func.func @transform_2(%arg0: i32) -> (i32, i32) {
    %c0_i32 = arith.constant 0 : i32
    %c0_i32_0 = arith.constant 0 : i32
    %c0_i32_1 = arith.constant 0 : i32
    return %c0_i32, %c0_i32_0 : i32, i32
  }
  func.func @transform_3(%arg0: i32) -> (i32, i32) {
    %c0_i32 = arith.constant 0 : i32
    %c0_i32_0 = arith.constant 0 : i32
    %c0_i32_1 = arith.constant 0 : i32
    return %c0_i32, %c0_i32_0 : i32, i32
  }
  func.func @transform_4(%arg0: i32) -> (i32, i32) {
    %c0_i32 = arith.constant 0 : i32
    %c0_i32_0 = arith.constant 0 : i32
    %c0_i32_1 = arith.constant 0 : i32
    return %c0_i32, %c0_i32_0 : i32, i32
  }
  func.func @transform_5(%arg0: i32) -> (i32, i32) {
    %c0_i32 = arith.constant 0 : i32
    %c0_i32_0 = arith.constant 0 : i32
    %c0_i32_1 = arith.constant 0 : i32
    return %c0_i32, %c0_i32_0 : i32, i32
  }
  func.func @transform_6(%arg0: i32) -> (i32, i32) {
    %c0_i32 = arith.constant 0 : i32
    %c0_i32_0 = arith.constant 0 : i32
    %c0_i32_1 = arith.constant 0 : i32
    return %c0_i32, %c0_i32_0 : i32, i32
  }
  func.func @transform_7(%arg0: i32) -> (i32, i32) {
    %c0_i32 = arith.constant 0 : i32
    %c0_i32_0 = arith.constant 0 : i32
    %c0_i32_1 = arith.constant 0 : i32
    return %c0_i32, %c0_i32_0 : i32, i32
  }
  func.func @transform_8(%arg0: i32) -> (i32, i32) {
    %c0_i32 = arith.constant 0 : i32
    %c0_i32_0 = arith.constant 0 : i32
    %c0_i32_1 = arith.constant 0 : i32
    return %c0_i32, %c0_i32_0 : i32, i32
  }
  func.func @transform_9(%arg0: i32) -> (i32, i32) {
    %c0_i32 = arith.constant 0 : i32
    %c0_i32_0 = arith.constant 0 : i32
    return %arg0, %c0_i32 : i32, i32
  }
  func.func @transform_10(%arg0: i32) -> (i32, i32) {
    %c0_i32 = arith.constant 0 : i32
    %c0_i32_0 = arith.constant 0 : i32
    return %arg0, %c0_i32 : i32, i32
  }
}

</mosaic_0001>

<bundles_post_ra>
// kernel: mlpnet_forward.1
= control target key start
LH: loop header
LB: loop body
LE: loop exit
PB: predicated region body
PF: predicated region fallthrough
CT: control target
= control target key end

     0   :  { %vm9860_vm0 = vmmov 0   ;;  %s13457_s1 = inlined_call_operand.vmem [shape: bf16[1024,1024], index: 1, kind: input, shape index: {}]   ;;  %s13458_s0 = inlined_call_operand.vmem [shape: bf16[8,1024], index: 0, kind: input, shape index: {}]   ;;  %s13459_s2 = inlined_call_operand.vmem [shape: f32[1,1024], index: 2, kind: input, shape index: {}]   ;;  %s13460_s3 = inlined_call_operand.vmem [shape: bf16[1024,1024], index: 3, kind: input, shape index: {}]   ;;  %s13461_s5 = inlined_call_operand.vmem [shape: bf16[1024,128], index: 5, kind: input, shape index: {}]   ;;  %s13462_s4 = inlined_call_operand.vmem [shape: f32[1,1024], index: 4, kind: input, shape index: {}]   ;;  %s13463_s7 = inlined_call_operand.vmem [shape: bf16[128,128], index: 7, kind: input, shape index: {}]   ;;  %s13464_s6 = inlined_call_operand.vmem [shape: f32[1,128], index: 6, kind: input, shape index: {}]   ;;  %s13465_s9 = inlined_call_operand.vmem [shape: f32[8,128], index: 9, kind: output, shape index: {0}]   ;;  %s13466_s8 = inlined_call_operand.vmem [shape: f32[1,128], index: 8, kind: input, shape index: {}]   ;;  %s13467_s10 = inlined_call_operand.vmem [shape: f32[8,128], index: 10, kind: output, shape index: {1}]  }
   0x1   :  { %v39_v0 = vld [vmem:[%s13457_s1] sm:$0xff]  ;;  %v40_v2 = vld [vmem:[%s13457_s1 + $0x8] sm:$0xff] }
   0x2   :  { %v43_v1 = vld [vmem:[%s13457_s1 + $0x20] sm:$0xff]  ;;  %v44_v4 = vld [vmem:[%s13457_s1 + $0x28] sm:$0xff] }
   0x3   :  { %v8450_v3 = vcombine.high %v39_v0, %v43_v1  ;;  %v8449_v5 = vcombine.low %v39_v0, %v43_v1  ;;  %v47_v6 = vld [vmem:[%s13457_s1 + $0x40] sm:$0xff]  ;;  %v8452_v8 = vcombine.high %v40_v2, %v44_v4  ;;  %v8451_v9 = vcombine.low %v40_v2, %v44_v4  ;;  %v48_v11 = vld [vmem:[%s13457_s1 + $0x48] sm:$0xff] }
   0x4   :  { %v51_v7 = vld [vmem:[%s13457_s1 + $0x60] sm:$0xff]  ;;  %v52_v12 = vld [vmem:[%s13457_s1 + $0x68] sm:$0xff] }
   0x5   :  { %v8458_v10 = vcombine.high %v47_v6, %v51_v7  ;;  %v55_v13 = vld [vmem:[%s13457_s1 + $0x80] sm:$0xff]  ;;  %3181 = vmatprep.subr.bf16.mxu0 %v8450_v3  ;;  %v8460_v14 = vcombine.high %v48_v11, %v52_v12  ;;  %v56_v16 = vld [vmem:[%s13457_s1 + $0x88] sm:$0xff]  ;;  %3345 = vmatprep.subr.bf16.mxu1 %v8452_v8  ;;  %v8457_v18 = vcombine.low %v47_v6, %v51_v7 }
   0x6   :  { %v59_v15 = vld [vmem:[%s13457_s1 + $0xa0] sm:$0xff]  ;;  %v60_v17 = vld [vmem:[%s13457_s1 + $0xa8] sm:$0xff]  ;;  %3182 = vmatpush1.bf16.msra.mxu0 %v8449_v5  ;;  %3346 = vmatpush1.bf16.msra.mxu1 %v8451_v9  ;;  %v8459_v19 = vcombine.low %v48_v11, %v52_v12 }
   0x7   :  { %3183 = vmatprep.subr.bf16.mxu0 %v8458_v10  ;;  %v8466_v20 = vcombine.high %v55_v13, %v59_v15  ;;  %3347 = vmatprep.subr.bf16.mxu1 %v8460_v14  ;;  %v8468_v21 = vcombine.high %v56_v16, %v60_v17  ;;  %v63_v22 = vld [vmem:[%s13457_s1 + $0xc0] sm:$0xff]  ;;  %v64_v24 = vld [vmem:[%s13457_s1 + $0xc8] sm:$0xff]  ;;  %v8465_v26 = vcombine.low %v55_v13, %v59_v15 }
   0x8   :  { %v67_v23 = vld [vmem:[%s13457_s1 + $0xe0] sm:$0xff]  ;;  %v68_v25 = vld [vmem:[%s13457_s1 + $0xe8] sm:$0xff]  ;;  %v8467_v27 = vcombine.low %v56_v16, %v60_v17 }
   0x9   :  { %v8474_v28 = vcombine.high %v63_v22, %v67_v23  ;;  %v8476_v29 = vcombine.high %v64_v24, %v68_v25  ;;  %v71_v30 = vld [vmem:[%s13457_s1 + $0x100] sm:$0xff]  ;;  %v72_v32 = vld [vmem:[%s13457_s1 + $0x108] sm:$0xff]  ;;  %v8473_v34 = vcombine.low %v63_v22, %v67_v23  ;;  %v8475_v35 = vcombine.low %v64_v24, %v68_v25 }
   0xa   :  { %3184 = vmatpush1.bf16.msra.mxu0 %v8457_v18  ;;  %3348 = vmatpush1.bf16.msra.mxu1 %v8459_v19  ;;  %v75_v31 = vld [vmem:[%s13457_s1 + $0x120] sm:$0xff]  ;;  %v76_v33 = vld [vmem:[%s13457_s1 + $0x128] sm:$0xff] }
   0xb   :  { %3185 = vmatprep.subr.bf16.mxu0 %v8466_v20  ;;  %3349 = vmatprep.subr.bf16.mxu1 %v8468_v21  ;;  %v8482_v36 = vcombine.high %v71_v30, %v75_v31  ;;  %v8484_v37 = vcombine.high %v72_v32, %v76_v33  ;;  %v79_v38 = vld [vmem:[%s13457_s1 + $0x140] sm:$0xff]  ;;  %v80_v40 = vld [vmem:[%s13457_s1 + $0x148] sm:$0xff]  ;;  %v8481_v42 = vcombine.low %v71_v30, %v75_v31 }
   0xc   :  { %v83_v39 = vld [vmem:[%s13457_s1 + $0x160] sm:$0xff]  ;;  %v84_v41 = vld [vmem:[%s13457_s1 + $0x168] sm:$0xff]  ;;  %v8483_v43 = vcombine.low %v72_v32, %v76_v33 }
   0xd   :  { %v8490_v44 = vcombine.high %v79_v38, %v83_v39  ;;  %v8492_v45 = vcombine.high %v80_v40, %v84_v41  ;;  %v87_v46 = vld [vmem:[%s13457_s1 + $0x180] sm:$0xff]  ;;  %v88_v48 = vld [vmem:[%s13457_s1 + $0x188] sm:$0xff]  ;;  %v8489_v50 = vcombine.low %v79_v38, %v83_v39  ;;  %v8491_v51 = vcombine.low %v80_v40, %v84_v41 }
   0xe   :  { %3186 = vmatpush1.bf16.msra.mxu0 %v8465_v26  ;;  %3350 = vmatpush1.bf16.msra.mxu1 %v8467_v27  ;;  %v91_v47 = vld [vmem:[%s13457_s1 + $0x1a0] sm:$0xff]  ;;  %v92_v49 = vld [vmem:[%s13457_s1 + $0x1a8] sm:$0xff] }
   0xf   :  { %3187 = vmatprep.subr.bf16.mxu0 %v8474_v28  ;;  %3351 = vmatprep.subr.bf16.mxu1 %v8476_v29  ;;  %v8498_v52 = vcombine.high %v87_v46, %v91_v47  ;;  %v10003_v53 = vld [vmem:[%s13458_s0] sm:$0xff]  ;;  %v8500_v54 = vcombine.high %v88_v48, %v92_v49  ;;  %v96_v58 = vld [vmem:[%s13457_s1 + $0x1c8] sm:$0xff]  ;;  %v8497_v60 = vcombine.low %v87_v46, %v91_v47 }
  0x10   :  { %v95_v55 = vld [vmem:[%s13457_s1 + $0x1c0] sm:$0xff]  ;;  %v10013_v57 = vcombine.high %v10003_v53, %v10003_v53  ;;  %v100_v59 = vld [vmem:[%s13457_s1 + $0x1e8] sm:$0xff]  ;;  %v8499_v61 = vcombine.low %v88_v48, %v92_v49 }
  0x11   :  { %v99_v56 = vld [vmem:[%s13457_s1 + $0x1e0] sm:$0xff]  ;;  %v8508_v63 = vcombine.high %v96_v58, %v100_v59  ;;  %v104_v2 = vld [vmem:[%s13457_s1 + $0x208] sm:$0xff]  ;;  %v8507_v5 = vcombine.low %v96_v58, %v100_v59 }
  0x12   :  { %3188 = vmatpush1.bf16.msra.mxu0 %v8473_v34  ;;  %3352 = vmatpush1.bf16.msra.mxu1 %v8475_v35  ;;  %v8506_v62 = vcombine.high %v95_v55, %v99_v56  ;;  %v103_v0 = vld [vmem:[%s13457_s1 + $0x200] sm:$0xff]  ;;  %v108_v3 = vld [vmem:[%s13457_s1 + $0x228] sm:$0xff]  ;;  %v8505_v4 = vcombine.low %v95_v55, %v99_v56 }
  0x13   :  { %3189 = vmatprep.subr.bf16.mxu0 %v8482_v36  ;;  %3353 = vmatprep.subr.bf16.mxu1 %v8484_v37  ;;  %v107_v1 = vld [vmem:[%s13457_s1 + $0x220] sm:$0xff]  ;;  %v8516_v7 = vcombine.high %v104_v2, %v108_v3  ;;  %v112_v10 = vld [vmem:[%s13457_s1 + $0x248] sm:$0xff]  ;;  %v8515_v13 = vcombine.low %v104_v2, %v108_v3 }
  0x14   :  { %3213 = vmatprep.mubr.bf16.mxu0 %v10013_v57  ;;  %3377 = vmatprep.mubr.bf16.mxu1 %v10013_v57  ;;  %v8514_v6 = vcombine.high %v103_v0, %v107_v1  ;;  %v111_v8 = vld [vmem:[%s13457_s1 + $0x240] sm:$0xff]  ;;  %v116_v11 = vld [vmem:[%s13457_s1 + $0x268] sm:$0xff]  ;;  %v8513_v12 = vcombine.low %v103_v0, %v107_v1 }
  0x15   :  { %v115_v9 = vld [vmem:[%s13457_s1 + $0x260] sm:$0xff]  ;;  %v8524_v15 = vcombine.high %v112_v10, %v116_v11  ;;  %v120_v18 = vld [vmem:[%s13457_s1 + $0x288] sm:$0xff]  ;;  %v8523_v21 = vcombine.low %v112_v10, %v116_v11 }
  0x16   :  { %3190 = vmatpush1.bf16.msra.mxu0 %v8481_v42  ;;  %3354 = vmatpush1.bf16.msra.mxu1 %v8483_v43  ;;  %v8522_v14 = vcombine.high %v111_v8, %v115_v9  ;;  %v119_v16 = vld [vmem:[%s13457_s1 + $0x280] sm:$0xff]  ;;  %v124_v19 = vld [vmem:[%s13457_s1 + $0x2a8] sm:$0xff]  ;;  %v8521_v20 = vcombine.low %v111_v8, %v115_v9 }
  0x17   :  { %3191 = vmatprep.subr.bf16.mxu0 %v8490_v44  ;;  %3355 = vmatprep.subr.bf16.mxu1 %v8492_v45  ;;  %v123_v17 = vld [vmem:[%s13457_s1 + $0x2a0] sm:$0xff]  ;;  %v8532_v23 = vcombine.high %v120_v18, %v124_v19  ;;  %v128_v26 = vld [vmem:[%s13457_s1 + $0x2c8] sm:$0xff]  ;;  %v8531_v29 = vcombine.low %v120_v18, %v124_v19 }
  0x18   :  { %v8530_v22 = vcombine.high %v119_v16, %v123_v17  ;;  %v127_v24 = vld [vmem:[%s13457_s1 + $0x2c0] sm:$0xff]  ;;  %v132_v27 = vld [vmem:[%s13457_s1 + $0x2e8] sm:$0xff]  ;;  %v8529_v28 = vcombine.low %v119_v16, %v123_v17 }
  0x19   :  { %v131_v25 = vld [vmem:[%s13457_s1 + $0x2e0] sm:$0xff]  ;;  %v8540_v31 = vcombine.high %v128_v26, %v132_v27  ;;  %v136_v34 = vld [vmem:[%s13457_s1 + $0x308] sm:$0xff]  ;;  %v8539_v37 = vcombine.low %v128_v26, %v132_v27 }
  0x1a   :  { %3192 = vmatpush1.bf16.msra.mxu0 %v8489_v50  ;;  %3356 = vmatpush1.bf16.msra.mxu1 %v8491_v51  ;;  %v8538_v30 = vcombine.high %v127_v24, %v131_v25  ;;  %v135_v32 = vld [vmem:[%s13457_s1 + $0x300] sm:$0xff]  ;;  %v140_v35 = vld [vmem:[%s13457_s1 + $0x328] sm:$0xff]  ;;  %v8537_v36 = vcombine.low %v127_v24, %v131_v25 }
  0x1b   :  { %3193 = vmatprep.subr.bf16.mxu0 %v8498_v52  ;;  %3357 = vmatprep.subr.bf16.mxu1 %v8500_v54  ;;  %v139_v33 = vld [vmem:[%s13457_s1 + $0x320] sm:$0xff]  ;;  %v8548_v39 = vcombine.high %v136_v34, %v140_v35  ;;  %v144_v42 = vld [vmem:[%s13457_s1 + $0x348] sm:$0xff]  ;;  %v8547_v45 = vcombine.low %v136_v34, %v140_v35 }
  0x1c   :  { %v8546_v38 = vcombine.high %v135_v32, %v139_v33  ;;  %v143_v40 = vld [vmem:[%s13457_s1 + $0x340] sm:$0xff]  ;;  %v148_v43 = vld [vmem:[%s13457_s1 + $0x368] sm:$0xff]  ;;  %v8545_v44 = vcombine.low %v135_v32, %v139_v33 }
  0x1d   :  { %v147_v41 = vld [vmem:[%s13457_s1 + $0x360] sm:$0xff]  ;;  %v8556_v47 = vcombine.high %v144_v42, %v148_v43  ;;  %v152_v50 = vld [vmem:[%s13457_s1 + $0x388] sm:$0xff]  ;;  %v8555_v54 = vcombine.low %v144_v42, %v148_v43 }
  0x1e   :  { %3194 = vmatpush1.bf16.msra.mxu0 %v8497_v60  ;;  %3358 = vmatpush1.bf16.msra.mxu1 %v8499_v61  ;;  %v8554_v46 = vcombine.high %v143_v40, %v147_v41  ;;  %v151_v48 = vld [vmem:[%s13457_s1 + $0x380] sm:$0xff]  ;;  %v156_v51 = vld [vmem:[%s13457_s1 + $0x3a8] sm:$0xff]  ;;  %v8553_v52 = vcombine.low %v143_v40, %v147_v41 }
  0x1f   :  { %3195 = vmatprep.subr.bf16.mxu0 %v8506_v62  ;;  %3359 = vmatprep.subr.bf16.mxu1 %v8508_v63  ;;  %v155_v49 = vld [vmem:[%s13457_s1 + $0x3a0] sm:$0xff]  ;;  %v8564_v56 = vcombine.high %v152_v50, %v156_v51  ;;  %v160_v60 = vld [vmem:[%s13457_s1 + $0x3c8] sm:$0xff]  ;;  %v8563_v63 = vcombine.low %v152_v50, %v156_v51 }
  0x20   :  { %v8562_v55 = vcombine.high %v151_v48, %v155_v49  ;;  %v159_v58 = vld [vmem:[%s13457_s1 + $0x3c0] sm:$0xff]  ;;  %v164_v61 = vld [vmem:[%s13457_s1 + $0x3e8] sm:$0xff]  ;;  %v8561_v62 = vcombine.low %v151_v48, %v155_v49 }
  0x21   :  { %v163_v59 = vld [vmem:[%s13457_s1 + $0x3e0] sm:$0xff]  ;;  %v8572_v1 = vcombine.high %v160_v60, %v164_v61 }
  0x22   :  { %3196 = vmatpush1.bf16.msra.mxu0 %v8505_v4  ;;  %3360 = vmatpush1.bf16.msra.mxu1 %v8507_v5  ;;  %v8570_v0 = vcombine.high %v159_v58, %v163_v59  ;;  %v167_v2 = vld [vmem:[%s13457_s1 + $0x400] sm:$0xff]  ;;  %v168_v4 = vld [vmem:[%s13457_s1 + $0x408] sm:$0xff] }
  0x23   :  { %3197 = vmatprep.subr.bf16.mxu0 %v8514_v6  ;;  %3361 = vmatprep.subr.bf16.mxu1 %v8516_v7  ;;  %v171_v3 = vld [vmem:[%s13457_s1 + $0x420] sm:$0xff]  ;;  %v172_v5 = vld [vmem:[%s13457_s1 + $0x428] sm:$0xff]  ;;  %v8569_v6 = vcombine.low %v159_v58, %v163_v59  ;;  %v8571_v7 = vcombine.low %v160_v60, %v164_v61 }
  0x24   :  { %v8578_v8 = vcombine.high %v167_v2, %v171_v3  ;;  %v8580_v9 = vcombine.high %v168_v4, %v172_v5  ;;  %v175_v10 = vld [vmem:[%s13457_s1 + $0x440] sm:$0xff]  ;;  %v8577_v16 = vcombine.low %v167_v2, %v171_v3  ;;  %v8579_v17 = vcombine.low %v168_v4, %v172_v5 }
  0x25   :  { %v179_v11 = vld [vmem:[%s13457_s1 + $0x460] sm:$0xff] }
  0x26   :  { %3198 = vmatpush1.bf16.msra.mxu0 %v8513_v12  ;;  %3362 = vmatpush1.bf16.msra.mxu1 %v8515_v13  ;;  %v10139_v12 = vcombine.low %v10003_v53, %v10003_v53  ;;  %v176_v13 = vld [vmem:[%s13457_s1 + $0x448] sm:$0xff]  ;;  %v8586_v53 = vcombine.high %v175_v10, %v179_v11  ;;  %v183_v19 = vld [vmem:[%s13457_s1 + $0x480] sm:$0xff]  ;;  %v8585_v24 = vcombine.low %v175_v10, %v179_v11 }
  0x27   :  { %3199 = vmatprep.subr.bf16.mxu0 %v8522_v14  ;;  %3363 = vmatprep.subr.bf16.mxu1 %v8524_v15  ;;  %v180_v14 = vld [vmem:[%s13457_s1 + $0x468] sm:$0xff] }
  0x28   :  { %v10150_v15 = vld [vmem:[%s13458_s0 + $0x8] sm:$0xff]  ;;  %v8588_v18 = vcombine.high %v176_v13, %v180_v14  ;;  %v8587_v25 = vcombine.low %v176_v13, %v180_v14 }
  0x2a   :  { %3200 = vmatpush1.bf16.msra.mxu0 %v8521_v20  ;;  %3364 = vmatpush1.bf16.msra.mxu1 %v8523_v21  ;;  %v187_v20 = vld [vmem:[%s13457_s1 + $0x4a0] sm:$0xff]  ;;  %v10160_v21 = vcombine.high %v10150_v15, %v10150_v15 }
  0x2b   :  { %3201 = vmatprep.subr.bf16.mxu0 %v8530_v22  ;;  %3365 = vmatprep.subr.bf16.mxu1 %v8532_v23  ;;  %v184_v22 = vld [vmem:[%s13457_s1 + $0x488] sm:$0xff]  ;;  %v8594_v26 = vcombine.high %v183_v19, %v187_v20  ;;  %v8593_v32 = vcombine.low %v183_v19, %v187_v20 }
  0x2c   :  { %v188_v23 = vld [vmem:[%s13457_s1 + $0x4a8] sm:$0xff] }
  0x2d   :  { %v8596_v27 = vcombine.high %v184_v22, %v188_v23  ;;  %v8595_v33 = vcombine.low %v184_v22, %v188_v23 }
  0x2e   :  { %3202 = vmatpush1.bf16.msra.mxu0 %v8529_v28  ;;  %3366 = vmatpush1.bf16.msra.mxu1 %v8531_v29  ;;  %v191_v28 = vld [vmem:[%s13457_s1 + $0x4c0] sm:$0xff] }
  0x2f   :  { %3203 = vmatprep.subr.bf16.mxu0 %v8538_v30  ;;  %3367 = vmatprep.subr.bf16.mxu1 %v8540_v31  ;;  %v195_v29 = vld [vmem:[%s13457_s1 + $0x4e0] sm:$0xff]  ;;  %v192_v30 = vld [vmem:[%s13457_s1 + $0x4c8] sm:$0xff] }
  0x30   :  { %v196_v31 = vld [vmem:[%s13457_s1 + $0x4e8] sm:$0xff]  ;;  %v8602_v34 = vcombine.high %v191_v28, %v195_v29  ;;  %v8601_v40 = vcombine.low %v191_v28, %v195_v29 }
  0x31   :  { %v8604_v35 = vcombine.high %v192_v30, %v196_v31  ;;  %v8603_v41 = vcombine.low %v192_v30, %v196_v31 }
  0x32   :  { %3204 = vmatpush1.bf16.msra.mxu0 %v8537_v36  ;;  %3368 = vmatpush1.bf16.msra.mxu1 %v8539_v37  ;;  %v199_v36 = vld [vmem:[%s13457_s1 + $0x500] sm:$0xff] }
  0x33   :  { %3205 = vmatprep.subr.bf16.mxu0 %v8546_v38  ;;  %3369 = vmatprep.subr.bf16.mxu1 %v8548_v39  ;;  %v203_v37 = vld [vmem:[%s13457_s1 + $0x520] sm:$0xff]  ;;  %v200_v38 = vld [vmem:[%s13457_s1 + $0x508] sm:$0xff] }
  0x34   :  { %v204_v39 = vld [vmem:[%s13457_s1 + $0x528] sm:$0xff]  ;;  %v8610_v42 = vcombine.high %v199_v36, %v203_v37  ;;  %v8609_v48 = vcombine.low %v199_v36, %v203_v37 }
  0x35   :  { %v8612_v43 = vcombine.high %v200_v38, %v204_v39  ;;  %v8611_v49 = vcombine.low %v200_v38, %v204_v39 }
  0x36   :  { %3206 = vmatpush1.bf16.msra.mxu0 %v8545_v44  ;;  %3370 = vmatpush1.bf16.msra.mxu1 %v8547_v45  ;;  %v207_v44 = vld [vmem:[%s13457_s1 + $0x540] sm:$0xff] }
  0x37   :  { %3207 = vmatprep.subr.bf16.mxu0 %v8554_v46  ;;  %3371 = vmatprep.subr.bf16.mxu1 %v8556_v47  ;;  %v211_v45 = vld [vmem:[%s13457_s1 + $0x560] sm:$0xff]  ;;  %v208_v46 = vld [vmem:[%s13457_s1 + $0x548] sm:$0xff] }
  0x38   :  { %v212_v47 = vld [vmem:[%s13457_s1 + $0x568] sm:$0xff]  ;;  %v8618_v50 = vcombine.high %v207_v44, %v211_v45  ;;  %v8617_v58 = vcombine.low %v207_v44, %v211_v45 }
  0x39   :  { %v8620_v51 = vcombine.high %v208_v46, %v212_v47  ;;  %v8619_v59 = vcombine.low %v208_v46, %v212_v47 }
  0x3a   :  { %3208 = vmatpush1.bf16.msra.mxu0 %v8553_v52  ;;  %3372 = vmatpush1.bf16.msra.mxu1 %v8555_v54  ;;  %v215_v52 = vld [vmem:[%s13457_s1 + $0x580] sm:$0xff] }
  0x3b   :  { %3209 = vmatprep.subr.bf16.mxu0 %v8562_v55  ;;  %3373 = vmatprep.subr.bf16.mxu1 %v8564_v56  ;;  %v219_v54 = vld [vmem:[%s13457_s1 + $0x5a0] sm:$0xff]  ;;  %v216_v55 = vld [vmem:[%s13457_s1 + $0x588] sm:$0xff] }
  0x3c   :  { %v220_v56 = vld [vmem:[%s13457_s1 + $0x5a8] sm:$0xff]  ;;  %v8626_v60 = vcombine.high %v215_v52, %v219_v54  ;;  %v8625_v2 = vcombine.low %v215_v52, %v219_v54 }
  0x3d   :  { %v8628_v61 = vcombine.high %v216_v55, %v220_v56  ;;  %v8627_v3 = vcombine.low %v216_v55, %v220_v56 }
  0x3e   :  { %3210 = vmatpush1.bf16.msra.mxu0 %v8561_v62  ;;  %3374 = vmatpush1.bf16.msra.mxu1 %v8563_v63  ;;  %v223_v62 = vld [vmem:[%s13457_s1 + $0x5c0] sm:$0xff] }
  0x3f   :  { %3211 = vmatprep.subr.bf16.mxu0 %v8570_v0  ;;  %3375 = vmatprep.subr.bf16.mxu1 %v8572_v1  ;;  %v227_v63 = vld [vmem:[%s13457_s1 + $0x5e0] sm:$0xff]  ;;  %v224_v0 = vld [vmem:[%s13457_s1 + $0x5c8] sm:$0xff] }
  0x40   :  { %v228_v1 = vld [vmem:[%s13457_s1 + $0x5e8] sm:$0xff]  ;;  %v8634_v4 = vcombine.high %v223_v62, %v227_v63  ;;  %v8633_v10 = vcombine.low %v223_v62, %v227_v63 }
  0x41   :  { %v8636_v5 = vcombine.high %v224_v0, %v228_v1  ;;  %v8635_v11 = vcombine.low %v224_v0, %v228_v1 }
  0x42   :  { %3212 = vmatpush1.bf16.msra.mxu0 %v8569_v6  ;;  %3376 = vmatpush1.bf16.msra.mxu1 %v8571_v7  ;;  %v231_v6 = vld [vmem:[%s13457_s1 + $0x600] sm:$0xff] }
  0x43   :  { %3222 = vmatprep.subr.bf16.mxu0 %v8578_v8  ;;  %3386 = vmatprep.subr.bf16.mxu1 %v8580_v9  ;;  %v235_v7 = vld [vmem:[%s13457_s1 + $0x620] sm:$0xff]  ;;  %v232_v8 = vld [vmem:[%s13457_s1 + $0x608] sm:$0xff] }
  0x44   :  { %v236_v9 = vld [vmem:[%s13457_s1 + $0x628] sm:$0xff]  ;;  %v8642_v13 = vcombine.high %v231_v6, %v235_v7  ;;  %v8641_v19 = vcombine.low %v231_v6, %v235_v7 }
  0x45   :  { %3214 = vmatmul.mubr.bf16.vlgmr.msra.gmra.mrb[0].mxu0 %v10139_v12  ;;  %3378 = vmatmul.mubr.bf16.vlgmr.msra.gmra.mrb[0].mxu1 %v10139_v12  ;;  %v8644_v14 = vcombine.high %v232_v8, %v236_v9  ;;  %v8643_v20 = vcombine.low %v232_v8, %v236_v9 }
  0x46   :  { %3223 = vmatpush1.bf16.msra.mxu0 %v8577_v16  ;;  %3387 = vmatpush1.bf16.msra.mxu1 %v8579_v17  ;;  %v239_v16 = vld [vmem:[%s13457_s1 + $0x640] sm:$0xff] }
  0x47   :  { %3224 = vmatprep.subr.bf16.mxu0 %v8586_v53  ;;  %3388 = vmatprep.subr.bf16.mxu1 %v8588_v18  ;;  %v243_v17 = vld [vmem:[%s13457_s1 + $0x660] sm:$0xff]  ;;  %v240_v53 = vld [vmem:[%s13457_s1 + $0x648] sm:$0xff] }
  0x48   :  { %3254 = vmatprep.mubr.bf16.mxu0 %v10160_v21  ;;  %3418 = vmatprep.mubr.bf16.mxu1 %v10160_v21  ;;  %v244_v18 = vld [vmem:[%s13457_s1 + $0x668] sm:$0xff]  ;;  %v8650_v22 = vcombine.high %v239_v16, %v243_v17  ;;  %v8649_v28 = vcombine.low %v239_v16, %v243_v17 }
  0x49   :  { %v8652_v23 = vcombine.high %v240_v53, %v244_v18  ;;  %v8651_v29 = vcombine.low %v240_v53, %v244_v18 }
  0x4a   :  { %3225 = vmatpush1.bf16.msra.mxu0 %v8585_v24  ;;  %3389 = vmatpush1.bf16.msra.mxu1 %v8587_v25  ;;  %v247_v24 = vld [vmem:[%s13457_s1 + $0x680] sm:$0xff] }
  0x4b   :  { %3226 = vmatprep.subr.bf16.mxu0 %v8594_v26  ;;  %3390 = vmatprep.subr.bf16.mxu1 %v8596_v27  ;;  %v251_v25 = vld [vmem:[%s13457_s1 + $0x6a0] sm:$0xff]  ;;  %v248_v26 = vld [vmem:[%s13457_s1 + $0x688] sm:$0xff] }
  0x4c   :  { %v252_v27 = vld [vmem:[%s13457_s1 + $0x6a8] sm:$0xff]  ;;  %v8658_v30 = vcombine.high %v247_v24, %v251_v25  ;;  %v8657_v36 = vcombine.low %v247_v24, %v251_v25  ;;  %v10359_v25 = vld [vmem:[%s13458_s0 + $0x10] sm:$0xff] }
  0x4d   :  { %v8660_v31 = vcombine.high %v248_v26, %v252_v27  ;;  %v8659_v37 = vcombine.low %v248_v26, %v252_v27  ;;  %v308_v24 = vld [vmem:[%s13457_s1 + $0x868] sm:$0xff] }
  0x4e   :  { %3227 = vmatpush1.bf16.msra.mxu0 %v8593_v32  ;;  %3391 = vmatpush1.bf16.msra.mxu1 %v8595_v33  ;;  %v255_v32 = vld [vmem:[%s13457_s1 + $0x6c0] sm:$0xff] }
  0x4f   :  { %3228 = vmatprep.subr.bf16.mxu0 %v8602_v34  ;;  %3392 = vmatprep.subr.bf16.mxu1 %v8604_v35  ;;  %v259_v33 = vld [vmem:[%s13457_s1 + $0x6e0] sm:$0xff]  ;;  %v256_v34 = vld [vmem:[%s13457_s1 + $0x6c8] sm:$0xff] }
  0x50   :  { %v260_v35 = vld [vmem:[%s13457_s1 + $0x6e8] sm:$0xff]  ;;  %v8666_v38 = vcombine.high %v255_v32, %v259_v33  ;;  %v8665_v44 = vcombine.low %v255_v32, %v259_v33 }
  0x51   :  { %v8668_v39 = vcombine.high %v256_v34, %v260_v35  ;;  %v8667_v45 = vcombine.low %v256_v34, %v260_v35  ;;  %v312_v32 = vld [vmem:[%s13457_s1 + $0x888] sm:$0xff] }
  0x52   :  { %3229 = vmatpush1.bf16.msra.mxu0 %v8601_v40  ;;  %3393 = vmatpush1.bf16.msra.mxu1 %v8603_v41  ;;  %v263_v40 = vld [vmem:[%s13457_s1 + $0x700] sm:$0xff]  ;;  %v316_v33 = vld [vmem:[%s13457_s1 + $0x8a8] sm:$0xff] }
  0x53   :  { %3230 = vmatprep.subr.bf16.mxu0 %v8610_v42  ;;  %3394 = vmatprep.subr.bf16.mxu1 %v8612_v43  ;;  %v267_v41 = vld [vmem:[%s13457_s1 + $0x720] sm:$0xff]  ;;  %v264_v42 = vld [vmem:[%s13457_s1 + $0x708] sm:$0xff] }
  0x54   :  { %v268_v43 = vld [vmem:[%s13457_s1 + $0x728] sm:$0xff]  ;;  %v8674_v46 = vcombine.high %v263_v40, %v267_v41  ;;  %v8673_v52 = vcombine.low %v263_v40, %v267_v41 }
  0x55   :  { %v8676_v47 = vcombine.high %v264_v42, %v268_v43  ;;  %v8675_v54 = vcombine.low %v264_v42, %v268_v43  ;;  %v320_v40 = vld [vmem:[%s13457_s1 + $0x8c8] sm:$0xff]  ;;  %v8723_v43 = vcombine.low %v312_v32, %v316_v33 }
  0x56   :  { %3231 = vmatpush1.bf16.msra.mxu0 %v8609_v48  ;;  %3395 = vmatpush1.bf16.msra.mxu1 %v8611_v49  ;;  %v271_v48 = vld [vmem:[%s13457_s1 + $0x740] sm:$0xff]  ;;  %v324_v41 = vld [vmem:[%s13457_s1 + $0x8e8] sm:$0xff] }
  0x57   :  { %3232 = vmatprep.subr.bf16.mxu0 %v8618_v50  ;;  %3396 = vmatprep.subr.bf16.mxu1 %v8620_v51  ;;  %v275_v49 = vld [vmem:[%s13457_s1 + $0x760] sm:$0xff]  ;;  %v272_v50 = vld [vmem:[%s13457_s1 + $0x748] sm:$0xff] }
  0x58   :  { %v276_v51 = vld [vmem:[%s13457_s1 + $0x768] sm:$0xff]  ;;  %v8682_v55 = vcombine.high %v271_v48, %v275_v49  ;;  %v8681_v62 = vcombine.low %v271_v48, %v275_v49 }
  0x59   :  { %v8684_v56 = vcombine.high %v272_v50, %v276_v51  ;;  %v8683_v63 = vcombine.low %v272_v50, %v276_v51  ;;  %v328_v48 = vld [vmem:[%s13457_s1 + $0x908] sm:$0xff]  ;;  %v8731_v51 = vcombine.low %v320_v40, %v324_v41 }
  0x5a   :  { %3233 = vmatpush1.bf16.msra.mxu0 %v8617_v58  ;;  %3397 = vmatpush1.bf16.msra.mxu1 %v8619_v59  ;;  %v279_v58 = vld [vmem:[%s13457_s1 + $0x780] sm:$0xff]  ;;  %v332_v49 = vld [vmem:[%s13457_s1 + $0x928] sm:$0xff] }
  0x5b   :  { %3234 = vmatprep.subr.bf16.mxu0 %v8626_v60  ;;  %3398 = vmatprep.subr.bf16.mxu1 %v8628_v61  ;;  %v283_v59 = vld [vmem:[%s13457_s1 + $0x7a0] sm:$0xff]  ;;  %v280_v60 = vld [vmem:[%s13457_s1 + $0x788] sm:$0xff] }
  0x5c   :  { %v284_v61 = vld [vmem:[%s13457_s1 + $0x7a8] sm:$0xff]  ;;  %v8690_v0 = vcombine.high %v279_v58, %v283_v59  ;;  %v8689_v6 = vcombine.low %v279_v58, %v283_v59 }
  0x5d   :  { %v8692_v1 = vcombine.high %v280_v60, %v284_v61  ;;  %v8691_v7 = vcombine.low %v280_v60, %v284_v61  ;;  %v336_v58 = vld [vmem:[%s13457_s1 + $0x948] sm:$0xff]  ;;  %v8739_v61 = vcombine.low %v328_v48, %v332_v49 }
  0x5e   :  { %3235 = vmatpush1.bf16.msra.mxu0 %v8625_v2  ;;  %3399 = vmatpush1.bf16.msra.mxu1 %v8627_v3  ;;  %v287_v2 = vld [vmem:[%s13457_s1 + $0x7c0] sm:$0xff]  ;;  %v340_v59 = vld [vmem:[%s13457_s1 + $0x968] sm:$0xff] }
  0x5f   :  { %3236 = vmatprep.subr.bf16.mxu0 %v8634_v4  ;;  %3400 = vmatprep.subr.bf16.mxu1 %v8636_v5  ;;  %v291_v3 = vld [vmem:[%s13457_s1 + $0x7e0] sm:$0xff]  ;;  %v288_v4 = vld [vmem:[%s13457_s1 + $0x7c8] sm:$0xff] }
  0x60   :  { %v292_v5 = vld [vmem:[%s13457_s1 + $0x7e8] sm:$0xff]  ;;  %v8698_v8 = vcombine.high %v287_v2, %v291_v3  ;;  %v8697_v16 = vcombine.low %v287_v2, %v291_v3 }
  0x61   :  { %v8700_v9 = vcombine.high %v288_v4, %v292_v5  ;;  %v8699_v17 = vcombine.low %v288_v4, %v292_v5  ;;  %v344_v2 = vld [vmem:[%s13457_s1 + $0x988] sm:$0xff]  ;;  %v8747_v5 = vcombine.low %v336_v58, %v340_v59 }
  0x62   :  { %3237 = vmatpush1.bf16.msra.mxu0 %v8633_v10  ;;  %3401 = vmatpush1.bf16.msra.mxu1 %v8635_v11  ;;  %v295_v10 = vld [vmem:[%s13457_s1 + $0x800] sm:$0xff]  ;;  %v348_v3 = vld [vmem:[%s13457_s1 + $0x9a8] sm:$0xff] }
  0x63   :  { %3238 = vmatprep.subr.bf16.mxu0 %v8642_v13  ;;  %3402 = vmatprep.subr.bf16.mxu1 %v8644_v14  ;;  %v299_v11 = vld [vmem:[%s13457_s1 + $0x820] sm:$0xff]  ;;  %v296_v13 = vld [vmem:[%s13457_s1 + $0x808] sm:$0xff] }
  0x64   :  { %v300_v14 = vld [vmem:[%s13457_s1 + $0x828] sm:$0xff]  ;;  %v8706_v53 = vcombine.high %v295_v10, %v299_v11  ;;  %v8705_v26 = vcombine.low %v295_v10, %v299_v11 }
  0x65   :  { %v8708_v18 = vcombine.high %v296_v13, %v300_v14  ;;  %v8707_v27 = vcombine.low %v296_v13, %v300_v14  ;;  %v352_v10 = vld [vmem:[%s13457_s1 + $0x9c8] sm:$0xff]  ;;  %v8755_v14 = vcombine.low %v344_v2, %v348_v3 }
  0x66   :  { %3239 = vmatpush1.bf16.msra.mxu0 %v8641_v19  ;;  %3403 = vmatpush1.bf16.msra.mxu1 %v8643_v20  ;;  %v303_v19 = vld [vmem:[%s13457_s1 + $0x840] sm:$0xff]  ;;  %v356_v11 = vld [vmem:[%s13457_s1 + $0x9e8] sm:$0xff] }
  0x67   :  { %3240 = vmatprep.subr.bf16.mxu0 %v8650_v22  ;;  %3404 = vmatprep.subr.bf16.mxu1 %v8652_v23  ;;  %v307_v20 = vld [vmem:[%s13457_s1 + $0x860] sm:$0xff]  ;;  %v10348_v22 = vcombine.low %v10150_v15, %v10150_v15  ;;  %v304_v23 = vld [vmem:[%s13457_s1 + $0x848] sm:$0xff] }
  0x68   :  { %v8714_v15 = vcombine.high %v303_v19, %v307_v20  ;;  %v8713_v34 = vcombine.low %v303_v19, %v307_v20  ;;  %v8715_v35 = vcombine.low %v304_v23, %v308_v24  ;;  %v360_v19 = vld [vmem:[%s13457_s1 + $0xa08] sm:$0xff] }
  0x69   :  { %v364_v20 = vld [vmem:[%s13457_s1 + $0xa28] sm:$0xff] }
  0x6a   :  { %3241 = vmatpush1.bf16.msra.mxu0 %v8649_v28  ;;  %3405 = vmatpush1.bf16.msra.mxu1 %v8651_v29  ;;  %v8716_v28 = vcombine.high %v304_v23, %v308_v24  ;;  %v311_v29 = vld [vmem:[%s13457_s1 + $0x880] sm:$0xff]  ;;  %v8763_v24 = vcombine.low %v352_v10, %v356_v11 }
  0x6b   :  { %3242 = vmatprep.subr.bf16.mxu0 %v8658_v30  ;;  %3406 = vmatprep.subr.bf16.mxu1 %v8660_v31  ;;  %v315_v30 = vld [vmem:[%s13457_s1 + $0x8a0] sm:$0xff]  ;;  %v10369_v31 = vcombine.high %v10359_v25, %v10359_v25 }
  0x6c   :  { %v8721_v42 = vcombine.low %v311_v29, %v315_v30 }
  0x6e   :  { %3243 = vmatpush1.bf16.msra.mxu0 %v8657_v36  ;;  %3407 = vmatpush1.bf16.msra.mxu1 %v8659_v37  ;;  %v8722_v36 = vcombine.high %v311_v29, %v315_v30  ;;  %v8724_v37 = vcombine.high %v312_v32, %v316_v33  ;;  %v368_v29 = vld [vmem:[%s13457_s1 + $0xa48] sm:$0xff]  ;;  %v8771_v33 = vcombine.low %v360_v19, %v364_v20 }
  0x6f   :  { %3244 = vmatprep.subr.bf16.mxu0 %v8666_v38  ;;  %3408 = vmatprep.subr.bf16.mxu1 %v8668_v39  ;;  %v319_v38 = vld [vmem:[%s13457_s1 + $0x8c0] sm:$0xff]  ;;  %v372_v30 = vld [vmem:[%s13457_s1 + $0xa68] sm:$0xff] }
  0x70   :  { %v323_v39 = vld [vmem:[%s13457_s1 + $0x8e0] sm:$0xff] }
  0x71   :  { %v8729_v50 = vcombine.low %v319_v38, %v323_v39 }
  0x72   :  { %3245 = vmatpush1.bf16.msra.mxu0 %v8665_v44  ;;  %3409 = vmatpush1.bf16.msra.mxu1 %v8667_v45  ;;  %v8730_v44 = vcombine.high %v319_v38, %v323_v39  ;;  %v8732_v45 = vcombine.high %v320_v40, %v324_v41  ;;  %v376_v38 = vld [vmem:[%s13457_s1 + $0xa88] sm:$0xff]  ;;  %v8779_v41 = vcombine.low %v368_v29, %v372_v30 }
  0x73   :  { %3246 = vmatprep.subr.bf16.mxu0 %v8674_v46  ;;  %3410 = vmatprep.subr.bf16.mxu1 %v8676_v47  ;;  %v327_v46 = vld [vmem:[%s13457_s1 + $0x900] sm:$0xff]  ;;  %v380_v39 = vld [vmem:[%s13457_s1 + $0xaa8] sm:$0xff] }
  0x74   :  { %v331_v47 = vld [vmem:[%s13457_s1 + $0x920] sm:$0xff] }
  0x75   :  { %v8737_v60 = vcombine.low %v327_v46, %v331_v47 }
  0x76   :  { %3247 = vmatpush1.bf16.msra.mxu0 %v8673_v52  ;;  %3411 = vmatpush1.bf16.msra.mxu1 %v8675_v54  ;;  %v8738_v52 = vcombine.high %v327_v46, %v331_v47  ;;  %v8740_v54 = vcombine.high %v328_v48, %v332_v49  ;;  %v384_v46 = vld [vmem:[%s13457_s1 + $0xac8] sm:$0xff]  ;;  %v8787_v49 = vcombine.low %v376_v38, %v380_v39 }
  0x77   :  { %3248 = vmatprep.subr.bf16.mxu0 %v8682_v55  ;;  %3412 = vmatprep.subr.bf16.mxu1 %v8684_v56  ;;  %v335_v55 = vld [vmem:[%s13457_s1 + $0x940] sm:$0xff]  ;;  %v388_v47 = vld [vmem:[%s13457_s1 + $0xae8] sm:$0xff] }
  0x78   :  { %v339_v56 = vld [vmem:[%s13457_s1 + $0x960] sm:$0xff] }
  0x79   :  { %v8745_v4 = vcombine.low %v335_v55, %v339_v56 }
  0x7a   :  { %3249 = vmatpush1.bf16.msra.mxu0 %v8681_v62  ;;  %3413 = vmatpush1.bf16.msra.mxu1 %v8683_v63  ;;  %v8746_v62 = vcombine.high %v335_v55, %v339_v56  ;;  %v8748_v63 = vcombine.high %v336_v58, %v340_v59  ;;  %v392_v55 = vld [vmem:[%s13457_s1 + $0xb08] sm:$0xff]  ;;  %v8795_v59 = vcombine.low %v384_v46, %v388_v47 }
  0x7b   :  { %3250 = vmatprep.subr.bf16.mxu0 %v8690_v0  ;;  %3414 = vmatprep.subr.bf16.mxu1 %v8692_v1  ;;  %v343_v0 = vld [vmem:[%s13457_s1 + $0x980] sm:$0xff]  ;;  %v396_v56 = vld [vmem:[%s13457_s1 + $0xb28] sm:$0xff] }
  0x7c   :  { %v347_v1 = vld [vmem:[%s13457_s1 + $0x9a0] sm:$0xff] }
  0x7d   :  { %v8753_v13 = vcombine.low %v343_v0, %v347_v1 }
  0x7e   :  { %3251 = vmatpush1.bf16.msra.mxu0 %v8689_v6  ;;  %3415 = vmatpush1.bf16.msra.mxu1 %v8691_v7  ;;  %v8754_v6 = vcombine.high %v343_v0, %v347_v1  ;;  %v8756_v7 = vcombine.high %v344_v2, %v348_v3  ;;  %v400_v0 = vld [vmem:[%s13457_s1 + $0xb48] sm:$0xff]  ;;  %v8803_v3 = vcombine.low %v392_v55, %v396_v56 }
  0x7f   :  { %3252 = vmatprep.subr.bf16.mxu0 %v8698_v8  ;;  %3416 = vmatprep.subr.bf16.mxu1 %v8700_v9  ;;  %v351_v8 = vld [vmem:[%s13457_s1 + $0x9c0] sm:$0xff]  ;;  %v404_v1 = vld [vmem:[%s13457_s1 + $0xb68] sm:$0xff] }
  0x80   :  { %v355_v9 = vld [vmem:[%s13457_s1 + $0x9e0] sm:$0xff] }
  0x81   :  { %v8761_v23 = vcombine.low %v351_v8, %v355_v9 }
  0x82   :  { %3253 = vmatpush1.bf16.msra.mxu0 %v8697_v16  ;;  %3417 = vmatpush1.bf16.msra.mxu1 %v8699_v17  ;;  %v8762_v16 = vcombine.high %v351_v8, %v355_v9  ;;  %v8764_v17 = vcombine.high %v352_v10, %v356_v11  ;;  %v408_v8 = vld [vmem:[%s13457_s1 + $0xb88] sm:$0xff]  ;;  %v8811_v11 = vcombine.low %v400_v0, %v404_v1 }
  0x83   :  { %3263 = vmatprep.subr.bf16.mxu0 %v8706_v53  ;;  %3427 = vmatprep.subr.bf16.mxu1 %v8708_v18  ;;  %v359_v53 = vld [vmem:[%s13457_s1 + $0xa00] sm:$0xff]  ;;  %v412_v9 = vld [vmem:[%s13457_s1 + $0xba8] sm:$0xff] }
  0x84   :  { %v363_v18 = vld [vmem:[%s13457_s1 + $0xa20] sm:$0xff] }
  0x85   :  { %3255 = vmatmul.mubr.bf16.vlgmr.msra.gmra.mrb[0].mxu0 %v10348_v22  ;;  %3419 = vmatmul.mubr.bf16.vlgmr.msra.gmra.mrb[0].mxu1 %v10348_v22  ;;  %v8769_v32 = vcombine.low %v359_v53, %v363_v18 }
  0x86   :  { %3264 = vmatpush1.bf16.msra.mxu0 %v8705_v26  ;;  %3428 = vmatpush1.bf16.msra.mxu1 %v8707_v27  ;;  %v8770_v26 = vcombine.high %v359_v53, %v363_v18  ;;  %v8772_v27 = vcombine.high %v360_v19, %v364_v20  ;;  %v416_v53 = vld [vmem:[%s13457_s1 + $0xbc8] sm:$0xff]  ;;  %v8819_v20 = vcombine.low %v408_v8, %v412_v9 }
  0x87   :  { %3265 = vmatprep.subr.bf16.mxu0 %v8714_v15  ;;  %3429 = vmatprep.subr.bf16.mxu1 %v8716_v28  ;;  %v367_v15 = vld [vmem:[%s13457_s1 + $0xa40] sm:$0xff]  ;;  %v420_v18 = vld [vmem:[%s13457_s1 + $0xbe8] sm:$0xff] }
  0x88   :  { %3295 = vmatprep.mubr.bf16.mxu0 %v10369_v31  ;;  %3459 = vmatprep.mubr.bf16.mxu1 %v10369_v31  ;;  %v371_v28 = vld [vmem:[%s13457_s1 + $0xa60] sm:$0xff] }
  0x89   :  { %v8777_v40 = vcombine.low %v367_v15, %v371_v28 }
  0x8a   :  { %3266 = vmatpush1.bf16.msra.mxu0 %v8713_v34  ;;  %3430 = vmatpush1.bf16.msra.mxu1 %v8715_v35  ;;  %v8778_v34 = vcombine.high %v367_v15, %v371_v28  ;;  %v8780_v35 = vcombine.high %v368_v29, %v372_v30  ;;  %v424_v15 = vld [vmem:[%s13457_s1 + $0xc08] sm:$0xff]  ;;  %v8827_v30 = vcombine.low %v416_v53, %v420_v18 }
  0x8b   :  { %3267 = vmatprep.subr.bf16.mxu0 %v8722_v36  ;;  %3431 = vmatprep.subr.bf16.mxu1 %v8724_v37  ;;  %v375_v36 = vld [vmem:[%s13457_s1 + $0xa80] sm:$0xff]  ;;  %v428_v28 = vld [vmem:[%s13457_s1 + $0xc28] sm:$0xff] }
  0x8c   :  { %v379_v37 = vld [vmem:[%s13457_s1 + $0xaa0] sm:$0xff] }
  0x8d   :  { %v8785_v48 = vcombine.low %v375_v36, %v379_v37 }
  0x8e   :  { %3268 = vmatpush1.bf16.msra.mxu0 %v8721_v42  ;;  %3432 = vmatpush1.bf16.msra.mxu1 %v8723_v43  ;;  %v8786_v42 = vcombine.high %v375_v36, %v379_v37  ;;  %v8788_v43 = vcombine.high %v376_v38, %v380_v39  ;;  %v10557_v36 = vcombine.low %v10359_v25, %v10359_v25  ;;  %v432_v37 = vld [vmem:[%s13457_s1 + $0xc48] sm:$0xff]  ;;  %v10568_v39 = vld [vmem:[%s13458_s0 + $0x18] sm:$0xff] }
  0x8f   :  { %3269 = vmatprep.subr.bf16.mxu0 %v8730_v44  ;;  %3433 = vmatprep.subr.bf16.mxu1 %v8732_v45  ;;  %v383_v44 = vld [vmem:[%s13457_s1 + $0xac0] sm:$0xff]  ;;  %v436_v38 = vld [vmem:[%s13457_s1 + $0xc68] sm:$0xff] }
  0x90   :  { %v387_v45 = vld [vmem:[%s13457_s1 + $0xae0] sm:$0xff] }
  0x91   :  { %v8793_v58 = vcombine.low %v383_v44, %v387_v45 }
  0x92   :  { %3270 = vmatpush1.bf16.msra.mxu0 %v8729_v50  ;;  %3434 = vmatpush1.bf16.msra.mxu1 %v8731_v51  ;;  %v8794_v50 = vcombine.high %v383_v44, %v387_v45  ;;  %v8796_v51 = vcombine.high %v384_v46, %v388_v47  ;;  %v443_v44 = vld [vmem:[%s13457_s1 + $0xca0] sm:$0xff]  ;;  %v10578_v45 = vcombine.high %v10568_v39, %v10568_v39  ;;  %v440_v46 = vld [vmem:[%s13457_s1 + $0xc88] sm:$0xff] }
  0x93   :  { %3271 = vmatprep.subr.bf16.mxu0 %v8738_v52  ;;  %3435 = vmatprep.subr.bf16.mxu1 %v8740_v54  ;;  %v391_v52 = vld [vmem:[%s13457_s1 + $0xb00] sm:$0xff]  ;;  %v444_v47 = vld [vmem:[%s13457_s1 + $0xca8] sm:$0xff] }
  0x94   :  { %v395_v54 = vld [vmem:[%s13457_s1 + $0xb20] sm:$0xff] }
  0x95   :  { %v8801_v2 = vcombine.low %v391_v52, %v395_v54 }
  0x96   :  { %3272 = vmatpush1.bf16.msra.mxu0 %v8737_v60  ;;  %3436 = vmatpush1.bf16.msra.mxu1 %v8739_v61  ;;  %v8802_v60 = vcombine.high %v391_v52, %v395_v54  ;;  %v8804_v61 = vcombine.high %v392_v55, %v396_v56  ;;  %v447_v52 = vld [vmem:[%s13457_s1 + $0xcc0] sm:$0xff]  ;;  %v448_v55 = vld [vmem:[%s13457_s1 + $0xcc8] sm:$0xff] }
  0x97   :  { %3273 = vmatprep.subr.bf16.mxu0 %v8746_v62  ;;  %3437 = vmatprep.subr.bf16.mxu1 %v8748_v63  ;;  %v399_v62 = vld [vmem:[%s13457_s1 + $0xb40] sm:$0xff]  ;;  %v452_v56 = vld [vmem:[%s13457_s1 + $0xce8] sm:$0xff] }
  0x98   :  { %v403_v63 = vld [vmem:[%s13457_s1 + $0xb60] sm:$0xff] }
  0x99   :  { %v8809_v10 = vcombine.low %v399_v62, %v403_v63  ;;  %v451_v54 = vld [vmem:[%s13457_s1 + $0xce0] sm:$0xff] }
  0x9a   :  { %3274 = vmatpush1.bf16.msra.mxu0 %v8745_v4  ;;  %3438 = vmatpush1.bf16.msra.mxu1 %v8747_v5  ;;  %v8810_v4 = vcombine.high %v399_v62, %v403_v63  ;;  %v8812_v5 = vcombine.high %v400_v0, %v404_v1  ;;  %v455_v62 = vld [vmem:[%s13457_s1 + $0xd00] sm:$0xff]  ;;  %v456_v0 = vld [vmem:[%s13457_s1 + $0xd08] sm:$0xff] }
  0x9b   :  { %3275 = vmatprep.subr.bf16.mxu0 %v8754_v6  ;;  %3439 = vmatprep.subr.bf16.mxu1 %v8756_v7  ;;  %v407_v6 = vld [vmem:[%s13457_s1 + $0xb80] sm:$0xff]  ;;  %v460_v1 = vld [vmem:[%s13457_s1 + $0xd28] sm:$0xff] }
  0x9c   :  { %v411_v7 = vld [vmem:[%s13457_s1 + $0xba0] sm:$0xff] }
  0x9d   :  { %v8817_v19 = vcombine.low %v407_v6, %v411_v7  ;;  %v459_v63 = vld [vmem:[%s13457_s1 + $0xd20] sm:$0xff] }
  0x9e   :  { %3276 = vmatpush1.bf16.msra.mxu0 %v8753_v13  ;;  %3440 = vmatpush1.bf16.msra.mxu1 %v8755_v14  ;;  %v8818_v13 = vcombine.high %v407_v6, %v411_v7  ;;  %v8820_v14 = vcombine.high %v408_v8, %v412_v9  ;;  %v463_v6 = vld [vmem:[%s13457_s1 + $0xd40] sm:$0xff]  ;;  %v464_v8 = vld [vmem:[%s13457_s1 + $0xd48] sm:$0xff] }
  0x9f   :  { %3277 = vmatprep.subr.bf16.mxu0 %v8762_v16  ;;  %3441 = vmatprep.subr.bf16.mxu1 %v8764_v17  ;;  %v415_v16 = vld [vmem:[%s13457_s1 + $0xbc0] sm:$0xff]  ;;  %v468_v9 = vld [vmem:[%s13457_s1 + $0xd68] sm:$0xff] }
  0xa0   :  { %v419_v17 = vld [vmem:[%s13457_s1 + $0xbe0] sm:$0xff] }
  0xa1   :  { %v8825_v29 = vcombine.low %v415_v16, %v419_v17  ;;  %v467_v7 = vld [vmem:[%s13457_s1 + $0xd60] sm:$0xff] }
  0xa2   :  { %3278 = vmatpush1.bf16.msra.mxu0 %v8761_v23  ;;  %3442 = vmatpush1.bf16.msra.mxu1 %v8763_v24  ;;  %v8826_v23 = vcombine.high %v415_v16, %v419_v17  ;;  %v8828_v24 = vcombine.high %v416_v53, %v420_v18  ;;  %v471_v16 = vld [vmem:[%s13457_s1 + $0xd80] sm:$0xff]  ;;  %v472_v53 = vld [vmem:[%s13457_s1 + $0xd88] sm:$0xff] }
  0xa3   :  { %3279 = vmatprep.subr.bf16.mxu0 %v8770_v26  ;;  %3443 = vmatprep.subr.bf16.mxu1 %v8772_v27  ;;  %v423_v26 = vld [vmem:[%s13457_s1 + $0xc00] sm:$0xff]  ;;  %v476_v18 = vld [vmem:[%s13457_s1 + $0xda8] sm:$0xff] }
  0xa4   :  { %v427_v27 = vld [vmem:[%s13457_s1 + $0xc20] sm:$0xff] }
  0xa5   :  { %v475_v17 = vld [vmem:[%s13457_s1 + $0xda0] sm:$0xff] }
  0xa6   :  { %3280 = vmatpush1.bf16.msra.mxu0 %v8769_v32  ;;  %3444 = vmatpush1.bf16.msra.mxu1 %v8771_v33  ;;  %v8834_v32 = vcombine.high %v423_v26, %v427_v27  ;;  %v8836_v33 = vcombine.high %v424_v15, %v428_v28 }
  0xa7   :  { %3281 = vmatprep.subr.bf16.mxu0 %v8778_v34  ;;  %3445 = vmatprep.subr.bf16.mxu1 %v8780_v35  ;;  %v431_v34 = vld [vmem:[%s13457_s1 + $0xc40] sm:$0xff] }
  0xa8   :  { %v435_v35 = vld [vmem:[%s13457_s1 + $0xc60] sm:$0xff] }
  0xa9   :  { %v8842_v25 = vcombine.high %v431_v34, %v435_v35 }
  0xaa   :  { %3282 = vmatpush1.bf16.msra.mxu0 %v8777_v40  ;;  %3446 = vmatpush1.bf16.msra.mxu1 %v8779_v41  ;;  %v8833_v40 = vcombine.low %v423_v26, %v427_v27  ;;  %v8835_v41 = vcombine.low %v424_v15, %v428_v28  ;;  %v479_v26 = vld [vmem:[%s13457_s1 + $0xdc0] sm:$0xff]  ;;  %v480_v15 = vld [vmem:[%s13457_s1 + $0xdc8] sm:$0xff] }
  0xab   :  { %3283 = vmatprep.subr.bf16.mxu0 %v8786_v42  ;;  %3447 = vmatprep.subr.bf16.mxu1 %v8788_v43  ;;  %v8844_v42 = vcombine.high %v432_v37, %v436_v38  ;;  %v439_v43 = vld [vmem:[%s13457_s1 + $0xc80] sm:$0xff]  ;;  %v484_v28 = vld [vmem:[%s13457_s1 + $0xde8] sm:$0xff] }
  0xac   :  { %v483_v27 = vld [vmem:[%s13457_s1 + $0xde0] sm:$0xff] }
  0xae   :  { %3284 = vmatpush1.bf16.msra.mxu0 %v8785_v48  ;;  %3448 = vmatpush1.bf16.msra.mxu1 %v8787_v49  ;;  %v8841_v48 = vcombine.low %v431_v34, %v435_v35  ;;  %v8843_v49 = vcombine.low %v432_v37, %v436_v38  ;;  %v487_v34 = vld [vmem:[%s13457_s1 + $0xe00] sm:$0xff]  ;;  %v488_v37 = vld [vmem:[%s13457_s1 + $0xe08] sm:$0xff] }
  0xaf   :  { %3285 = vmatprep.subr.bf16.mxu0 %v8794_v50  ;;  %3449 = vmatprep.subr.bf16.mxu1 %v8796_v51  ;;  %v8850_v50 = vcombine.high %v439_v43, %v443_v44  ;;  %v8852_v51 = vcombine.high %v440_v46, %v444_v47  ;;  %v491_v35 = vld [vmem:[%s13457_s1 + $0xe20] sm:$0xff]  ;;  %v492_v38 = vld [vmem:[%s13457_s1 + $0xe28] sm:$0xff] }
  0xb2   :  { %3286 = vmatpush1.bf16.msra.mxu0 %v8793_v58  ;;  %3450 = vmatpush1.bf16.msra.mxu1 %v8795_v59  ;;  %v8849_v58 = vcombine.low %v439_v43, %v443_v44  ;;  %v8851_v59 = vcombine.low %v440_v46, %v444_v47  ;;  %v495_v43 = vld [vmem:[%s13457_s1 + $0xe40] sm:$0xff]  ;;  %v496_v46 = vld [vmem:[%s13457_s1 + $0xe48] sm:$0xff] }
  0xb3   :  { %3287 = vmatprep.subr.bf16.mxu0 %v8802_v60  ;;  %3451 = vmatprep.subr.bf16.mxu1 %v8804_v61  ;;  %v8858_v60 = vcombine.high %v447_v52, %v451_v54  ;;  %v8860_v61 = vcombine.high %v448_v55, %v452_v56  ;;  %v499_v44 = vld [vmem:[%s13457_s1 + $0xe60] sm:$0xff]  ;;  %v500_v47 = vld [vmem:[%s13457_s1 + $0xe68] sm:$0xff] }
  0xb6   :  { %3288 = vmatpush1.bf16.msra.mxu0 %v8801_v2  ;;  %3452 = vmatpush1.bf16.msra.mxu1 %v8803_v3  ;;  %v8857_v2 = vcombine.low %v447_v52, %v451_v54  ;;  %v8859_v3 = vcombine.low %v448_v55, %v452_v56  ;;  %v503_v52 = vld [vmem:[%s13457_s1 + $0xe80] sm:$0xff]  ;;  %v504_v55 = vld [vmem:[%s13457_s1 + $0xe88] sm:$0xff] }
  0xb7   :  { %3289 = vmatprep.subr.bf16.mxu0 %v8810_v4  ;;  %3453 = vmatprep.subr.bf16.mxu1 %v8812_v5  ;;  %v8866_v4 = vcombine.high %v455_v62, %v459_v63  ;;  %v8868_v5 = vcombine.high %v456_v0, %v460_v1  ;;  %v507_v54 = vld [vmem:[%s13457_s1 + $0xea0] sm:$0xff]  ;;  %v508_v56 = vld [vmem:[%s13457_s1 + $0xea8] sm:$0xff] }
  0xba   :  { %3290 = vmatpush1.bf16.msra.mxu0 %v8809_v10  ;;  %3454 = vmatpush1.bf16.msra.mxu1 %v8811_v11  ;;  %v8865_v10 = vcombine.low %v455_v62, %v459_v63  ;;  %v8867_v11 = vcombine.low %v456_v0, %v460_v1  ;;  %v511_v62 = vld [vmem:[%s13457_s1 + $0xec0] sm:$0xff]  ;;  %v512_v0 = vld [vmem:[%s13457_s1 + $0xec8] sm:$0xff] }
  0xbb   :  { %3291 = vmatprep.subr.bf16.mxu0 %v8818_v13  ;;  %3455 = vmatprep.subr.bf16.mxu1 %v8820_v14  ;;  %v8874_v13 = vcombine.high %v463_v6, %v467_v7  ;;  %v8876_v14 = vcombine.high %v464_v8, %v468_v9  ;;  %v515_v63 = vld [vmem:[%s13457_s1 + $0xee0] sm:$0xff]  ;;  %v516_v1 = vld [vmem:[%s13457_s1 + $0xee8] sm:$0xff] }
  0xbe   :  { %3292 = vmatpush1.bf16.msra.mxu0 %v8817_v19  ;;  %3456 = vmatpush1.bf16.msra.mxu1 %v8819_v20  ;;  %v8873_v19 = vcombine.low %v463_v6, %v467_v7  ;;  %v8875_v20 = vcombine.low %v464_v8, %v468_v9  ;;  %v519_v6 = vld [vmem:[%s13457_s1 + $0xf00] sm:$0xff]  ;;  %v520_v8 = vld [vmem:[%s13457_s1 + $0xf08] sm:$0xff] }
  0xbf   :  { %3293 = vmatprep.subr.bf16.mxu0 %v8826_v23  ;;  %3457 = vmatprep.subr.bf16.mxu1 %v8828_v24  ;;  %v8882_v23 = vcombine.high %v471_v16, %v475_v17  ;;  %v8884_v24 = vcombine.high %v472_v53, %v476_v18  ;;  %v523_v7 = vld [vmem:[%s13457_s1 + $0xf20] sm:$0xff]  ;;  %v524_v9 = vld [vmem:[%s13457_s1 + $0xf28] sm:$0xff] }
  0xc2   :  { %3294 = vmatpush1.bf16.msra.mxu0 %v8825_v29  ;;  %3458 = vmatpush1.bf16.msra.mxu1 %v8827_v30  ;;  %v8881_v29 = vcombine.low %v471_v16, %v475_v17  ;;  %v8883_v30 = vcombine.low %v472_v53, %v476_v18  ;;  %v527_v16 = vld [vmem:[%s13457_s1 + $0xf40] sm:$0xff]  ;;  %v528_v53 = vld [vmem:[%s13457_s1 + $0xf48] sm:$0xff] }
  0xc3   :  { %3304 = vmatprep.subr.bf16.mxu0 %v8834_v32  ;;  %3468 = vmatprep.subr.bf16.mxu1 %v8836_v33  ;;  %v8890_v32 = vcombine.high %v479_v26, %v483_v27  ;;  %v8892_v33 = vcombine.high %v480_v15, %v484_v28  ;;  %v531_v17 = vld [vmem:[%s13457_s1 + $0xf60] sm:$0xff]  ;;  %v532_v18 = vld [vmem:[%s13457_s1 + $0xf68] sm:$0xff] }
  0xc5   :  { %3296 = vmatmul.mubr.bf16.vlgmr.msra.gmra.mrb[0].mxu0 %v10557_v36  ;;  %3460 = vmatmul.mubr.bf16.vlgmr.msra.gmra.mrb[0].mxu1 %v10557_v36 }
  0xc6   :  { %3305 = vmatpush1.bf16.msra.mxu0 %v8833_v40  ;;  %3469 = vmatpush1.bf16.msra.mxu1 %v8835_v41  ;;  %v8889_v40 = vcombine.low %v479_v26, %v483_v27  ;;  %v8891_v41 = vcombine.low %v480_v15, %v484_v28  ;;  %v535_v26 = vld [vmem:[%s13457_s1 + $0xf80] sm:$0xff]  ;;  %v536_v15 = vld [vmem:[%s13457_s1 + $0xf88] sm:$0xff] }
  0xc7   :  { %3306 = vmatprep.subr.bf16.mxu0 %v8842_v25  ;;  %3470 = vmatprep.subr.bf16.mxu1 %v8844_v42  ;;  %v8898_v25 = vcombine.high %v487_v34, %v491_v35  ;;  %v8900_v42 = vcombine.high %v488_v37, %v492_v38  ;;  %v539_v27 = vld [vmem:[%s13457_s1 + $0xfa0] sm:$0xff]  ;;  %v540_v28 = vld [vmem:[%s13457_s1 + $0xfa8] sm:$0xff] }
  0xc8   :  { %3336 = vmatprep.mubr.bf16.mxu0 %v10578_v45  ;;  %3500 = vmatprep.mubr.bf16.mxu1 %v10578_v45 }
  0xca   :  { %3307 = vmatpush1.bf16.msra.mxu0 %v8841_v48  ;;  %3471 = vmatpush1.bf16.msra.mxu1 %v8843_v49  ;;  %v8897_v48 = vcombine.low %v487_v34, %v491_v35  ;;  %v8899_v49 = vcombine.low %v488_v37, %v492_v38  ;;  %v543_v34 = vld [vmem:[%s13457_s1 + $0xfc0] sm:$0xff]  ;;  %v544_v37 = vld [vmem:[%s13457_s1 + $0xfc8] sm:$0xff] }
  0xcb   :  { %3308 = vmatprep.subr.bf16.mxu0 %v8850_v50  ;;  %3472 = vmatprep.subr.bf16.mxu1 %v8852_v51  ;;  %v8906_v50 = vcombine.high %v495_v43, %v499_v44  ;;  %v8908_v51 = vcombine.high %v496_v46, %v500_v47  ;;  %v547_v35 = vld [vmem:[%s13457_s1 + $0xfe0] sm:$0xff]  ;;  %v548_v38 = vld [vmem:[%s13457_s1 + $0xfe8] sm:$0xff] }
  0xce   :  { %3309 = vmatpush1.bf16.msra.mxu0 %v8849_v58  ;;  %3473 = vmatpush1.bf16.msra.mxu1 %v8851_v59  ;;  %v8905_v58 = vcombine.low %v495_v43, %v499_v44  ;;  %v8907_v59 = vcombine.low %v496_v46, %v500_v47  ;;  %v41_v43 = vld [vmem:[%s13457_s1 + $0x10] sm:$0xff]  ;;  %v42_v46 = vld [vmem:[%s13457_s1 + $0x18] sm:$0xff] }
  0xcf   :  { %3310 = vmatprep.subr.bf16.mxu0 %v8858_v60  ;;  %3474 = vmatprep.subr.bf16.mxu1 %v8860_v61  ;;  %v8914_v60 = vcombine.high %v503_v52, %v507_v54  ;;  %v8916_v61 = vcombine.high %v504_v55, %v508_v56  ;;  %v45_v44 = vld [vmem:[%s13457_s1 + $0x30] sm:$0xff]  ;;  %v46_v47 = vld [vmem:[%s13457_s1 + $0x38] sm:$0xff] }
  0xd2   :  { %3311 = vmatpush1.bf16.msra.mxu0 %v8857_v2  ;;  %3475 = vmatpush1.bf16.msra.mxu1 %v8859_v3  ;;  %v8913_v2 = vcombine.low %v503_v52, %v507_v54  ;;  %v8915_v3 = vcombine.low %v504_v55, %v508_v56  ;;  %v49_v52 = vld [vmem:[%s13457_s1 + $0x50] sm:$0xff]  ;;  %v10766_v55 = vcombine.low %v10568_v39, %v10568_v39  ;;  %v50_v56 = vld [vmem:[%s13457_s1 + $0x58] sm:$0xff] }
  0xd3   :  { %3312 = vmatprep.subr.bf16.mxu0 %v8866_v4  ;;  %3476 = vmatprep.subr.bf16.mxu1 %v8868_v5  ;;  %v8922_v4 = vcombine.high %v511_v62, %v515_v63  ;;  %v8924_v5 = vcombine.high %v512_v0, %v516_v1  ;;  %v53_v54 = vld [vmem:[%s13457_s1 + $0x70] sm:$0xff] }
  0xd4   :  { %v57_v39 = vld [vmem:[%s13457_s1 + $0x90] sm:$0xff] }
  0xd6   :  { %3313 = vmatpush1.bf16.msra.mxu0 %v8865_v10  ;;  %3477 = vmatpush1.bf16.msra.mxu1 %v8867_v11  ;;  %v8921_v10 = vcombine.low %v511_v62, %v515_v63  ;;  %v8923_v11 = vcombine.low %v512_v0, %v516_v1  ;;  %v61_v63 = vld [vmem:[%s13457_s1 + $0xb0] sm:$0xff]  ;;  %v58_v0 = vld [vmem:[%s13457_s1 + $0x98] sm:$0xff] }
  0xd7   :  { %3314 = vmatprep.subr.bf16.mxu0 %v8874_v13  ;;  %3478 = vmatprep.subr.bf16.mxu1 %v8876_v14  ;;  %v8930_v13 = vcombine.high %v519_v6, %v523_v7  ;;  %v8932_v14 = vcombine.high %v520_v8, %v524_v9  ;;  %v62_v1 = vld [vmem:[%s13457_s1 + $0xb8] sm:$0xff] }
  0xda   :  { %3315 = vmatpush1.bf16.msra.mxu0 %v8873_v19  ;;  %3479 = vmatpush1.bf16.msra.mxu1 %v8875_v20  ;;  %v8929_v19 = vcombine.low %v519_v6, %v523_v7  ;;  %v8931_v20 = vcombine.low %v520_v8, %v524_v9  ;;  %v65_v6 = vld [vmem:[%s13457_s1 + $0xd0] sm:$0xff]  ;;  %v66_v8 = vld [vmem:[%s13457_s1 + $0xd8] sm:$0xff] }
  0xdb   :  { %3316 = vmatprep.subr.bf16.mxu0 %v8882_v23  ;;  %3480 = vmatprep.subr.bf16.mxu1 %v8884_v24  ;;  %v8938_v23 = vcombine.high %v527_v16, %v531_v17  ;;  %v8940_v24 = vcombine.high %v528_v53, %v532_v18  ;;  %v69_v7 = vld [vmem:[%s13457_s1 + $0xf0] sm:$0xff]  ;;  %v70_v9 = vld [vmem:[%s13457_s1 + $0xf8] sm:$0xff] }
  0xde   :  { %3317 = vmatpush1.bf16.msra.mxu0 %v8881_v29  ;;  %3481 = vmatpush1.bf16.msra.mxu1 %v8883_v30  ;;  %v8937_v29 = vcombine.low %v527_v16, %v531_v17  ;;  %v8939_v30 = vcombine.low %v528_v53, %v532_v18  ;;  %v73_v16 = vld [vmem:[%s13457_s1 + $0x110] sm:$0xff]  ;;  %v78_v53 = vld [vmem:[%s13457_s1 + $0x138] sm:$0xff]  ;;  %v8477_v18 = vcombine.low %v65_v6, %v69_v7 }
  0xdf   :  { %3318 = vmatprep.subr.bf16.mxu0 %v8890_v32  ;;  %3482 = vmatprep.subr.bf16.mxu1 %v8892_v33  ;;  %v8946_v32 = vcombine.high %v535_v26, %v539_v27  ;;  %v8948_v33 = vcombine.high %v536_v15, %v540_v28  ;;  %v77_v17 = vld [vmem:[%s13457_s1 + $0x130] sm:$0xff] }
  0xe2   :  { %3319 = vmatpush1.bf16.msra.mxu0 %v8889_v40  ;;  %3483 = vmatpush1.bf16.msra.mxu1 %v8891_v41  ;;  %v8945_v40 = vcombine.low %v535_v26, %v539_v27  ;;  %v8947_v41 = vcombine.low %v536_v15, %v540_v28  ;;  %v85_v26 = vld [vmem:[%s13457_s1 + $0x170] sm:$0xff]  ;;  %v82_v27 = vld [vmem:[%s13457_s1 + $0x158] sm:$0xff]  ;;  %v8485_v28 = vcombine.low %v73_v16, %v77_v17 }
  0xe3   :  { %3320 = vmatprep.subr.bf16.mxu0 %v8898_v25  ;;  %3484 = vmatprep.subr.bf16.mxu1 %v8900_v42  ;;  %v8954_v25 = vcombine.high %v543_v34, %v547_v35  ;;  %v8956_v42 = vcombine.high %v544_v37, %v548_v38  ;;  %v86_v15 = vld [vmem:[%s13457_s1 + $0x178] sm:$0xff] }
  0xe6   :  { %3321 = vmatpush1.bf16.msra.mxu0 %v8897_v48  ;;  %3485 = vmatpush1.bf16.msra.mxu1 %v8899_v49  ;;  %v8953_v48 = vcombine.low %v543_v34, %v547_v35  ;;  %v8955_v49 = vcombine.low %v544_v37, %v548_v38  ;;  %v93_v34 = vld [vmem:[%s13457_s1 + $0x1b0] sm:$0xff]  ;;  %v90_v35 = vld [vmem:[%s13457_s1 + $0x198] sm:$0xff] }
  0xe7   :  { %3322 = vmatprep.subr.bf16.mxu0 %v8906_v50  ;;  %3486 = vmatprep.subr.bf16.mxu1 %v8908_v51  ;;  %v8454_v50 = vcombine.high %v41_v43, %v45_v44  ;;  %v8456_v51 = vcombine.high %v42_v46, %v46_v47  ;;  %v94_v37 = vld [vmem:[%s13457_s1 + $0x1b8] sm:$0xff] }
  0xea   :  { %3323 = vmatpush1.bf16.msra.mxu0 %v8905_v58  ;;  %3487 = vmatpush1.bf16.msra.mxu1 %v8907_v59  ;;  %v54_v58 = vld [vmem:[%s13457_s1 + $0x78] sm:$0xff]  ;;  %v8453_v59 = vcombine.low %v41_v43, %v45_v44  ;;  %v101_v43 = vld [vmem:[%s13457_s1 + $0x1f0] sm:$0xff] }
  0xeb   :  { %3324 = vmatprep.subr.bf16.mxu0 %v8914_v60  ;;  %3488 = vmatprep.subr.bf16.mxu1 %v8916_v61  ;;  %v8455_v60 = vcombine.low %v42_v46, %v46_v47  ;;  %v8462_v61 = vcombine.high %v49_v52, %v53_v54  ;;  %v8464_v62 = vcombine.high %v50_v56, %v54_v58  ;;  %v98_v44 = vld [vmem:[%s13457_s1 + $0x1d8] sm:$0xff] }
  0xec   :  { %v102_v46 = vld [vmem:[%s13457_s1 + $0x1f8] sm:$0xff] }
  0xee   :  { %3325 = vmatpush1.bf16.msra.mxu0 %v8913_v2  ;;  %3489 = vmatpush1.bf16.msra.mxu1 %v8915_v3  ;;  %v8461_v2 = vcombine.low %v49_v52, %v53_v54  ;;  %v8463_v3 = vcombine.low %v50_v56, %v54_v58  ;;  %v109_v52 = vld [vmem:[%s13457_s1 + $0x230] sm:$0xff]  ;;  %v106_v54 = vld [vmem:[%s13457_s1 + $0x218] sm:$0xff] }
  0xef   :  { %3326 = vmatprep.subr.bf16.mxu0 %v8922_v4  ;;  %3490 = vmatprep.subr.bf16.mxu1 %v8924_v5  ;;  %v8470_v4 = vcombine.high %v57_v39, %v61_v63  ;;  %v8472_v5 = vcombine.high %v58_v0, %v62_v1  ;;  %v110_v56 = vld [vmem:[%s13457_s1 + $0x238] sm:$0xff] }
  0xf2   :  { %3327 = vmatpush1.bf16.msra.mxu0 %v8921_v10  ;;  %3491 = vmatpush1.bf16.msra.mxu1 %v8923_v11  ;;  %v8469_v10 = vcombine.low %v57_v39, %v61_v63  ;;  %v8471_v11 = vcombine.low %v58_v0, %v62_v1  ;;  %v117_v39 = vld [vmem:[%s13457_s1 + $0x270] sm:$0xff]  ;;  %v114_v63 = vld [vmem:[%s13457_s1 + $0x258] sm:$0xff] }
  0xf3   :  { %3328 = vmatprep.subr.bf16.mxu0 %v8930_v13  ;;  %3492 = vmatprep.subr.bf16.mxu1 %v8932_v14  ;;  %v8478_v13 = vcombine.high %v65_v6, %v69_v7  ;;  %v8480_v14 = vcombine.high %v66_v8, %v70_v9  ;;  %v118_v0 = vld [vmem:[%s13457_s1 + $0x278] sm:$0xff]  ;;  %v125_v6 = vld [vmem:[%s13457_s1 + $0x2b0] sm:$0xff] }
  0xf4   :  { %v122_v7 = vld [vmem:[%s13457_s1 + $0x298] sm:$0xff] }
  0xf6   :  { %3329 = vmatpush1.bf16.msra.mxu0 %v8929_v19  ;;  %3493 = vmatpush1.bf16.msra.mxu1 %v8931_v20  ;;  %v8479_v19 = vcombine.low %v66_v8, %v70_v9  ;;  %v8486_v20 = vcombine.high %v73_v16, %v77_v17  ;;  %v126_v8 = vld [vmem:[%s13457_s1 + $0x2b8] sm:$0xff]  ;;  %v133_v16 = vld [vmem:[%s13457_s1 + $0x2f0] sm:$0xff] }
  0xf7   :  { %3330 = vmatprep.subr.bf16.mxu0 %v8938_v23  ;;  %3494 = vmatprep.subr.bf16.mxu1 %v8940_v24  ;;  %v81_v24 = vld [vmem:[%s13457_s1 + $0x150] sm:$0xff]  ;;  %v130_v17 = vld [vmem:[%s13457_s1 + $0x2d8] sm:$0xff] }
  0xf8   :  { %v8493_v38 = vcombine.low %v81_v24, %v85_v26 }
  0xfa   :  { %3331 = vmatpush1.bf16.msra.mxu0 %v8937_v29  ;;  %3495 = vmatpush1.bf16.msra.mxu1 %v8939_v30  ;;  %v8494_v30 = vcombine.high %v81_v24, %v85_v26  ;;  %v141_v24 = vld [vmem:[%s13457_s1 + $0x330] sm:$0xff]  ;;  %v138_v26 = vld [vmem:[%s13457_s1 + $0x318] sm:$0xff] }
  0xfb   :  { %3332 = vmatprep.subr.bf16.mxu0 %v8946_v32  ;;  %3496 = vmatprep.subr.bf16.mxu1 %v8948_v33  ;;  %v8496_v32 = vcombine.high %v82_v27, %v86_v15  ;;  %v89_v33 = vld [vmem:[%s13457_s1 + $0x190] sm:$0xff] }
  0xfc   :  { %v8501_v47 = vcombine.low %v89_v33, %v93_v34 }
  0xfe   :  { %3333 = vmatpush1.bf16.msra.mxu0 %v8945_v40  ;;  %3497 = vmatpush1.bf16.msra.mxu1 %v8947_v41  ;;  %v8495_v40 = vcombine.low %v82_v27, %v86_v15  ;;  %v8502_v41 = vcombine.high %v89_v33, %v93_v34  ;;  %v142_v27 = vld [vmem:[%s13457_s1 + $0x338] sm:$0xff]  ;;  %v149_v33 = vld [vmem:[%s13457_s1 + $0x370] sm:$0xff] }
  0xff   :  { %3334 = vmatprep.subr.bf16.mxu0 %v8954_v25  ;;  %3498 = vmatprep.subr.bf16.mxu1 %v8956_v42  ;;  %v8504_v25 = vcombine.high %v90_v35, %v94_v37  ;;  %v97_v42 = vld [vmem:[%s13457_s1 + $0x1d0] sm:$0xff]  ;;  %v146_v34 = vld [vmem:[%s13457_s1 + $0x358] sm:$0xff] }
 0x100   :  { %v8509_v58 = vcombine.low %v97_v42, %v101_v43 }
 0x102   :  { %3335 = vmatpush1.bf16.msra.mxu0 %v8953_v48  ;;  %3499 = vmatpush1.bf16.msra.mxu1 %v8955_v49  ;;  %v8503_v48 = vcombine.low %v90_v35, %v94_v37  ;;  %v8510_v49 = vcombine.high %v97_v42, %v101_v43  ;;  %v150_v35 = vld [vmem:[%s13457_s1 + $0x378] sm:$0xff]  ;;  %v157_v42 = vld [vmem:[%s13457_s1 + $0x3b0] sm:$0xff] }
 0x103   :  { %3509 = vmatprep.subr.bf16.mxu0 %v8454_v50  ;;  %3673 = vmatprep.subr.bf16.mxu1 %v8456_v51  ;;  %v8512_v50 = vcombine.high %v98_v44, %v102_v46  ;;  %v105_v51 = vld [vmem:[%s13457_s1 + $0x210] sm:$0xff]  ;;  %v154_v43 = vld [vmem:[%s13457_s1 + $0x398] sm:$0xff] }
 0x104   :  { %v8517_v1 = vcombine.low %v105_v51, %v109_v52 }
 0x105   :  { %3337 = vmatmul.mubr.bf16.vlgmr.msra.gmra.mrb[0].mxu0 %v10766_v55  ;;  %3501 = vmatmul.mubr.bf16.vlgmr.msra.gmra.mrb[0].mxu1 %v10766_v55 }
 0x106   :  { %3510 = vmatpush1.bf16.msra.mxu0 %v8453_v59  ;;  %3674 = vmatpush1.bf16.msra.mxu1 %v8455_v60  ;;  %v8511_v59 = vcombine.low %v98_v44, %v102_v46  ;;  %v8518_v60 = vcombine.high %v105_v51, %v109_v52  ;;  %v158_v44 = vld [vmem:[%s13457_s1 + $0x3b8] sm:$0xff]  ;;  %v165_v51 = vld [vmem:[%s13457_s1 + $0x3f0] sm:$0xff] }
 0x107   :  { %3511 = vmatprep.subr.bf16.mxu0 %v8462_v61  ;;  %3675 = vmatprep.subr.bf16.mxu1 %v8464_v62  ;;  %v8520_v61 = vcombine.high %v106_v54, %v110_v56  ;;  %v113_v62 = vld [vmem:[%s13457_s1 + $0x250] sm:$0xff]  ;;  %v162_v52 = vld [vmem:[%s13457_s1 + $0x3d8] sm:$0xff] }
 0x108   :  { %3541 = vmatprep.mubr.bf16.mxu0 %v10013_v57  ;;  %3705 = vmatprep.mubr.bf16.mxu1 %v10013_v57  ;;  %v74_v57 = vld [vmem:[%s13457_s1 + $0x118] sm:$0xff]  ;;  %v8525_v9 = vcombine.low %v113_v62, %v117_v39 }
 0x109   :  { %v8488_v23 = vcombine.high %v74_v57, %v78_v53  ;;  %v8487_v29 = vcombine.low %v74_v57, %v78_v53  ;;  %v134_v57 = vld [vmem:[%s13457_s1 + $0x2f8] sm:$0xff] }
 0x10a   :  { %3512 = vmatpush1.bf16.msra.mxu0 %v8461_v2  ;;  %3676 = vmatpush1.bf16.msra.mxu1 %v8463_v3  ;;  %v8519_v2 = vcombine.low %v106_v54, %v110_v56  ;;  %v8526_v3 = vcombine.high %v113_v62, %v117_v39  ;;  %v166_v54 = vld [vmem:[%s13457_s1 + $0x3f8] sm:$0xff]  ;;  %v173_v62 = vld [vmem:[%s13457_s1 + $0x430] sm:$0xff] }
 0x10b   :  { %3513 = vmatprep.subr.bf16.mxu0 %v8470_v4  ;;  %3677 = vmatprep.subr.bf16.mxu1 %v8472_v5  ;;  %v8528_v4 = vcombine.high %v114_v63, %v118_v0  ;;  %v121_v5 = vld [vmem:[%s13457_s1 + $0x290] sm:$0xff]  ;;  %v170_v39 = vld [vmem:[%s13457_s1 + $0x418] sm:$0xff] }
 0x10c   :  { %v8533_v53 = vcombine.low %v121_v5, %v125_v6 }
 0x10e   :  { %3514 = vmatpush1.bf16.msra.mxu0 %v8469_v10  ;;  %3678 = vmatpush1.bf16.msra.mxu1 %v8471_v11  ;;  %v8527_v10 = vcombine.low %v114_v63, %v118_v0  ;;  %v8534_v11 = vcombine.high %v121_v5, %v125_v6  ;;  %v174_v63 = vld [vmem:[%s13457_s1 + $0x438] sm:$0xff]  ;;  %v181_v5 = vld [vmem:[%s13457_s1 + $0x470] sm:$0xff] }
 0x10f   :  { %3515 = vmatprep.subr.bf16.mxu0 %v8478_v13  ;;  %3679 = vmatprep.subr.bf16.mxu1 %v8480_v14  ;;  %v8536_v13 = vcombine.high %v122_v7, %v126_v8  ;;  %v129_v14 = vld [vmem:[%s13457_s1 + $0x2d0] sm:$0xff]  ;;  %v178_v6 = vld [vmem:[%s13457_s1 + $0x458] sm:$0xff] }
 0x110   :  { %v8541_v15 = vcombine.low %v129_v14, %v133_v16 }
 0x112   :  { %3516 = vmatpush1.bf16.msra.mxu0 %v8477_v18  ;;  %3680 = vmatpush1.bf16.msra.mxu1 %v8479_v19  ;;  %v8535_v18 = vcombine.low %v122_v7, %v126_v8  ;;  %v8542_v19 = vcombine.high %v129_v14, %v133_v16  ;;  %v182_v7 = vld [vmem:[%s13457_s1 + $0x478] sm:$0xff]  ;;  %v189_v14 = vld [vmem:[%s13457_s1 + $0x4b0] sm:$0xff] }
 0x113   :  { %3517 = vmatprep.subr.bf16.mxu0 %v8486_v20  ;;  %3681 = vmatprep.subr.bf16.mxu1 %v8488_v23  ;;  %v8544_v20 = vcombine.high %v130_v17, %v134_v57  ;;  %v137_v23 = vld [vmem:[%s13457_s1 + $0x310] sm:$0xff]  ;;  %v186_v16 = vld [vmem:[%s13457_s1 + $0x498] sm:$0xff] }
 0x114   :  { %v8549_v37 = vcombine.low %v137_v23, %v141_v24 }
 0x116   :  { %3518 = vmatpush1.bf16.msra.mxu0 %v8485_v28  ;;  %3682 = vmatpush1.bf16.msra.mxu1 %v8487_v29  ;;  %v8543_v28 = vcombine.low %v130_v17, %v134_v57  ;;  %v8550_v29 = vcombine.high %v137_v23, %v141_v24  ;;  %v190_v17 = vld [vmem:[%s13457_s1 + $0x4b8] sm:$0xff]  ;;  %v197_v23 = vld [vmem:[%s13457_s1 + $0x4f0] sm:$0xff] }
 0x117   :  { %3519 = vmatprep.subr.bf16.mxu0 %v8494_v30  ;;  %3683 = vmatprep.subr.bf16.mxu1 %v8496_v32  ;;  %v8552_v30 = vcombine.high %v138_v26, %v142_v27  ;;  %v145_v32 = vld [vmem:[%s13457_s1 + $0x350] sm:$0xff]  ;;  %v198_v24 = vld [vmem:[%s13457_s1 + $0x4f8] sm:$0xff] }
 0x118   :  { %v8557_v46 = vcombine.low %v145_v32, %v149_v33 }
 0x11a   :  { %3520 = vmatpush1.bf16.msra.mxu0 %v8493_v38  ;;  %3684 = vmatpush1.bf16.msra.mxu1 %v8495_v40  ;;  %v8551_v38 = vcombine.low %v138_v26, %v142_v27  ;;  %v8558_v40 = vcombine.high %v145_v32, %v149_v33  ;;  %v8599_v27 = vcombine.low %v186_v16, %v190_v17  ;;  %v206_v32 = vld [vmem:[%s13457_s1 + $0x538] sm:$0xff] }
 0x11b   :  { %3521 = vmatprep.subr.bf16.mxu0 %v8502_v41  ;;  %3685 = vmatprep.subr.bf16.mxu1 %v8504_v25  ;;  %v8560_v41 = vcombine.high %v146_v34, %v150_v35  ;;  %v153_v25 = vld [vmem:[%s13457_s1 + $0x390] sm:$0xff] }
 0x11c   :  { %v8565_v56 = vcombine.low %v153_v25, %v157_v42 }
 0x11e   :  { %3522 = vmatpush1.bf16.msra.mxu0 %v8501_v47  ;;  %3686 = vmatpush1.bf16.msra.mxu1 %v8503_v48  ;;  %v8559_v47 = vcombine.low %v146_v34, %v150_v35  ;;  %v8566_v48 = vcombine.high %v153_v25, %v157_v42  ;;  %v214_v25 = vld [vmem:[%s13457_s1 + $0x578] sm:$0xff] }
 0x11f   :  { %3523 = vmatprep.subr.bf16.mxu0 %v8510_v49  ;;  %3687 = vmatprep.subr.bf16.mxu1 %v8512_v50  ;;  %v8568_v49 = vcombine.high %v154_v43, %v158_v44  ;;  %v161_v50 = vld [vmem:[%s13457_s1 + $0x3d0] sm:$0xff] }
 0x120   :  { %v8573_v0 = vcombine.low %v161_v50, %v165_v51 }
 0x122   :  { %3524 = vmatpush1.bf16.msra.mxu0 %v8509_v58  ;;  %3688 = vmatpush1.bf16.msra.mxu1 %v8511_v59  ;;  %v8567_v58 = vcombine.low %v154_v43, %v158_v44  ;;  %v8574_v59 = vcombine.high %v161_v50, %v165_v51  ;;  %v222_v50 = vld [vmem:[%s13457_s1 + $0x5b8] sm:$0xff] }
 0x123   :  { %3525 = vmatprep.subr.bf16.mxu0 %v8518_v60  ;;  %3689 = vmatprep.subr.bf16.mxu1 %v8520_v61  ;;  %v8576_v60 = vcombine.high %v162_v52, %v166_v54  ;;  %v169_v61 = vld [vmem:[%s13457_s1 + $0x410] sm:$0xff] }
 0x124   :  { %v8581_v8 = vcombine.low %v169_v61, %v173_v62 }
 0x126   :  { %3526 = vmatpush1.bf16.msra.mxu0 %v8517_v1  ;;  %3690 = vmatpush1.bf16.msra.mxu1 %v8519_v2  ;;  %v8575_v1 = vcombine.low %v162_v52, %v166_v54  ;;  %v8582_v2 = vcombine.high %v169_v61, %v173_v62  ;;  %v230_v61 = vld [vmem:[%s13457_s1 + $0x5f8] sm:$0xff] }
 0x127   :  { %3527 = vmatprep.subr.bf16.mxu0 %v8526_v3  ;;  %3691 = vmatprep.subr.bf16.mxu1 %v8528_v4  ;;  %v8584_v3 = vcombine.high %v170_v39, %v174_v63  ;;  %v177_v4 = vld [vmem:[%s13457_s1 + $0x450] sm:$0xff] }
 0x128   :  { %v8589_v57 = vcombine.low %v177_v4, %v181_v5 }
 0x12a   :  { %3528 = vmatpush1.bf16.msra.mxu0 %v8525_v9  ;;  %3692 = vmatpush1.bf16.msra.mxu1 %v8527_v10  ;;  %v8583_v9 = vcombine.low %v170_v39, %v174_v63  ;;  %v8590_v10 = vcombine.high %v177_v4, %v181_v5  ;;  %v238_v4 = vld [vmem:[%s13457_s1 + $0x638] sm:$0xff] }
 0x12b   :  { %3529 = vmatprep.subr.bf16.mxu0 %v8534_v11  ;;  %3693 = vmatprep.subr.bf16.mxu1 %v8536_v13  ;;  %v8592_v11 = vcombine.high %v178_v6, %v182_v7  ;;  %v185_v13 = vld [vmem:[%s13457_s1 + $0x490] sm:$0xff] }
 0x12c   :  { %v8597_v26 = vcombine.low %v185_v13, %v189_v14 }
 0x12e   :  { %3530 = vmatpush1.bf16.msra.mxu0 %v8533_v53  ;;  %3694 = vmatpush1.bf16.msra.mxu1 %v8535_v18  ;;  %v8591_v53 = vcombine.low %v178_v6, %v182_v7  ;;  %v8598_v18 = vcombine.high %v185_v13, %v189_v14  ;;  %v246_v13 = vld [vmem:[%s13457_s1 + $0x678] sm:$0xff] }
 0x12f   :  { %3531 = vmatprep.subr.bf16.mxu0 %v8542_v19  ;;  %3695 = vmatprep.subr.bf16.mxu1 %v8544_v20  ;;  %v8600_v19 = vcombine.high %v186_v16, %v190_v17  ;;  %v193_v20 = vld [vmem:[%s13457_s1 + $0x4d0] sm:$0xff] }
 0x130   :  { %v8605_v33 = vcombine.low %v193_v20, %v197_v23 }
 0x132   :  { %3532 = vmatpush1.bf16.msra.mxu0 %v8541_v15  ;;  %3696 = vmatpush1.bf16.msra.mxu1 %v8543_v28  ;;  %v8606_v15 = vcombine.high %v193_v20, %v197_v23  ;;  %v254_v20 = vld [vmem:[%s13457_s1 + $0x6b8] sm:$0xff] }
 0x133   :  { %3533 = vmatprep.subr.bf16.mxu0 %v8550_v29  ;;  %3697 = vmatprep.subr.bf16.mxu1 %v8552_v30  ;;  %v201_v29 = vld [vmem:[%s13457_s1 + $0x510] sm:$0xff] }
 0x134   :  { %v205_v30 = vld [vmem:[%s13457_s1 + $0x530] sm:$0xff] }
 0x135   :  { %v8614_v35 = vcombine.high %v201_v29, %v205_v30  ;;  %v8613_v42 = vcombine.low %v201_v29, %v205_v30  ;;  %v262_v29 = vld [vmem:[%s13457_s1 + $0x6f8] sm:$0xff] }
 0x136   :  { %3534 = vmatpush1.bf16.msra.mxu0 %v8549_v37  ;;  %3698 = vmatpush1.bf16.msra.mxu1 %v8551_v38  ;;  %v209_v38 = vld [vmem:[%s13457_s1 + $0x550] sm:$0xff] }
 0x137   :  { %3535 = vmatprep.subr.bf16.mxu0 %v8558_v40  ;;  %3699 = vmatprep.subr.bf16.mxu1 %v8560_v41  ;;  %v213_v40 = vld [vmem:[%s13457_s1 + $0x570] sm:$0xff]  ;;  %v210_v41 = vld [vmem:[%s13457_s1 + $0x558] sm:$0xff] }
 0x138   :  { %v8622_v44 = vcombine.high %v209_v38, %v213_v40  ;;  %v8621_v51 = vcombine.low %v209_v38, %v213_v40  ;;  %v8623_v52 = vcombine.low %v210_v41, %v214_v25  ;;  %v270_v38 = vld [vmem:[%s13457_s1 + $0x738] sm:$0xff] }
 0x13a   :  { %3536 = vmatpush1.bf16.msra.mxu0 %v8557_v46  ;;  %3700 = vmatpush1.bf16.msra.mxu1 %v8559_v47  ;;  %v8624_v46 = vcombine.high %v210_v41, %v214_v25  ;;  %v217_v47 = vld [vmem:[%s13457_s1 + $0x590] sm:$0xff] }
 0x13b   :  { %3537 = vmatprep.subr.bf16.mxu0 %v8566_v48  ;;  %3701 = vmatprep.subr.bf16.mxu1 %v8568_v49  ;;  %v221_v48 = vld [vmem:[%s13457_s1 + $0x5b0] sm:$0xff]  ;;  %v218_v49 = vld [vmem:[%s13457_s1 + $0x598] sm:$0xff] }
 0x13c   :  { %v8630_v54 = vcombine.high %v217_v47, %v221_v48  ;;  %v8629_v62 = vcombine.low %v217_v47, %v221_v48  ;;  %v8631_v39 = vcombine.low %v218_v49, %v222_v50  ;;  %v278_v47 = vld [vmem:[%s13457_s1 + $0x778] sm:$0xff] }
 0x13e   :  { %3538 = vmatpush1.bf16.msra.mxu0 %v8565_v56  ;;  %3702 = vmatpush1.bf16.msra.mxu1 %v8567_v58  ;;  %v8632_v56 = vcombine.high %v218_v49, %v222_v50  ;;  %v225_v58 = vld [vmem:[%s13457_s1 + $0x5d0] sm:$0xff] }
 0x13f   :  { %3539 = vmatprep.subr.bf16.mxu0 %v8574_v59  ;;  %3703 = vmatprep.subr.bf16.mxu1 %v8576_v60  ;;  %v229_v59 = vld [vmem:[%s13457_s1 + $0x5f0] sm:$0xff]  ;;  %v226_v60 = vld [vmem:[%s13457_s1 + $0x5d8] sm:$0xff] }
 0x140   :  { %v8638_v63 = vcombine.high %v225_v58, %v229_v59  ;;  %v8637_v5 = vcombine.low %v225_v58, %v229_v59  ;;  %v8639_v6 = vcombine.low %v226_v60, %v230_v61  ;;  %v286_v58 = vld [vmem:[%s13457_s1 + $0x7b8] sm:$0xff] }
 0x142   :  { %3540 = vmatpush1.bf16.msra.mxu0 %v8573_v0  ;;  %3704 = vmatpush1.bf16.msra.mxu1 %v8575_v1  ;;  %v8640_v0 = vcombine.high %v226_v60, %v230_v61  ;;  %v233_v1 = vld [vmem:[%s13457_s1 + $0x610] sm:$0xff] }
 0x143   :  { %3550 = vmatprep.subr.bf16.mxu0 %v8582_v2  ;;  %3714 = vmatprep.subr.bf16.mxu1 %v8584_v3  ;;  %v237_v2 = vld [vmem:[%s13457_s1 + $0x630] sm:$0xff]  ;;  %v234_v3 = vld [vmem:[%s13457_s1 + $0x618] sm:$0xff] }
 0x144   :  { %v8646_v7 = vcombine.high %v233_v1, %v237_v2  ;;  %v8645_v14 = vcombine.low %v233_v1, %v237_v2  ;;  %v8647_v16 = vcombine.low %v234_v3, %v238_v4  ;;  %v294_v1 = vld [vmem:[%s13457_s1 + $0x7f8] sm:$0xff] }
 0x145   :  { %3542 = vmatmul.mubr.bf16.vlgmr.msra.gmra.mrb[4].mxu0 %v10139_v12  ;;  %3706 = vmatmul.mubr.bf16.vlgmr.msra.gmra.mrb[4].mxu1 %v10139_v12  ;;  %v194_v12 = vld [vmem:[%s13457_s1 + $0x4d8] sm:$0xff] }
 0x146   :  { %3551 = vmatpush1.bf16.msra.mxu0 %v8581_v8  ;;  %3715 = vmatpush1.bf16.msra.mxu1 %v8583_v9  ;;  %v8608_v28 = vcombine.high %v194_v12, %v198_v24  ;;  %v8607_v34 = vcombine.low %v194_v12, %v198_v24  ;;  %v8648_v8 = vcombine.high %v234_v3, %v238_v4  ;;  %v241_v9 = vld [vmem:[%s13457_s1 + $0x650] sm:$0xff] }
 0x147   :  { %3552 = vmatprep.subr.bf16.mxu0 %v8590_v10  ;;  %3716 = vmatprep.subr.bf16.mxu1 %v8592_v11  ;;  %v245_v10 = vld [vmem:[%s13457_s1 + $0x670] sm:$0xff]  ;;  %v242_v11 = vld [vmem:[%s13457_s1 + $0x658] sm:$0xff] }
 0x148   :  { %3582 = vmatprep.mubr.bf16.mxu0 %v10160_v21  ;;  %3746 = vmatprep.mubr.bf16.mxu1 %v10160_v21  ;;  %v202_v21 = vld [vmem:[%s13457_s1 + $0x518] sm:$0xff]  ;;  %v8654_v17 = vcombine.high %v241_v9, %v245_v10  ;;  %v8653_v23 = vcombine.low %v241_v9, %v245_v10  ;;  %v8655_v12 = vcombine.low %v242_v11, %v246_v13 }
 0x149   :  { %v8616_v37 = vcombine.high %v202_v21, %v206_v32  ;;  %v8615_v43 = vcombine.low %v202_v21, %v206_v32  ;;  %v302_v9 = vld [vmem:[%s13457_s1 + $0x838] sm:$0xff] }
 0x14a   :  { %3553 = vmatpush1.bf16.msra.mxu0 %v8589_v57  ;;  %3717 = vmatpush1.bf16.msra.mxu1 %v8591_v53  ;;  %v8656_v57 = vcombine.high %v242_v11, %v246_v13  ;;  %v249_v53 = vld [vmem:[%s13457_s1 + $0x690] sm:$0xff] }
 0x14b   :  { %3554 = vmatprep.subr.bf16.mxu0 %v8598_v18  ;;  %3718 = vmatprep.subr.bf16.mxu1 %v8600_v19  ;;  %v253_v18 = vld [vmem:[%s13457_s1 + $0x6b0] sm:$0xff]  ;;  %v250_v19 = vld [vmem:[%s13457_s1 + $0x698] sm:$0xff] }
 0x14c   :  { %v8662_v24 = vcombine.high %v249_v53, %v253_v18  ;;  %v8661_v30 = vcombine.low %v249_v53, %v253_v18  ;;  %v8663_v21 = vcombine.low %v250_v19, %v254_v20  ;;  %v310_v53 = vld [vmem:[%s13457_s1 + $0x878] sm:$0xff] }
 0x14e   :  { %3555 = vmatpush1.bf16.msra.mxu0 %v8597_v26  ;;  %3719 = vmatpush1.bf16.msra.mxu1 %v8599_v27  ;;  %v8664_v26 = vcombine.high %v250_v19, %v254_v20  ;;  %v257_v27 = vld [vmem:[%s13457_s1 + $0x6d0] sm:$0xff] }
 0x14f   :  { %3556 = vmatprep.subr.bf16.mxu0 %v8606_v15  ;;  %3720 = vmatprep.subr.bf16.mxu1 %v8608_v28  ;;  %v261_v15 = vld [vmem:[%s13457_s1 + $0x6f0] sm:$0xff]  ;;  %v258_v28 = vld [vmem:[%s13457_s1 + $0x6d8] sm:$0xff] }
 0x150   :  { %v8670_v32 = vcombine.high %v257_v27, %v261_v15  ;;  %v8669_v40 = vcombine.low %v257_v27, %v261_v15  ;;  %v8671_v41 = vcombine.low %v258_v28, %v262_v29  ;;  %v318_v27 = vld [vmem:[%s13457_s1 + $0x8b8] sm:$0xff] }
 0x152   :  { %3557 = vmatpush1.bf16.msra.mxu0 %v8605_v33  ;;  %3721 = vmatpush1.bf16.msra.mxu1 %v8607_v34  ;;  %v8672_v33 = vcombine.high %v258_v28, %v262_v29  ;;  %v265_v34 = vld [vmem:[%s13457_s1 + $0x710] sm:$0xff] }
 0x153   :  { %3558 = vmatprep.subr.bf16.mxu0 %v8614_v35  ;;  %3722 = vmatprep.subr.bf16.mxu1 %v8616_v37  ;;  %v269_v35 = vld [vmem:[%s13457_s1 + $0x730] sm:$0xff]  ;;  %v266_v37 = vld [vmem:[%s13457_s1 + $0x718] sm:$0xff] }
 0x154   :  { %v8678_v25 = vcombine.high %v265_v34, %v269_v35  ;;  %v8677_v48 = vcombine.low %v265_v34, %v269_v35  ;;  %v8679_v49 = vcombine.low %v266_v37, %v270_v38 }
 0x156   :  { %3559 = vmatpush1.bf16.msra.mxu0 %v8613_v42  ;;  %3723 = vmatpush1.bf16.msra.mxu1 %v8615_v43  ;;  %v8680_v42 = vcombine.high %v266_v37, %v270_v38  ;;  %v273_v43 = vld [vmem:[%s13457_s1 + $0x750] sm:$0xff] }
 0x157   :  { %3560 = vmatprep.subr.bf16.mxu0 %v8622_v44  ;;  %3724 = vmatprep.subr.bf16.mxu1 %v8624_v46  ;;  %v277_v44 = vld [vmem:[%s13457_s1 + $0x770] sm:$0xff]  ;;  %v274_v46 = vld [vmem:[%s13457_s1 + $0x758] sm:$0xff] }
 0x158   :  { %v8686_v50 = vcombine.high %v273_v43, %v277_v44  ;;  %v8685_v59 = vcombine.low %v273_v43, %v277_v44  ;;  %v8687_v60 = vcombine.low %v274_v46, %v278_v47 }
 0x15a   :  { %3561 = vmatpush1.bf16.msra.mxu0 %v8621_v51  ;;  %3725 = vmatpush1.bf16.msra.mxu1 %v8623_v52  ;;  %v8688_v51 = vcombine.high %v274_v46, %v278_v47  ;;  %v281_v52 = vld [vmem:[%s13457_s1 + $0x790] sm:$0xff] }
 0x15b   :  { %3562 = vmatprep.subr.bf16.mxu0 %v8630_v54  ;;  %3726 = vmatprep.subr.bf16.mxu1 %v8632_v56  ;;  %v285_v54 = vld [vmem:[%s13457_s1 + $0x7b0] sm:$0xff]  ;;  %v282_v56 = vld [vmem:[%s13457_s1 + $0x798] sm:$0xff] }
 0x15c   :  { %v8694_v61 = vcombine.high %v281_v52, %v285_v54  ;;  %v8693_v2 = vcombine.low %v281_v52, %v285_v54  ;;  %v8695_v3 = vcombine.low %v282_v56, %v286_v58  ;;  %v337_v47 = vld [vmem:[%s13457_s1 + $0x950] sm:$0xff] }
 0x15e   :  { %3563 = vmatpush1.bf16.msra.mxu0 %v8629_v62  ;;  %3727 = vmatpush1.bf16.msra.mxu1 %v8631_v39  ;;  %v8696_v62 = vcombine.high %v282_v56, %v286_v58  ;;  %v289_v39 = vld [vmem:[%s13457_s1 + $0x7d0] sm:$0xff] }
 0x15f   :  { %3564 = vmatprep.subr.bf16.mxu0 %v8638_v63  ;;  %3728 = vmatprep.subr.bf16.mxu1 %v8640_v0  ;;  %v293_v63 = vld [vmem:[%s13457_s1 + $0x7f0] sm:$0xff]  ;;  %v290_v0 = vld [vmem:[%s13457_s1 + $0x7d8] sm:$0xff] }
 0x160   :  { %v8702_v4 = vcombine.high %v289_v39, %v293_v63  ;;  %v8701_v10 = vcombine.low %v289_v39, %v293_v63  ;;  %v8703_v11 = vcombine.low %v290_v0, %v294_v1  ;;  %v345_v58 = vld [vmem:[%s13457_s1 + $0x990] sm:$0xff] }
 0x162   :  { %3565 = vmatpush1.bf16.msra.mxu0 %v8637_v5  ;;  %3729 = vmatpush1.bf16.msra.mxu1 %v8639_v6  ;;  %v8704_v5 = vcombine.high %v290_v0, %v294_v1  ;;  %v297_v6 = vld [vmem:[%s13457_s1 + $0x810] sm:$0xff] }
 0x163   :  { %3566 = vmatprep.subr.bf16.mxu0 %v8646_v7  ;;  %3730 = vmatprep.subr.bf16.mxu1 %v8648_v8  ;;  %v301_v7 = vld [vmem:[%s13457_s1 + $0x830] sm:$0xff]  ;;  %v298_v8 = vld [vmem:[%s13457_s1 + $0x818] sm:$0xff] }
 0x164   :  { %v8710_v13 = vcombine.high %v297_v6, %v301_v7  ;;  %v8709_v18 = vcombine.low %v297_v6, %v301_v7  ;;  %v8711_v19 = vcombine.low %v298_v8, %v302_v9  ;;  %v353_v1 = vld [vmem:[%s13457_s1 + $0x9d0] sm:$0xff] }
 0x166   :  { %3567 = vmatpush1.bf16.msra.mxu0 %v8645_v14  ;;  %3731 = vmatpush1.bf16.msra.mxu1 %v8647_v16  ;;  %v8712_v14 = vcombine.high %v298_v8, %v302_v9  ;;  %v305_v16 = vld [vmem:[%s13457_s1 + $0x850] sm:$0xff] }
 0x167   :  { %3568 = vmatprep.subr.bf16.mxu0 %v8654_v17  ;;  %3732 = vmatprep.subr.bf16.mxu1 %v8656_v57  ;;  %v309_v17 = vld [vmem:[%s13457_s1 + $0x870] sm:$0xff]  ;;  %v306_v57 = vld [vmem:[%s13457_s1 + $0x858] sm:$0xff] }
 0x168   :  { %v8718_v20 = vcombine.high %v305_v16, %v309_v17  ;;  %v8717_v15 = vcombine.low %v305_v16, %v309_v17  ;;  %v8719_v28 = vcombine.low %v306_v57, %v310_v53  ;;  %v361_v9 = vld [vmem:[%s13457_s1 + $0xa10] sm:$0xff] }
 0x16a   :  { %3569 = vmatpush1.bf16.msra.mxu0 %v8653_v23  ;;  %3733 = vmatpush1.bf16.msra.mxu1 %v8655_v12  ;;  %v8720_v23 = vcombine.high %v306_v57, %v310_v53  ;;  %v313_v12 = vld [vmem:[%s13457_s1 + $0x890] sm:$0xff] }
 0x16b   :  { %3570 = vmatprep.subr.bf16.mxu0 %v8662_v24  ;;  %3734 = vmatprep.subr.bf16.mxu1 %v8664_v26  ;;  %v317_v24 = vld [vmem:[%s13457_s1 + $0x8b0] sm:$0xff]  ;;  %v314_v26 = vld [vmem:[%s13457_s1 + $0x898] sm:$0xff] }
 0x16c   :  { %v8726_v29 = vcombine.high %v313_v12, %v317_v24  ;;  %v8725_v34 = vcombine.low %v313_v12, %v317_v24  ;;  %v8727_v35 = vcombine.low %v314_v26, %v318_v27  ;;  %v369_v53 = vld [vmem:[%s13457_s1 + $0xa50] sm:$0xff] }
 0x16e   :  { %3571 = vmatpush1.bf16.msra.mxu0 %v8661_v30  ;;  %3735 = vmatpush1.bf16.msra.mxu1 %v8663_v21  ;;  %v8728_v30 = vcombine.high %v314_v26, %v318_v27  ;;  %v321_v21 = vld [vmem:[%s13457_s1 + $0x8d0] sm:$0xff] }
 0x16f   :  { %3572 = vmatprep.subr.bf16.mxu0 %v8670_v32  ;;  %3736 = vmatprep.subr.bf16.mxu1 %v8672_v33  ;;  %v325_v32 = vld [vmem:[%s13457_s1 + $0x8f0] sm:$0xff]  ;;  %v326_v33 = vld [vmem:[%s13457_s1 + $0x8f8] sm:$0xff] }
 0x170   :  { %v8734_v37 = vcombine.high %v321_v21, %v325_v32  ;;  %v377_v27 = vld [vmem:[%s13457_s1 + $0xa90] sm:$0xff] }
 0x172   :  { %3573 = vmatpush1.bf16.msra.mxu0 %v8669_v40  ;;  %3737 = vmatpush1.bf16.msra.mxu1 %v8671_v41  ;;  %v329_v40 = vld [vmem:[%s13457_s1 + $0x910] sm:$0xff] }
 0x173   :  { %3574 = vmatprep.subr.bf16.mxu0 %v8678_v25  ;;  %3738 = vmatprep.subr.bf16.mxu1 %v8680_v42  ;;  %v333_v41 = vld [vmem:[%s13457_s1 + $0x930] sm:$0xff]  ;;  %v334_v25 = vld [vmem:[%s13457_s1 + $0x938] sm:$0xff]  ;;  %v8733_v42 = vcombine.low %v321_v21, %v325_v32 }
 0x174   :  { %v8742_v44 = vcombine.high %v329_v40, %v333_v41 }
 0x176   :  { %3575 = vmatpush1.bf16.msra.mxu0 %v8677_v48  ;;  %3739 = vmatpush1.bf16.msra.mxu1 %v8679_v49  ;;  %v341_v48 = vld [vmem:[%s13457_s1 + $0x970] sm:$0xff]  ;;  %v338_v49 = vld [vmem:[%s13457_s1 + $0x958] sm:$0xff] }
 0x177   :  { %3576 = vmatprep.subr.bf16.mxu0 %v8686_v50  ;;  %3740 = vmatprep.subr.bf16.mxu1 %v8688_v51  ;;  %v342_v50 = vld [vmem:[%s13457_s1 + $0x978] sm:$0xff]  ;;  %v8741_v51 = vcombine.low %v329_v40, %v333_v41  ;;  %v8750_v54 = vcombine.high %v337_v47, %v341_v48 }
 0x178   :  { %v8752_v56 = vcombine.high %v338_v49, %v342_v50  ;;  %v8751_v39 = vcombine.low %v338_v49, %v342_v50  ;;  %v401_v50 = vld [vmem:[%s13457_s1 + $0xb50] sm:$0xff] }
 0x17a   :  { %3577 = vmatpush1.bf16.msra.mxu0 %v8685_v59  ;;  %3741 = vmatpush1.bf16.msra.mxu1 %v8687_v60  ;;  %v349_v59 = vld [vmem:[%s13457_s1 + $0x9b0] sm:$0xff]  ;;  %v346_v60 = vld [vmem:[%s13457_s1 + $0x998] sm:$0xff] }
 0x17b   :  { %3578 = vmatprep.subr.bf16.mxu0 %v8694_v61  ;;  %3742 = vmatprep.subr.bf16.mxu1 %v8696_v62  ;;  %v350_v61 = vld [vmem:[%s13457_s1 + $0x9b8] sm:$0xff]  ;;  %v8749_v62 = vcombine.low %v337_v47, %v341_v48  ;;  %v8758_v63 = vcombine.high %v345_v58, %v349_v59 }
 0x17c   :  { %v8760_v0 = vcombine.high %v346_v60, %v350_v61  ;;  %v8759_v6 = vcombine.low %v346_v60, %v350_v61  ;;  %v409_v61 = vld [vmem:[%s13457_s1 + $0xb90] sm:$0xff] }
 0x17e   :  { %3579 = vmatpush1.bf16.msra.mxu0 %v8693_v2  ;;  %3743 = vmatpush1.bf16.msra.mxu1 %v8695_v3  ;;  %v357_v2 = vld [vmem:[%s13457_s1 + $0x9f0] sm:$0xff]  ;;  %v354_v3 = vld [vmem:[%s13457_s1 + $0x9d8] sm:$0xff] }
 0x17f   :  { %3580 = vmatprep.subr.bf16.mxu0 %v8702_v4  ;;  %3744 = vmatprep.subr.bf16.mxu1 %v8704_v5  ;;  %v358_v4 = vld [vmem:[%s13457_s1 + $0x9f8] sm:$0xff]  ;;  %v8757_v5 = vcombine.low %v345_v58, %v349_v59  ;;  %v8766_v7 = vcombine.high %v353_v1, %v357_v2 }
 0x180   :  { %v8768_v8 = vcombine.high %v354_v3, %v358_v4  ;;  %v8767_v16 = vcombine.low %v354_v3, %v358_v4  ;;  %v417_v4 = vld [vmem:[%s13457_s1 + $0xbd0] sm:$0xff] }
 0x182   :  { %3581 = vmatpush1.bf16.msra.mxu0 %v8701_v10  ;;  %3745 = vmatpush1.bf16.msra.mxu1 %v8703_v11  ;;  %v365_v10 = vld [vmem:[%s13457_s1 + $0xa30] sm:$0xff]  ;;  %v362_v11 = vld [vmem:[%s13457_s1 + $0xa18] sm:$0xff] }
 0x183   :  { %3591 = vmatprep.subr.bf16.mxu0 %v8710_v13  ;;  %3755 = vmatprep.subr.bf16.mxu1 %v8712_v14  ;;  %v366_v13 = vld [vmem:[%s13457_s1 + $0xa38] sm:$0xff]  ;;  %v8765_v14 = vcombine.low %v353_v1, %v357_v2  ;;  %v8774_v17 = vcombine.high %v361_v9, %v365_v10 }
 0x184   :  { %v8776_v57 = vcombine.high %v362_v11, %v366_v13  ;;  %v8775_v12 = vcombine.low %v362_v11, %v366_v13  ;;  %v425_v13 = vld [vmem:[%s13457_s1 + $0xc10] sm:$0xff] }
 0x185   :  { %3583 = vmatmul.mubr.bf16.vlgmr.msra.gmra.mrb[4].mxu0 %v10348_v22  ;;  %3747 = vmatmul.mubr.bf16.vlgmr.msra.gmra.mrb[4].mxu1 %v10348_v22  ;;  %v322_v22 = vld [vmem:[%s13457_s1 + $0x8d8] sm:$0xff] }
 0x186   :  { %3592 = vmatpush1.bf16.msra.mxu0 %v8709_v18  ;;  %3756 = vmatpush1.bf16.msra.mxu1 %v8711_v19  ;;  %v8736_v38 = vcombine.high %v322_v22, %v326_v33  ;;  %v8735_v43 = vcombine.low %v322_v22, %v326_v33  ;;  %v373_v18 = vld [vmem:[%s13457_s1 + $0xa70] sm:$0xff]  ;;  %v370_v19 = vld [vmem:[%s13457_s1 + $0xa58] sm:$0xff] }
 0x187   :  { %3593 = vmatprep.subr.bf16.mxu0 %v8718_v20  ;;  %3757 = vmatprep.subr.bf16.mxu1 %v8720_v23  ;;  %v374_v20 = vld [vmem:[%s13457_s1 + $0xa78] sm:$0xff]  ;;  %v8773_v23 = vcombine.low %v361_v9, %v365_v10  ;;  %v8782_v24 = vcombine.high %v369_v53, %v373_v18  ;;  %v385_v33 = vld [vmem:[%s13457_s1 + $0xad0] sm:$0xff] }
 0x188   :  { %3623 = vmatprep.mubr.bf16.mxu0 %v10369_v31  ;;  %3787 = vmatprep.mubr.bf16.mxu1 %v10369_v31  ;;  %v330_v31 = vld [vmem:[%s13457_s1 + $0x918] sm:$0xff]  ;;  %v8784_v26 = vcombine.high %v370_v19, %v374_v20  ;;  %v8783_v21 = vcombine.low %v370_v19, %v374_v20  ;;  %v433_v20 = vld [vmem:[%s13457_s1 + $0xc50] sm:$0xff] }
 0x189   :  { %v8744_v46 = vcombine.high %v330_v31, %v334_v25  ;;  %v8743_v52 = vcombine.low %v330_v31, %v334_v25  ;;  %v393_v25 = vld [vmem:[%s13457_s1 + $0xb10] sm:$0xff] }
 0x18a   :  { %3594 = vmatpush1.bf16.msra.mxu0 %v8717_v15  ;;  %3758 = vmatpush1.bf16.msra.mxu1 %v8719_v28  ;;  %v381_v15 = vld [vmem:[%s13457_s1 + $0xab0] sm:$0xff]  ;;  %v378_v28 = vld [vmem:[%s13457_s1 + $0xa98] sm:$0xff] }
 0x18b   :  { %3595 = vmatprep.subr.bf16.mxu0 %v8726_v29  ;;  %3759 = vmatprep.subr.bf16.mxu1 %v8728_v30  ;;  %v382_v29 = vld [vmem:[%s13457_s1 + $0xab8] sm:$0xff]  ;;  %v8781_v30 = vcombine.low %v369_v53, %v373_v18  ;;  %v8790_v32 = vcombine.high %v377_v27, %v381_v15 }
 0x18c   :  { %v8792_v22 = vcombine.high %v378_v28, %v382_v29  ;;  %v8791_v40 = vcombine.low %v378_v28, %v382_v29  ;;  %v441_v29 = vld [vmem:[%s13457_s1 + $0xc90] sm:$0xff] }
 0x18e   :  { %3596 = vmatpush1.bf16.msra.mxu0 %v8725_v34  ;;  %3760 = vmatpush1.bf16.msra.mxu1 %v8727_v35  ;;  %v389_v34 = vld [vmem:[%s13457_s1 + $0xaf0] sm:$0xff]  ;;  %v386_v35 = vld [vmem:[%s13457_s1 + $0xad8] sm:$0xff] }
 0x18f   :  { %3597 = vmatprep.subr.bf16.mxu0 %v8734_v37  ;;  %3761 = vmatprep.subr.bf16.mxu1 %v8736_v38  ;;  %v390_v37 = vld [vmem:[%s13457_s1 + $0xaf8] sm:$0xff]  ;;  %v8789_v38 = vcombine.low %v377_v27, %v381_v15  ;;  %v8798_v41 = vcombine.high %v385_v33, %v389_v34 }
 0x190   :  { %v8800_v31 = vcombine.high %v386_v35, %v390_v37  ;;  %v8799_v47 = vcombine.low %v386_v35, %v390_v37  ;;  %v449_v37 = vld [vmem:[%s13457_s1 + $0xcd0] sm:$0xff] }
 0x192   :  { %3598 = vmatpush1.bf16.msra.mxu0 %v8733_v42  ;;  %3762 = vmatpush1.bf16.msra.mxu1 %v8735_v43  ;;  %v397_v42 = vld [vmem:[%s13457_s1 + $0xb30] sm:$0xff]  ;;  %v394_v43 = vld [vmem:[%s13457_s1 + $0xb18] sm:$0xff] }
 0x193   :  { %3599 = vmatprep.subr.bf16.mxu0 %v8742_v44  ;;  %3763 = vmatprep.subr.bf16.mxu1 %v8744_v46  ;;  %v398_v44 = vld [vmem:[%s13457_s1 + $0xb38] sm:$0xff]  ;;  %v8797_v46 = vcombine.low %v385_v33, %v389_v34  ;;  %v8806_v48 = vcombine.high %v393_v25, %v397_v42 }
 0x194   :  { %v8808_v49 = vcombine.high %v394_v43, %v398_v44  ;;  %v8807_v58 = vcombine.low %v394_v43, %v398_v44  ;;  %v457_v43 = vld [vmem:[%s13457_s1 + $0xd10] sm:$0xff] }
 0x195   :  { %v461_v44 = vld [vmem:[%s13457_s1 + $0xd30] sm:$0xff] }
 0x196   :  { %3600 = vmatpush1.bf16.msra.mxu0 %v8741_v51  ;;  %3764 = vmatpush1.bf16.msra.mxu1 %v8743_v52  ;;  %v405_v51 = vld [vmem:[%s13457_s1 + $0xb70] sm:$0xff]  ;;  %v402_v52 = vld [vmem:[%s13457_s1 + $0xb58] sm:$0xff] }
 0x197   :  { %3601 = vmatprep.subr.bf16.mxu0 %v8750_v54  ;;  %3765 = vmatprep.subr.bf16.mxu1 %v8752_v56  ;;  %v406_v54 = vld [vmem:[%s13457_s1 + $0xb78] sm:$0xff]  ;;  %v8805_v56 = vcombine.low %v393_v25, %v397_v42  ;;  %v8814_v59 = vcombine.high %v401_v50, %v405_v51 }
 0x198   :  { %v8816_v60 = vcombine.high %v402_v52, %v406_v54  ;;  %v8815_v1 = vcombine.low %v402_v52, %v406_v54  ;;  %v469_v52 = vld [vmem:[%s13457_s1 + $0xd70] sm:$0xff]  ;;  %v466_v54 = vld [vmem:[%s13457_s1 + $0xd58] sm:$0xff] }
 0x19a   :  { %3602 = vmatpush1.bf16.msra.mxu0 %v8749_v62  ;;  %3766 = vmatpush1.bf16.msra.mxu1 %v8751_v39  ;;  %v413_v62 = vld [vmem:[%s13457_s1 + $0xbb0] sm:$0xff]  ;;  %v410_v39 = vld [vmem:[%s13457_s1 + $0xb98] sm:$0xff] }
 0x19b   :  { %3603 = vmatprep.subr.bf16.mxu0 %v8758_v63  ;;  %3767 = vmatprep.subr.bf16.mxu1 %v8760_v0  ;;  %v414_v63 = vld [vmem:[%s13457_s1 + $0xbb8] sm:$0xff]  ;;  %v8813_v0 = vcombine.low %v401_v50, %v405_v51  ;;  %v8822_v2 = vcombine.high %v409_v61, %v413_v62  ;;  %v465_v51 = vld [vmem:[%s13457_s1 + $0xd50] sm:$0xff] }
 0x19c   :  { %v8824_v3 = vcombine.high %v410_v39, %v414_v63  ;;  %v8823_v9 = vcombine.low %v410_v39, %v414_v63  ;;  %v477_v39 = vld [vmem:[%s13457_s1 + $0xdb0] sm:$0xff]  ;;  %v474_v63 = vld [vmem:[%s13457_s1 + $0xd98] sm:$0xff] }
 0x19e   :  { %3604 = vmatpush1.bf16.msra.mxu0 %v8757_v5  ;;  %3768 = vmatpush1.bf16.msra.mxu1 %v8759_v6  ;;  %v421_v5 = vld [vmem:[%s13457_s1 + $0xbf0] sm:$0xff]  ;;  %v418_v6 = vld [vmem:[%s13457_s1 + $0xbd8] sm:$0xff] }
 0x19f   :  { %3605 = vmatprep.subr.bf16.mxu0 %v8766_v7  ;;  %3769 = vmatprep.subr.bf16.mxu1 %v8768_v8  ;;  %v422_v7 = vld [vmem:[%s13457_s1 + $0xbf8] sm:$0xff]  ;;  %v8821_v8 = vcombine.low %v409_v61, %v413_v62  ;;  %v8830_v10 = vcombine.high %v417_v4, %v421_v5  ;;  %v473_v62 = vld [vmem:[%s13457_s1 + $0xd90] sm:$0xff] }
 0x1a0   :  { %v8832_v11 = vcombine.high %v418_v6, %v422_v7  ;;  %v8831_v53 = vcombine.low %v418_v6, %v422_v7  ;;  %v481_v6 = vld [vmem:[%s13457_s1 + $0xdd0] sm:$0xff] }
 0x1a1   :  { %v485_v7 = vld [vmem:[%s13457_s1 + $0xdf0] sm:$0xff] }
 0x1a2   :  { %3606 = vmatpush1.bf16.msra.mxu0 %v8765_v14  ;;  %3770 = vmatpush1.bf16.msra.mxu1 %v8767_v16  ;;  %v429_v14 = vld [vmem:[%s13457_s1 + $0xc30] sm:$0xff]  ;;  %v426_v16 = vld [vmem:[%s13457_s1 + $0xc18] sm:$0xff] }
 0x1a3   :  { %3607 = vmatprep.subr.bf16.mxu0 %v8774_v17  ;;  %3771 = vmatprep.subr.bf16.mxu1 %v8776_v57  ;;  %v430_v17 = vld [vmem:[%s13457_s1 + $0xc38] sm:$0xff]  ;;  %v8829_v57 = vcombine.low %v417_v4, %v421_v5  ;;  %v8838_v18 = vcombine.high %v425_v13, %v429_v14 }
 0x1a4   :  { %v8840_v19 = vcombine.high %v426_v16, %v430_v17  ;;  %v8839_v27 = vcombine.low %v426_v16, %v430_v17  ;;  %v8885_v16 = vcombine.low %v473_v62, %v477_v39 }
 0x1a6   :  { %3608 = vmatpush1.bf16.msra.mxu0 %v8773_v23  ;;  %3772 = vmatpush1.bf16.msra.mxu1 %v8775_v12  ;;  %v437_v23 = vld [vmem:[%s13457_s1 + $0xc70] sm:$0xff]  ;;  %v434_v12 = vld [vmem:[%s13457_s1 + $0xc58] sm:$0xff] }
 0x1a7   :  { %3609 = vmatprep.subr.bf16.mxu0 %v8782_v24  ;;  %3773 = vmatprep.subr.bf16.mxu1 %v8784_v26  ;;  %v438_v24 = vld [vmem:[%s13457_s1 + $0xc78] sm:$0xff]  ;;  %v8837_v26 = vcombine.low %v425_v13, %v429_v14  ;;  %v8846_v15 = vcombine.high %v433_v20, %v437_v23 }
 0x1a8   :  { %v8848_v28 = vcombine.high %v434_v12, %v438_v24  ;;  %v8847_v33 = vcombine.low %v434_v12, %v438_v24  ;;  %v493_v12 = vld [vmem:[%s13457_s1 + $0xe30] sm:$0xff]  ;;  %v490_v24 = vld [vmem:[%s13457_s1 + $0xe18] sm:$0xff] }
 0x1aa   :  { %3610 = vmatpush1.bf16.msra.mxu0 %v8781_v30  ;;  %3774 = vmatpush1.bf16.msra.mxu1 %v8783_v21  ;;  %v445_v30 = vld [vmem:[%s13457_s1 + $0xcb0] sm:$0xff]  ;;  %v442_v21 = vld [vmem:[%s13457_s1 + $0xc98] sm:$0xff] }
 0x1ab   :  { %3611 = vmatprep.subr.bf16.mxu0 %v8790_v32  ;;  %3775 = vmatprep.subr.bf16.mxu1 %v8792_v22  ;;  %v446_v32 = vld [vmem:[%s13457_s1 + $0xcb8] sm:$0xff]  ;;  %v8845_v22 = vcombine.low %v433_v20, %v437_v23  ;;  %v8854_v34 = vcombine.high %v441_v29, %v445_v30  ;;  %v489_v23 = vld [vmem:[%s13457_s1 + $0xe10] sm:$0xff] }
 0x1ac   :  { %v8856_v35 = vcombine.high %v442_v21, %v446_v32 }
 0x1ae   :  { %3612 = vmatpush1.bf16.msra.mxu0 %v8789_v38  ;;  %3776 = vmatpush1.bf16.msra.mxu1 %v8791_v40  ;;  %v453_v38 = vld [vmem:[%s13457_s1 + $0xcf0] sm:$0xff]  ;;  %v454_v40 = vld [vmem:[%s13457_s1 + $0xcf8] sm:$0xff] }
 0x1af   :  { %3613 = vmatprep.subr.bf16.mxu0 %v8798_v41  ;;  %3777 = vmatprep.subr.bf16.mxu1 %v8800_v31  ;;  %v8853_v41 = vcombine.low %v441_v29, %v445_v30  ;;  %v8855_v31 = vcombine.low %v442_v21, %v446_v32  ;;  %v8862_v25 = vcombine.high %v449_v37, %v453_v38  ;;  %v497_v30 = vld [vmem:[%s13457_s1 + $0xe50] sm:$0xff]  ;;  %v498_v32 = vld [vmem:[%s13457_s1 + $0xe58] sm:$0xff] }
 0x1b0   :  { %v501_v21 = vld [vmem:[%s13457_s1 + $0xe70] sm:$0xff] }
 0x1b2   :  { %3614 = vmatpush1.bf16.msra.mxu0 %v8797_v46  ;;  %3778 = vmatpush1.bf16.msra.mxu1 %v8799_v47  ;;  %v462_v46 = vld [vmem:[%s13457_s1 + $0xd38] sm:$0xff]  ;;  %v8861_v47 = vcombine.low %v449_v37, %v453_v38  ;;  %v505_v38 = vld [vmem:[%s13457_s1 + $0xe90] sm:$0xff] }
 0x1b3   :  { %3615 = vmatprep.subr.bf16.mxu0 %v8806_v48  ;;  %3779 = vmatprep.subr.bf16.mxu1 %v8808_v49  ;;  %v8870_v49 = vcombine.high %v457_v43, %v461_v44 }
 0x1b6   :  { %3616 = vmatpush1.bf16.msra.mxu0 %v8805_v56  ;;  %3780 = vmatpush1.bf16.msra.mxu1 %v8807_v58  ;;  %v470_v56 = vld [vmem:[%s13457_s1 + $0xd78] sm:$0xff]  ;;  %v8869_v58 = vcombine.low %v457_v43, %v461_v44  ;;  %v513_v44 = vld [vmem:[%s13457_s1 + $0xed0] sm:$0xff] }
 0x1b7   :  { %3617 = vmatprep.subr.bf16.mxu0 %v8814_v59  ;;  %3781 = vmatprep.subr.bf16.mxu1 %v8816_v60  ;;  %v8878_v60 = vcombine.high %v465_v51, %v469_v52  ;;  %v8880_v61 = vcombine.high %v466_v54, %v470_v56 }
 0x1ba   :  { %3618 = vmatpush1.bf16.msra.mxu0 %v8813_v0  ;;  %3782 = vmatpush1.bf16.msra.mxu1 %v8815_v1  ;;  %v478_v0 = vld [vmem:[%s13457_s1 + $0xdb8] sm:$0xff]  ;;  %v8877_v1 = vcombine.low %v465_v51, %v469_v52  ;;  %v521_v52 = vld [vmem:[%s13457_s1 + $0xf10] sm:$0xff] }
 0x1bb   :  { %3619 = vmatprep.subr.bf16.mxu0 %v8822_v2  ;;  %3783 = vmatprep.subr.bf16.mxu1 %v8824_v3  ;;  %v8879_v2 = vcombine.low %v466_v54, %v470_v56  ;;  %v8886_v3 = vcombine.high %v473_v62, %v477_v39  ;;  %v8888_v5 = vcombine.high %v474_v63, %v478_v0  ;;  %v525_v54 = vld [vmem:[%s13457_s1 + $0xf30] sm:$0xff]  ;;  %v553_v56 = vlaneseq }
 0x1bc   :  { %v8934_v62 = vcombine.high %v521_v52, %v525_v54 }
 0x1be   :  { %3620 = vmatpush1.bf16.msra.mxu0 %v8821_v8  ;;  %3784 = vmatpush1.bf16.msra.mxu1 %v8823_v9 }
 0x1bf   :  { %3621 = vmatprep.subr.bf16.mxu0 %v8830_v10  ;;  %3785 = vmatprep.subr.bf16.mxu1 %v8832_v11  ;;  %v482_v10 = vld [vmem:[%s13457_s1 + $0xdd8] sm:$0xff] }
 0x1c0   :  { %v486_v11 = vld [vmem:[%s13457_s1 + $0xdf8] sm:$0xff] }
 0x1c1   :  { %v8896_v20 = vcombine.high %v482_v10, %v486_v11 }
 0x1c2   :  { %3622 = vmatpush1.bf16.msra.mxu0 %v8829_v57  ;;  %3786 = vmatpush1.bf16.msra.mxu1 %v8831_v53  ;;  %v8887_v53 = vcombine.low %v474_v63, %v478_v0  ;;  %v529_v63 = vld [vmem:[%s13457_s1 + $0xf50] sm:$0xff] }
 0x1c3   :  { %3632 = vmatprep.subr.bf16.mxu0 %v8838_v18  ;;  %3796 = vmatprep.subr.bf16.mxu1 %v8840_v19  ;;  %v8894_v18 = vcombine.high %v481_v6, %v485_v7  ;;  %v533_v0 = vld [vmem:[%s13457_s1 + $0xf70] sm:$0xff] }
 0x1c5   :  { %3624 = vmatmul.mubr.bf16.vlgmr.msra.gmra.mrb[4].mxu0 %v10557_v36  ;;  %3788 = vmatmul.mubr.bf16.vlgmr.msra.gmra.mrb[4].mxu1 %v10557_v36  ;;  %v450_v36 = vld [vmem:[%s13457_s1 + $0xcd8] sm:$0xff] }
 0x1c6   :  { %3633 = vmatpush1.bf16.msra.mxu0 %v8837_v26  ;;  %3797 = vmatpush1.bf16.msra.mxu1 %v8839_v27  ;;  %v8864_v42 = vcombine.high %v450_v36, %v454_v40  ;;  %v8863_v48 = vcombine.low %v450_v36, %v454_v40  ;;  %v494_v26 = vld [vmem:[%s13457_s1 + $0xe38] sm:$0xff]  ;;  %v8893_v27 = vcombine.low %v481_v6, %v485_v7  ;;  %v509_v36 = vld [vmem:[%s13457_s1 + $0xeb0] sm:$0xff] }
 0x1c7   :  { %3634 = vmatprep.subr.bf16.mxu0 %v8846_v15  ;;  %3798 = vmatprep.subr.bf16.mxu1 %v8848_v28  ;;  %v8895_v15 = vcombine.low %v482_v10, %v486_v11  ;;  %v8902_v28 = vcombine.high %v489_v23, %v493_v12  ;;  %v8904_v29 = vcombine.high %v490_v24, %v494_v26  ;;  %v506_v40 = vld [vmem:[%s13457_s1 + $0xe98] sm:$0xff]  ;;  %v537_v11 = vld [vmem:[%s13457_s1 + $0xf90] sm:$0xff] }
 0x1c8   :  { %3664 = vmatprep.mubr.bf16.mxu0 %v10578_v45  ;;  %3828 = vmatprep.mubr.bf16.mxu1 %v10578_v45  ;;  %v458_v45 = vld [vmem:[%s13457_s1 + $0xd18] sm:$0xff]  ;;  %v8942_v7 = vcombine.high %v529_v63, %v533_v0 }
 0x1c9   :  { %v8872_v50 = vcombine.high %v458_v45, %v462_v46  ;;  %v8871_v59 = vcombine.low %v458_v45, %v462_v46  ;;  %v517_v45 = vld [vmem:[%s13457_s1 + $0xef0] sm:$0xff]  ;;  %v514_v46 = vld [vmem:[%s13457_s1 + $0xed8] sm:$0xff] }
 0x1ca   :  { %3635 = vmatpush1.bf16.msra.mxu0 %v8845_v22  ;;  %3799 = vmatpush1.bf16.msra.mxu1 %v8847_v33  ;;  %v502_v22 = vld [vmem:[%s13457_s1 + $0xe78] sm:$0xff]  ;;  %v8901_v33 = vcombine.low %v489_v23, %v493_v12  ;;  %v545_v12 = vld [vmem:[%s13457_s1 + $0xfd0] sm:$0xff] }
 0x1cb   :  { %3636 = vmatprep.subr.bf16.mxu0 %v8854_v34  ;;  %3800 = vmatprep.subr.bf16.mxu1 %v8856_v35  ;;  %v8903_v34 = vcombine.low %v490_v24, %v494_v26  ;;  %v8910_v35 = vcombine.high %v497_v30, %v501_v21  ;;  %v8912_v37 = vcombine.high %v498_v32, %v502_v22  ;;  %v549_v24 = vld [vmem:[%s13457_s1 + $0xff0] sm:$0xff] }
 0x1ce   :  { %3637 = vmatpush1.bf16.msra.mxu0 %v8853_v41  ;;  %3801 = vmatpush1.bf16.msra.mxu1 %v8855_v31  ;;  %v510_v41 = vld [vmem:[%s13457_s1 + $0xeb8] sm:$0xff]  ;;  %v8909_v31 = vcombine.low %v497_v30, %v501_v21  ;;  %v8958_v30 = vcombine.high %v545_v12, %v549_v24 }
 0x1cf   :  { %3638 = vmatprep.subr.bf16.mxu0 %v8862_v25  ;;  %3802 = vmatprep.subr.bf16.mxu1 %v8864_v42  ;;  %v8911_v25 = vcombine.low %v498_v32, %v502_v22  ;;  %v8918_v42 = vcombine.high %v505_v38, %v509_v36  ;;  %v8920_v43 = vcombine.high %v506_v40, %v510_v41  ;;  %v3853_v32 = vld [vmem:[%s13460_s3] sm:$0xff] }
 0x1d0   :  { %v3857_v22 = vld [vmem:[%s13460_s3 + $0x20] sm:$0xff] }
 0x1d2   :  { %3639 = vmatpush1.bf16.msra.mxu0 %v8861_v47  ;;  %3803 = vmatpush1.bf16.msra.mxu1 %v8863_v48  ;;  %v518_v47 = vld [vmem:[%s13457_s1 + $0xef8] sm:$0xff]  ;;  %v8917_v48 = vcombine.low %v505_v38, %v509_v36  ;;  %v8962_v36 = vcombine.high %v3853_v32, %v3857_v22 }
 0x1d3   :  { %3640 = vmatprep.subr.bf16.mxu0 %v8870_v49  ;;  %3804 = vmatprep.subr.bf16.mxu1 %v8872_v50  ;;  %v8919_v49 = vcombine.low %v506_v40, %v510_v41  ;;  %v8926_v50 = vcombine.high %v513_v44, %v517_v45  ;;  %v8928_v51 = vcombine.high %v514_v46, %v518_v47 }
 0x1d6   :  { %3641 = vmatpush1.bf16.msra.mxu0 %v8869_v58  ;;  %3805 = vmatpush1.bf16.msra.mxu1 %v8871_v59  ;;  %v522_v58 = vld [vmem:[%s13457_s1 + $0xf18] sm:$0xff] }
 0x1d7   :  { %3642 = vmatprep.subr.bf16.mxu0 %v8878_v60  ;;  %3806 = vmatprep.subr.bf16.mxu1 %v8880_v61  ;;  %v526_v59 = vld [vmem:[%s13457_s1 + $0xf38] sm:$0xff]  ;;  %v8925_v60 = vcombine.low %v513_v44, %v517_v45  ;;  %v8927_v61 = vcombine.low %v514_v46, %v518_v47  ;;  %v3869_v46 = vld [vmem:[%s13460_s3 + $0x80] sm:$0xff] }
 0x1d8   :  { %v11426_v4 = vpop.f32.mrb[0].mxu0  ;;  %v11434_v8 = vpop.f32.mrb[0].mxu1  ;;  %v8936_v39 = vcombine.high %v522_v58, %v526_v59  ;;  %v8935_v6 = vcombine.low %v522_v58, %v526_v59  ;;  %v3873_v47 = vld [vmem:[%s13460_s3 + $0xa0] sm:$0xff] }
 0x1d9   :  { %v11436_v9 = vpop.f32.mrb[1].mxu0  ;;  %v11444_v13 = vpop.f32.mrb[1].mxu1  ;;  %v3877_v59 = vld [vmem:[%s13460_s3 + $0xc0] sm:$0xff] }
 0x1da   :  { %v3342_v14 = vpop.f32.mrb[2].mxu0  ;;  %3643 = vmatpush1.bf16.msra.mxu0 %v8877_v1  ;;  %v3506_v17 = vpop.f32.mrb[2].mxu1  ;;  %3807 = vmatpush1.bf16.msra.mxu1 %v8879_v2  ;;  %v11512_v1 = vshrl.u32 %v553_v56, 7  ;;  %v530_v2 = vld [vmem:[%s13457_s1 + $0xf58] sm:$0xff]  ;;  %v8978_v56 = vcombine.high %v3869_v46, %v3873_v47 }
 0x1db   :  { %v3343_v57 = vpop.f32.mrb[3].mxu0  ;;  %3644 = vmatprep.subr.bf16.mxu0 %v8886_v3  ;;  %v3507_v19 = vpop.f32.mrb[3].mxu1  ;;  %3808 = vmatprep.subr.bf16.mxu1 %v8888_v5  ;;  %v534_v3 = vld [vmem:[%s13457_s1 + $0xf78] sm:$0xff]  ;;  %v8933_v5 = vcombine.low %v521_v52, %v525_v54  ;;  %v541_v14 = vld [vmem:[%s13457_s1 + $0xfb0] sm:$0xff] }
 0x1dc   :  { %v8944_v10 = vcombine.high %v530_v2, %v534_v3  ;;  %v538_v17 = vld [vmem:[%s13457_s1 + $0xf98] sm:$0xff]  ;;  %v8943_v19 = vcombine.low %v530_v2, %v534_v3  ;;  %v3885_v2 = vld [vmem:[%s13460_s3 + $0x100] sm:$0xff] }
 0x1dd   :  { %v542_v57 = vld [vmem:[%s13457_s1 + $0xfb8] sm:$0xff]  ;;  %v3889_v3 = vld [vmem:[%s13460_s3 + $0x120] sm:$0xff] }
 0x1de   :  { %3645 = vmatpush1.bf16.msra.mxu0 %v8885_v16  ;;  %3809 = vmatpush1.bf16.msra.mxu1 %v8887_v53  ;;  %v559_v16 = vsub.s32 1, %v11512_v1  ;;  %v11536_v53 = vld [vmem:[%s13459_s2] sm:$0xff]  ;;  %v8952_v23 = vcombine.high %v538_v17, %v542_v57 }
 0x1df   :  { %3646 = vmatprep.subr.bf16.mxu0 %v8894_v18  ;;  %3810 = vmatprep.subr.bf16.mxu1 %v8896_v20  ;;  %v8941_v18 = vcombine.low %v529_v63, %v533_v0  ;;  %v8950_v20 = vcombine.high %v537_v11, %v541_v14 }
 0x1e0   :  { %v560_v26 = vrot.slane %v11536_v53, %v559_v16 }
 0x1e2   :  { %3647 = vmatpush1.bf16.msra.mxu0 %v8893_v27  ;;  %3811 = vmatpush1.bf16.msra.mxu1 %v8895_v15  ;;  %v546_v27 = vld [vmem:[%s13457_s1 + $0xfd8] sm:$0xff] }
 0x1e3   :  { %3648 = vmatprep.subr.bf16.mxu0 %v8902_v28  ;;  %3812 = vmatprep.subr.bf16.mxu1 %v8904_v29  ;;  %v550_v15 = vld [vmem:[%s13457_s1 + $0xff8] sm:$0xff]  ;;  %v8949_v28 = vcombine.low %v537_v11, %v541_v14  ;;  %v8951_v29 = vcombine.low %v538_v17, %v542_v57  ;;  %v8994_v11 = vcombine.high %v3885_v2, %v3889_v3  ;;  %v3893_v17 = vld [vmem:[%s13460_s3 + $0x140] sm:$0xff] }
 0x1e4   :  { %v8960_v21 = vcombine.high %v546_v27, %v550_v15  ;;  %v8959_v38 = vcombine.low %v546_v27, %v550_v15  ;;  %v3897_v57 = vld [vmem:[%s13460_s3 + $0x160] sm:$0xff]  ;;  %v3902_v15 = vld [vmem:[%s13460_s3 + $0x188] sm:$0xff] }
 0x1e5   :  { %v3905_v27 = vld [vmem:[%s13460_s3 + $0x1a0] sm:$0xff] }
 0x1e6   :  { %3649 = vmatpush1.bf16.msra.mxu0 %v8901_v33  ;;  %3813 = vmatpush1.bf16.msra.mxu1 %v8903_v34  ;;  %v9665_v33 = vadd.f32 %v11436_v9, %v560_v26  ;;  %v3854_v34 = vld [vmem:[%s13460_s3 + $0x8] sm:$0xff]  ;;  %v3861_v9 = vld [vmem:[%s13460_s3 + $0x40] sm:$0xff] }
 0x1e7   :  { %3650 = vmatprep.subr.bf16.mxu0 %v8910_v35  ;;  %3814 = vmatprep.subr.bf16.mxu1 %v8912_v37  ;;  %v3858_v35 = vld [vmem:[%s13460_s3 + $0x28] sm:$0xff]  ;;  %v8957_v37 = vcombine.low %v545_v12, %v549_v24  ;;  %v9002_v12 = vcombine.high %v3893_v17, %v3897_v57  ;;  %v3901_v26 = vld [vmem:[%s13460_s3 + $0x180] sm:$0xff] }
 0x1e8   :  { %v8964_v40 = vcombine.high %v3854_v34, %v3858_v35  ;;  %v3838_v41 = vmax.f32 %v9665_v33, 0.0  ;;  %v8963_v44 = vcombine.low %v3854_v34, %v3858_v35  ;;  %v3913_v33 = vld [vmem:[%s13460_s3 + $0x1e0] sm:$0xff]  ;;  %v3910_v34 = vld [vmem:[%s13460_s3 + $0x1c8] sm:$0xff] }
 0x1e9   :  { %v3914_v35 = vld [vmem:[%s13460_s3 + $0x1e8] sm:$0xff] }
 0x1ea   :  { %3651 = vmatpush1.bf16.msra.mxu0 %v8909_v31  ;;  %3815 = vmatpush1.bf16.msra.mxu1 %v8911_v25  ;;  %v3865_v31 = vld [vmem:[%s13460_s3 + $0x60] sm:$0xff]  ;;  %v8961_v25 = vcombine.low %v3853_v32, %v3857_v22 }
 0x1eb   :  { %3652 = vmatprep.subr.bf16.mxu0 %v8918_v42  ;;  %3816 = vmatprep.subr.bf16.mxu1 %v8920_v43  ;;  %v3862_v42 = vld [vmem:[%s13460_s3 + $0x48] sm:$0xff]  ;;  %v8970_v45 = vcombine.high %v3861_v9, %v3865_v31  ;;  %v8969_v52 = vcombine.low %v3861_v9, %v3865_v31  ;;  %v3909_v22 = vld [vmem:[%s13460_s3 + $0x1c0] sm:$0xff] }
 0x1ec   :  { %v3866_v43 = vld [vmem:[%s13460_s3 + $0x68] sm:$0xff]  ;;  %v3921_v9 = vld [vmem:[%s13460_s3 + $0x220] sm:$0xff] }
 0x1ed   :  { %v8971_v54 = vcombine.low %v3862_v42, %v3866_v43  ;;  %v3918_v31 = vld [vmem:[%s13460_s3 + $0x208] sm:$0xff] }
 0x1ee   :  { %3653 = vmatpush1.bf16.msra.mxu0 %v8917_v48  ;;  %3817 = vmatpush1.bf16.msra.mxu1 %v8919_v49  ;;  %v11584_v48 = vpack.c.bf16 %v3838_v41, %v3838_v41  ;;  %v8972_v49 = vcombine.high %v3862_v42, %v3866_v43  ;;  %v3917_v41 = vld [vmem:[%s13460_s3 + $0x200] sm:$0xff]  ;;  %v9017_v42 = vcombine.low %v3909_v22, %v3913_v33 }
 0x1ef   :  { %3654 = vmatprep.subr.bf16.mxu0 %v8926_v50  ;;  %3818 = vmatprep.subr.bf16.mxu1 %v8928_v51  ;;  %v3870_v50 = vld [vmem:[%s13460_s3 + $0x88] sm:$0xff]  ;;  %v9019_v43 = vcombine.low %v3910_v34, %v3914_v35 }
 0x1f0   :  { %v3874_v51 = vld [vmem:[%s13460_s3 + $0xa8] sm:$0xff] }
 0x1f1   :  { %v8980_v58 = vcombine.high %v3870_v50, %v3874_v51 }
 0x1f2   :  { %3655 = vmatpush1.bf16.msra.mxu0 %v8925_v60  ;;  %3819 = vmatpush1.bf16.msra.mxu1 %v8927_v61  ;;  %v3881_v60 = vld [vmem:[%s13460_s3 + $0xe0] sm:$0xff]  ;;  %v3882_v61 = vld [vmem:[%s13460_s3 + $0xe8] sm:$0xff] }
 0x1f3   :  { %3656 = vmatprep.subr.bf16.mxu0 %v8934_v62  ;;  %3820 = vmatprep.subr.bf16.mxu1 %v8936_v39  ;;  %v8977_v62 = vcombine.low %v3869_v46, %v3873_v47  ;;  %v8979_v39 = vcombine.low %v3870_v50, %v3874_v51  ;;  %v8986_v63 = vcombine.high %v3877_v59, %v3881_v60  ;;  %v3925_v46 = vld [vmem:[%s13460_s3 + $0x240] sm:$0xff]  ;;  %v3930_v50 = vld [vmem:[%s13460_s3 + $0x268] sm:$0xff] }
 0x1f4   :  { %v3929_v47 = vld [vmem:[%s13460_s3 + $0x260] sm:$0xff]  ;;  %v9025_v51 = vcombine.low %v3917_v41, %v3921_v9 }
 0x1f6   :  { %3657 = vmatpush1.bf16.msra.mxu0 %v8933_v5  ;;  %3821 = vmatpush1.bf16.msra.mxu1 %v8935_v6  ;;  %v3886_v5 = vld [vmem:[%s13460_s3 + $0x108] sm:$0xff] }
 0x1f7   :  { %3658 = vmatprep.subr.bf16.mxu0 %v8942_v7  ;;  %3822 = vmatprep.subr.bf16.mxu1 %v8944_v10  ;;  %v3890_v6 = vld [vmem:[%s13460_s3 + $0x128] sm:$0xff]  ;;  %v8985_v7 = vcombine.low %v3877_v59, %v3881_v60  ;;  %v3937_v59 = vld [vmem:[%s13460_s3 + $0x2a0] sm:$0xff] }
 0x1f8   :  { %v8996_v14 = vcombine.high %v3886_v5, %v3890_v6  ;;  %v3934_v60 = vld [vmem:[%s13460_s3 + $0x288] sm:$0xff] }
 0x1fa   :  { %3659 = vmatpush1.bf16.msra.mxu0 %v8941_v18  ;;  %3823 = vmatpush1.bf16.msra.mxu1 %v8943_v19  ;;  %v3894_v18 = vld [vmem:[%s13460_s3 + $0x148] sm:$0xff] }
 0x1fb   :  { %3660 = vmatprep.subr.bf16.mxu0 %v8950_v20  ;;  %3824 = vmatprep.subr.bf16.mxu1 %v8952_v23  ;;  %v3898_v19 = vld [vmem:[%s13460_s3 + $0x168] sm:$0xff]  ;;  %v8993_v20 = vcombine.low %v3885_v2, %v3889_v3  ;;  %v8995_v23 = vcombine.low %v3886_v5, %v3890_v6  ;;  %v3945_v2 = vld [vmem:[%s13460_s3 + $0x2e0] sm:$0xff] }
 0x1fc   :  { %v9004_v24 = vcombine.high %v3894_v18, %v3898_v19  ;;  %v3942_v3 = vld [vmem:[%s13460_s3 + $0x2c8] sm:$0xff] }
 0x1fd   :  { %v3946_v5 = vld [vmem:[%s13460_s3 + $0x2e8] sm:$0xff] }
 0x1fe   :  { %3661 = vmatpush1.bf16.msra.mxu0 %v8949_v28  ;;  %3825 = vmatpush1.bf16.msra.mxu1 %v8951_v29  ;;  %v3906_v28 = vld [vmem:[%s13460_s3 + $0x1a8] sm:$0xff]  ;;  %v9001_v29 = vcombine.low %v3893_v17, %v3897_v57  ;;  %v3953_v17 = vld [vmem:[%s13460_s3 + $0x320] sm:$0xff] }
 0x1ff   :  { %3662 = vmatprep.subr.bf16.mxu0 %v8958_v30  ;;  %3826 = vmatprep.subr.bf16.mxu1 %v8960_v21  ;;  %v9003_v30 = vcombine.low %v3894_v18, %v3898_v19  ;;  %v9010_v21 = vcombine.high %v3901_v26, %v3905_v27  ;;  %v9012_v32 = vcombine.high %v3902_v15, %v3906_v28  ;;  %v3950_v57 = vld [vmem:[%s13460_s3 + $0x308] sm:$0xff] }
 0x200   :  { %v3954_v18 = vld [vmem:[%s13460_s3 + $0x328] sm:$0xff] }
 0x202   :  { %3663 = vmatpush1.bf16.msra.mxu0 %v8957_v37  ;;  %3827 = vmatpush1.bf16.msra.mxu1 %v8959_v38  ;;  %v9009_v37 = vcombine.low %v3901_v26, %v3905_v27  ;;  %v9011_v38 = vcombine.low %v3902_v15, %v3906_v28  ;;  %v3961_v26 = vld [vmem:[%s13460_s3 + $0x360] sm:$0xff]  ;;  %v3958_v27 = vld [vmem:[%s13460_s3 + $0x348] sm:$0xff] }
 0x203   :  { %6967 = vmatprep.subr.bf16.mxu0 %v8962_v36  ;;  %7131 = vmatprep.subr.bf16.mxu1 %v8964_v40  ;;  %v9018_v36 = vcombine.high %v3909_v22, %v3913_v33  ;;  %v9020_v40 = vcombine.high %v3910_v34, %v3914_v35  ;;  %v3962_v15 = vld [vmem:[%s13460_s3 + $0x368] sm:$0xff]  ;;  %v3965_v22 = vld [vmem:[%s13460_s3 + $0x380] sm:$0xff]  ;;  %v567_v34 = vsub.s32 3, %v11512_v1 }
 0x204   :  { %v3969_v33 = vld [vmem:[%s13460_s3 + $0x3a0] sm:$0xff]  ;;  %v3966_v35 = vld [vmem:[%s13460_s3 + $0x388] sm:$0xff] }
 0x205   :  { %3665 = vmatmul.mubr.bf16.vlgmr.msra.gmra.mrb[4].mxu0 %v10766_v55  ;;  %3829 = vmatmul.mubr.bf16.vlgmr.msra.gmra.mrb[4].mxu1 %v10766_v55  ;;  %v3878_v55 = vld [vmem:[%s13460_s3 + $0xc8] sm:$0xff] }
 0x206   :  { %6968 = vmatpush1.bf16.msra.mxu0 %v8961_v25  ;;  %6999 = vmatprep.mubr.bf16.mxu0 %v11584_v48  ;;  %v8988_v0 = vcombine.high %v3878_v55, %v3882_v61  ;;  %v8987_v10 = vcombine.low %v3878_v55, %v3882_v61  ;;  %v3922_v25 = vld [vmem:[%s13460_s3 + $0x228] sm:$0xff]  ;;  %v9033_v61 = vcombine.low %v3925_v46, %v3929_v47 }
 0x207   :  { %7132 = vmatpush1.bf16.msra.mxu1 %v8963_v44  ;;  %7163 = vmatprep.mubr.bf16.mxu1 %v11584_v48  ;;  %v9026_v44 = vcombine.high %v3917_v41, %v3921_v9  ;;  %v3938_v55 = vld [vmem:[%s13460_s3 + $0x2a8] sm:$0xff]  ;;  %v9074_v41 = vcombine.high %v3965_v22, %v3969_v33 }
 0x208   :  { %6969 = vmatprep.subr.bf16.mxu0 %v8970_v45  ;;  %7133 = vmatprep.subr.bf16.mxu1 %v8972_v49  ;;  %v9028_v45 = vcombine.high %v3918_v31, %v3922_v25  ;;  %v3926_v49 = vld [vmem:[%s13460_s3 + $0x248] sm:$0xff] }
 0x20a   :  { %6970 = vmatpush1.bf16.msra.mxu0 %v8969_v52  ;;  %v9027_v52 = vcombine.low %v3918_v31, %v3922_v25  ;;  %v3973_v31 = vld [vmem:[%s13460_s3 + $0x3c0] sm:$0xff] }
 0x20b   :  { %7134 = vmatpush1.bf16.msra.mxu1 %v8971_v54  ;;  %6971 = vmatprep.subr.bf16.mxu0 %v8978_v56  ;;  %v9034_v54 = vcombine.high %v3925_v46, %v3929_v47  ;;  %v9036_v56 = vcombine.high %v3926_v49, %v3930_v50  ;;  %v3977_v25 = vld [vmem:[%s13460_s3 + $0x3e0] sm:$0xff] }
 0x20c   :  { %7135 = vmatprep.subr.bf16.mxu1 %v8980_v58  ;;  %v3933_v58 = vld [vmem:[%s13460_s3 + $0x280] sm:$0xff] }
 0x20d   :  { %v9041_v6 = vcombine.low %v3933_v58, %v3937_v59 }
 0x20e   :  { %6972 = vmatpush1.bf16.msra.mxu0 %v8977_v62  ;;  %v9035_v62 = vcombine.low %v3926_v49, %v3930_v50  ;;  %v9082_v49 = vcombine.high %v3973_v31, %v3977_v25 }
 0x20f   :  { %7136 = vmatpush1.bf16.msra.mxu1 %v8979_v39  ;;  %6973 = vmatprep.subr.bf16.mxu0 %v8986_v63  ;;  %v9042_v39 = vcombine.high %v3933_v58, %v3937_v59  ;;  %v9044_v63 = vcombine.high %v3934_v60, %v3938_v55  ;;  %v9081_v58 = vcombine.low %v3973_v31, %v3977_v25  ;;  %v4022_v31 = vld [vmem:[%s13460_s3 + $0x548] sm:$0xff] }
 0x210   :  { %7137 = vmatprep.subr.bf16.mxu1 %v8988_v0  ;;  %v3941_v0 = vld [vmem:[%s13460_s3 + $0x2c0] sm:$0xff]  ;;  %v4026_v25 = vld [vmem:[%s13460_s3 + $0x568] sm:$0xff] }
 0x211   :  { %v9049_v19 = vcombine.low %v3941_v0, %v3945_v2 }
 0x212   :  { %6974 = vmatpush1.bf16.msra.mxu0 %v8985_v7  ;;  %v9043_v7 = vcombine.low %v3934_v60, %v3938_v55 }
 0x213   :  { %7138 = vmatpush1.bf16.msra.mxu1 %v8987_v10  ;;  %6975 = vmatprep.subr.bf16.mxu0 %v8994_v11  ;;  %v9050_v10 = vcombine.high %v3941_v0, %v3945_v2  ;;  %v9052_v11 = vcombine.high %v3942_v3, %v3946_v5  ;;  %v3990_v0 = vld [vmem:[%s13460_s3 + $0x448] sm:$0xff] }
 0x214   :  { %7139 = vmatprep.subr.bf16.mxu1 %v8996_v14  ;;  %v3949_v14 = vld [vmem:[%s13460_s3 + $0x300] sm:$0xff]  ;;  %v3994_v2 = vld [vmem:[%s13460_s3 + $0x468] sm:$0xff] }
 0x215   :  { %v9057_v28 = vcombine.low %v3949_v14, %v3953_v17 }
 0x216   :  { %6976 = vmatpush1.bf16.msra.mxu0 %v8993_v20  ;;  %v9051_v20 = vcombine.low %v3942_v3, %v3946_v5 }
 0x217   :  { %7140 = vmatpush1.bf16.msra.mxu1 %v8995_v23  ;;  %6977 = vmatprep.subr.bf16.mxu0 %v9002_v12  ;;  %v9058_v23 = vcombine.high %v3949_v14, %v3953_v17  ;;  %v9060_v12 = vcombine.high %v3950_v57, %v3954_v18  ;;  %v9100_v14 = vcombine.high %v3990_v0, %v3994_v2  ;;  %v3998_v17 = vld [vmem:[%s13460_s3 + $0x488] sm:$0xff] }
 0x218   :  { %7141 = vmatprep.subr.bf16.mxu1 %v9004_v24  ;;  %v3957_v24 = vld [vmem:[%s13460_s3 + $0x340] sm:$0xff] }
 0x21a   :  { %6978 = vmatpush1.bf16.msra.mxu0 %v9001_v29  ;;  %v555_v29 = vsub.s32 0, %v11512_v1 }
 0x21b   :  { %7142 = vmatpush1.bf16.msra.mxu1 %v9003_v30  ;;  %6979 = vmatprep.subr.bf16.mxu0 %v9010_v21  ;;  %v9059_v30 = vcombine.low %v3950_v57, %v3954_v18  ;;  %v9066_v21 = vcombine.high %v3957_v24, %v3961_v26  ;;  %v4002_v57 = vld [vmem:[%s13460_s3 + $0x4a8] sm:$0xff] }
 0x21c   :  { %7143 = vmatprep.subr.bf16.mxu1 %v9012_v32  ;;  %v9068_v32 = vcombine.high %v3958_v27, %v3962_v15 }
 0x21e   :  { %6980 = vmatpush1.bf16.msra.mxu0 %v9009_v37  ;;  %v3970_v37 = vld [vmem:[%s13460_s3 + $0x3a8] sm:$0xff] }
 0x21f   :  { %7144 = vmatpush1.bf16.msra.mxu1 %v9011_v38  ;;  %6981 = vmatprep.subr.bf16.mxu0 %v9018_v36  ;;  %v9065_v38 = vcombine.low %v3957_v24, %v3961_v26  ;;  %v556_v36 = vrot.slane %v11536_v53, %v555_v29  ;;  %v9076_v9 = vcombine.high %v3966_v35, %v3970_v37  ;;  %v4009_v24 = vld [vmem:[%s13460_s3 + $0x4e0] sm:$0xff]  ;;  %v4006_v26 = vld [vmem:[%s13460_s3 + $0x4c8] sm:$0xff] }
 0x220   :  { %7145 = vmatprep.subr.bf16.mxu1 %v9020_v40  ;;  %v9067_v40 = vcombine.low %v3958_v27, %v3962_v15  ;;  %v9075_v47 = vcombine.low %v3966_v35, %v3970_v37  ;;  %v4010_v27 = vld [vmem:[%s13460_s3 + $0x4e8] sm:$0xff] }
 0x221   :  { %v9664_v46 = vadd.f32 %v11426_v4, %v556_v36  ;;  %v3982_v4 = vld [vmem:[%s13460_s3 + $0x408] sm:$0xff] }
 0x222   :  { %6982 = vmatpush1.bf16.msra.mxu0 %v9017_v42  ;;  %v568_v42 = vrot.slane %v11536_v53, %v567_v34  ;;  %v4018_v35 = vld [vmem:[%s13460_s3 + $0x528] sm:$0xff] }
 0x223   :  { %7146 = vmatpush1.bf16.msra.mxu1 %v9019_v43  ;;  %6983 = vmatprep.subr.bf16.mxu0 %v9026_v44  ;;  %v3974_v43 = vld [vmem:[%s13460_s3 + $0x3c8] sm:$0xff]  ;;  %v3837_v59 = vmax.f32 %v9664_v46, 0.0  ;;  %v4029_v46 = vld [vmem:[%s13460_s3 + $0x580] sm:$0xff] }
 0x224   :  { %7147 = vmatprep.subr.bf16.mxu1 %v9028_v45  ;;  %v3978_v44 = vld [vmem:[%s13460_s3 + $0x3e8] sm:$0xff]  ;;  %v9073_v45 = vcombine.low %v3965_v22, %v3969_v33  ;;  %v4017_v22 = vld [vmem:[%s13460_s3 + $0x520] sm:$0xff] }
 0x225   :  { %v9084_v50 = vcombine.high %v3974_v43, %v3978_v44  ;;  %v9083_v60 = vcombine.low %v3974_v43, %v3978_v44  ;;  %v11786_v3 = vpack.c.bf16 %v3837_v59, %v3837_v59  ;;  %v4014_v33 = vld [vmem:[%s13460_s3 + $0x508] sm:$0xff] }
 0x226   :  { %6984 = vmatpush1.bf16.msra.mxu0 %v9025_v51  ;;  %v3981_v51 = vld [vmem:[%s13460_s3 + $0x400] sm:$0xff]  ;;  %v9123_v43 = vcombine.low %v4014_v33, %v4018_v35  ;;  %v4038_v59 = vld [vmem:[%s13460_s3 + $0x5c8] sm:$0xff] }
 0x227   :  { %7148 = vmatpush1.bf16.msra.mxu1 %v9027_v52  ;;  %6985 = vmatprep.subr.bf16.mxu0 %v9034_v54  ;;  %v3985_v52 = vld [vmem:[%s13460_s3 + $0x420] sm:$0xff]  ;;  %v9667_v54 = vadd.f32 %v11444_v13, %v568_v42 }
 0x228   :  { %7149 = vmatprep.subr.bf16.mxu1 %v9036_v56  ;;  %v3986_v56 = vld [vmem:[%s13460_s3 + $0x428] sm:$0xff]  ;;  %v9090_v55 = vcombine.high %v3981_v51, %v3985_v52  ;;  %v3989_v13 = vld [vmem:[%s13460_s3 + $0x440] sm:$0xff] }
 0x229   :  { %v9091_v5 = vcombine.low %v3982_v4, %v3986_v56 }
 0x22a   :  { %6986 = vmatpush1.bf16.msra.mxu0 %v9033_v61  ;;  %v9092_v61 = vcombine.high %v3982_v4, %v3986_v56  ;;  %v4037_v56 = vld [vmem:[%s13460_s3 + $0x5c0] sm:$0xff] }
 0x22b   :  { %7150 = vmatpush1.bf16.msra.mxu1 %v9035_v62  ;;  %6987 = vmatprep.subr.bf16.mxu0 %v9042_v39  ;;  %v3840_v62 = vmax.f32 %v9667_v54, 0.0  ;;  %v3993_v39 = vld [vmem:[%s13460_s3 + $0x460] sm:$0xff] }
 0x22c   :  { %7151 = vmatprep.subr.bf16.mxu1 %v9044_v63  ;;  %v9089_v63 = vcombine.low %v3981_v51, %v3985_v52  ;;  %v9097_v18 = vcombine.low %v3989_v13, %v3993_v39  ;;  %v9131_v52 = vcombine.low %v4022_v31, %v4026_v25 }
 0x22e   :  { %6988 = vmatpush1.bf16.msra.mxu0 %v9041_v6  ;;  %v9098_v6 = vcombine.high %v3989_v13, %v3993_v39  ;;  %v4045_v39 = vld [vmem:[%s13460_s3 + $0x600] sm:$0xff] }
 0x22f   :  { %7152 = vmatpush1.bf16.msra.mxu1 %v9043_v7  ;;  %6989 = vmatprep.subr.bf16.mxu0 %v9050_v10  ;;  %v3997_v7 = vld [vmem:[%s13460_s3 + $0x480] sm:$0xff] }
 0x230   :  { %7153 = vmatprep.subr.bf16.mxu1 %v9052_v11  ;;  %v4001_v10 = vld [vmem:[%s13460_s3 + $0x4a0] sm:$0xff]  ;;  %v11794_v11 = vpack.c.bf16 %v3840_v62, %v3840_v62 }
 0x231   :  { %v9105_v15 = vcombine.low %v3997_v7, %v4001_v10 }
 0x232   :  { %6990 = vmatpush1.bf16.msra.mxu0 %v9049_v19  ;;  %v9099_v19 = vcombine.low %v3990_v0, %v3994_v2  ;;  %v4046_v0 = vld [vmem:[%s13460_s3 + $0x608] sm:$0xff] }
 0x233   :  { %7154 = vmatpush1.bf16.msra.mxu1 %v9051_v20  ;;  %6991 = vmatprep.subr.bf16.mxu0 %v9058_v23  ;;  %v9106_v20 = vcombine.high %v3997_v7, %v4001_v10  ;;  %v9108_v23 = vcombine.high %v3998_v17, %v4002_v57  ;;  %v4050_v2 = vld [vmem:[%s13460_s3 + $0x628] sm:$0xff] }
 0x234   :  { %7155 = vmatprep.subr.bf16.mxu1 %v9060_v12  ;;  %v4005_v12 = vld [vmem:[%s13460_s3 + $0x4c0] sm:$0xff]  ;;  %v9156_v10 = vcombine.high %v4046_v0, %v4050_v2 }
 0x235   :  { %v9113_v37 = vcombine.low %v4005_v12, %v4009_v24 }
 0x236   :  { %6992 = vmatpush1.bf16.msra.mxu0 %v9057_v28  ;;  %v9107_v28 = vcombine.low %v3998_v17, %v4002_v57  ;;  %v4057_v17 = vld [vmem:[%s13460_s3 + $0x660] sm:$0xff]  ;;  %v4054_v57 = vld [vmem:[%s13460_s3 + $0x648] sm:$0xff] }
 0x237   :  { %7156 = vmatpush1.bf16.msra.mxu1 %v9059_v30  ;;  %6993 = vmatprep.subr.bf16.mxu0 %v9066_v21  ;;  %v9114_v30 = vcombine.high %v4005_v12, %v4009_v24  ;;  %v9116_v21 = vcombine.high %v4006_v26, %v4010_v27  ;;  %v4061_v24 = vld [vmem:[%s13460_s3 + $0x680] sm:$0xff] }
 0x238   :  { %7157 = vmatprep.subr.bf16.mxu1 %v9068_v32  ;;  %v4013_v32 = vld [vmem:[%s13460_s3 + $0x500] sm:$0xff] }
 0x239   :  { %v9122_v36 = vcombine.high %v4013_v32, %v4017_v22  ;;  %v9121_v42 = vcombine.low %v4013_v32, %v4017_v22  ;;  %v4069_v22 = vld [vmem:[%s13460_s3 + $0x6c0] sm:$0xff] }
 0x23a   :  { %6994 = vmatpush1.bf16.msra.mxu0 %v9065_v38  ;;  %v9115_v38 = vcombine.low %v4006_v26, %v4010_v27  ;;  %v4065_v26 = vld [vmem:[%s13460_s3 + $0x6a0] sm:$0xff]  ;;  %v4062_v27 = vld [vmem:[%s13460_s3 + $0x688] sm:$0xff] }
 0x23b   :  { %7158 = vmatpush1.bf16.msra.mxu1 %v9067_v40  ;;  %6995 = vmatprep.subr.bf16.mxu0 %v9074_v41  ;;  %v9124_v40 = vcombine.high %v4014_v33, %v4018_v35  ;;  %v4021_v41 = vld [vmem:[%s13460_s3 + $0x540] sm:$0xff]  ;;  %v4070_v35 = vld [vmem:[%s13460_s3 + $0x6c8] sm:$0xff] }
 0x23c   :  { %7159 = vmatprep.subr.bf16.mxu1 %v9076_v9  ;;  %v4025_v9 = vld [vmem:[%s13460_s3 + $0x560] sm:$0xff] }
 0x23d   :  { %v9130_v44 = vcombine.high %v4021_v41, %v4025_v9  ;;  %v9129_v51 = vcombine.low %v4021_v41, %v4025_v9  ;;  %v4073_v33 = vld [vmem:[%s13460_s3 + $0x6e0] sm:$0xff] }
 0x23e   :  { %6996 = vmatpush1.bf16.msra.mxu0 %v9073_v45  ;;  %v9132_v45 = vcombine.high %v4022_v31, %v4026_v25  ;;  %v4077_v9 = vld [vmem:[%s13460_s3 + $0x700] sm:$0xff]  ;;  %v4078_v25 = vld [vmem:[%s13460_s3 + $0x708] sm:$0xff] }
 0x23f   :  { %7160 = vmatpush1.bf16.msra.mxu1 %v9075_v47  ;;  %6997 = vmatprep.subr.bf16.mxu0 %v9082_v49  ;;  %v4033_v47 = vld [vmem:[%s13460_s3 + $0x5a0] sm:$0xff]  ;;  %v4030_v49 = vld [vmem:[%s13460_s3 + $0x588] sm:$0xff] }
 0x240   :  { %7161 = vmatprep.subr.bf16.mxu1 %v9084_v50  ;;  %v4034_v50 = vld [vmem:[%s13460_s3 + $0x5a8] sm:$0xff]  ;;  %v9138_v54 = vcombine.high %v4029_v46, %v4033_v47  ;;  %v4081_v31 = vld [vmem:[%s13460_s3 + $0x720] sm:$0xff] }
 0x241   :  { %v9140_v4 = vcombine.high %v4030_v49, %v4034_v50 }
 0x242   :  { %6998 = vmatpush1.bf16.msra.mxu0 %v9081_v58  ;;  %v4041_v58 = vld [vmem:[%s13460_s3 + $0x5e0] sm:$0xff] }
 0x243   :  { %7162 = vmatpush1.bf16.msra.mxu1 %v9083_v60  ;;  %7008 = vmatprep.subr.bf16.mxu0 %v9090_v55  ;;  %v4042_v60 = vld [vmem:[%s13460_s3 + $0x5e8] sm:$0xff]  ;;  %v9137_v55 = vcombine.low %v4029_v46, %v4033_v47  ;;  %v9146_v62 = vcombine.high %v4037_v56, %v4041_v58  ;;  %v4085_v47 = vld [vmem:[%s13460_s3 + $0x740] sm:$0xff] }
 0x244   :  { %7172 = vmatprep.subr.bf16.mxu1 %v9092_v61  ;;  %v9139_v61 = vcombine.low %v4030_v49, %v4034_v50  ;;  %v9148_v13 = vcombine.high %v4038_v59, %v4042_v60  ;;  %v4089_v49 = vld [vmem:[%s13460_s3 + $0x760] sm:$0xff]  ;;  %v4086_v50 = vld [vmem:[%s13460_s3 + $0x748] sm:$0xff] }
 0x245   :  { %7000 = vmatmul.mubr.bf16.vlgmr.msra.gmra.mrb[8].mxu0 %v11786_v3 }
 0x246   :  { %7164 = vmatmul.mubr.bf16.vlgmr.msra.gmra.mrb[8].mxu1 %v11786_v3  ;;  %7009 = vmatpush1.bf16.msra.mxu0 %v9089_v63  ;;  %v4049_v63 = vld [vmem:[%s13460_s3 + $0x620] sm:$0xff] }
 0x247   :  { %7040 = vmatprep.mubr.bf16.mxu0 %v11794_v11  ;;  %7173 = vmatpush1.bf16.msra.mxu1 %v9091_v5  ;;  %v9145_v5 = vcombine.low %v4037_v56, %v4041_v58  ;;  %v9154_v7 = vcombine.high %v4045_v39, %v4049_v63  ;;  %v9194_v56 = vcombine.high %v4085_v47, %v4089_v49 }
 0x248   :  { %7204 = vmatprep.mubr.bf16.mxu1 %v11794_v11  ;;  %7010 = vmatprep.subr.bf16.mxu0 %v9098_v6  ;;  %v9147_v6 = vcombine.low %v4038_v59, %v4042_v60  ;;  %v4093_v59 = vld [vmem:[%s13460_s3 + $0x780] sm:$0xff] }
 0x249   :  { %7174 = vmatprep.subr.bf16.mxu1 %v9100_v14  ;;  %v4053_v14 = vld [vmem:[%s13460_s3 + $0x640] sm:$0xff] }
 0x24a   :  { %7011 = vmatpush1.bf16.msra.mxu0 %v9097_v18  ;;  %v4058_v18 = vld [vmem:[%s13460_s3 + $0x668] sm:$0xff]  ;;  %v4097_v60 = vld [vmem:[%s13460_s3 + $0x7a0] sm:$0xff] }
 0x24b   :  { %7175 = vmatpush1.bf16.msra.mxu1 %v9099_v19  ;;  %7012 = vmatprep.subr.bf16.mxu0 %v9106_v20  ;;  %v9153_v19 = vcombine.low %v4045_v39, %v4049_v63  ;;  %v9155_v20 = vcombine.low %v4046_v0, %v4050_v2  ;;  %v9164_v12 = vcombine.high %v4054_v57, %v4058_v18  ;;  %v4101_v2 = vld [vmem:[%s13460_s3 + $0x7c0] sm:$0xff] }
 0x24c   :  { %7176 = vmatprep.subr.bf16.mxu1 %v9108_v23  ;;  %v9162_v23 = vcombine.high %v4053_v14, %v4057_v17  ;;  %v9202_v63 = vcombine.high %v4093_v59, %v4097_v60 }
 0x24e   :  { %7013 = vmatpush1.bf16.msra.mxu0 %v9105_v15  ;;  %v4066_v15 = vld [vmem:[%s13460_s3 + $0x6a8] sm:$0xff] }
 0x24f   :  { %7177 = vmatpush1.bf16.msra.mxu1 %v9107_v28  ;;  %7014 = vmatprep.subr.bf16.mxu0 %v9114_v30  ;;  %v9161_v28 = vcombine.low %v4053_v14, %v4057_v17  ;;  %v9163_v30 = vcombine.low %v4054_v57, %v4058_v18  ;;  %v9172_v32 = vcombine.high %v4062_v27, %v4066_v15  ;;  %v4109_v18 = vld [vmem:[%s13460_s3 + $0x800] sm:$0xff] }
 0x250   :  { %7178 = vmatprep.subr.bf16.mxu1 %v9116_v21  ;;  %v9170_v21 = vcombine.high %v4061_v24, %v4065_v26 }
 0x252   :  { %7015 = vmatpush1.bf16.msra.mxu0 %v9113_v37  ;;  %v4074_v37 = vld [vmem:[%s13460_s3 + $0x6e8] sm:$0xff] }
 0x253   :  { %7179 = vmatpush1.bf16.msra.mxu1 %v9115_v38  ;;  %7016 = vmatprep.subr.bf16.mxu0 %v9122_v36  ;;  %v9169_v38 = vcombine.low %v4061_v24, %v4065_v26  ;;  %v9171_v36 = vcombine.low %v4062_v27, %v4066_v15  ;;  %v9180_v41 = vcombine.high %v4070_v35, %v4074_v37  ;;  %v4117_v15 = vld [vmem:[%s13460_s3 + $0x840] sm:$0xff] }
 0x254   :  { %7180 = vmatprep.subr.bf16.mxu1 %v9124_v40  ;;  %v9178_v40 = vcombine.high %v4069_v22, %v4073_v33 }
 0x256   :  { %7017 = vmatpush1.bf16.msra.mxu0 %v9121_v42  ;;  %v4082_v42 = vld [vmem:[%s13460_s3 + $0x728] sm:$0xff] }
 0x257   :  { %7181 = vmatpush1.bf16.msra.mxu1 %v9123_v43  ;;  %7018 = vmatprep.subr.bf16.mxu0 %v9130_v44  ;;  %v9177_v43 = vcombine.low %v4069_v22, %v4073_v33  ;;  %v9179_v44 = vcombine.low %v4070_v35, %v4074_v37  ;;  %v9188_v46 = vcombine.high %v4078_v25, %v4082_v42 }
 0x258   :  { %7182 = vmatprep.subr.bf16.mxu1 %v9132_v45  ;;  %v9186_v45 = vcombine.high %v4077_v9, %v4081_v31 }
 0x25a   :  { %7019 = vmatpush1.bf16.msra.mxu0 %v9129_v51  ;;  %v4090_v51 = vld [vmem:[%s13460_s3 + $0x768] sm:$0xff] }
 0x25b   :  { %7183 = vmatpush1.bf16.msra.mxu1 %v9131_v52  ;;  %7020 = vmatprep.subr.bf16.mxu0 %v9138_v54  ;;  %v9185_v52 = vcombine.low %v4077_v9, %v4081_v31  ;;  %v563_v54 = vsub.s32 2, %v11512_v1  ;;  %v9196_v58 = vcombine.high %v4086_v50, %v4090_v51  ;;  %v9195_v39 = vcombine.low %v4086_v50, %v4090_v51 }
 0x25c   :  { %7184 = vmatprep.subr.bf16.mxu1 %v9140_v4  ;;  %v9187_v4 = vcombine.low %v4078_v25, %v4082_v42 }
 0x25e   :  { %7021 = vmatpush1.bf16.msra.mxu0 %v9137_v55  ;;  %v4094_v55 = vld [vmem:[%s13460_s3 + $0x788] sm:$0xff] }
 0x25f   :  { %7185 = vmatpush1.bf16.msra.mxu1 %v9139_v61  ;;  %7022 = vmatprep.subr.bf16.mxu0 %v9146_v62  ;;  %v4098_v61 = vld [vmem:[%s13460_s3 + $0x7a8] sm:$0xff]  ;;  %v9193_v62 = vcombine.low %v4085_v47, %v4089_v49 }
 0x260   :  { %7186 = vmatprep.subr.bf16.mxu1 %v9148_v13  ;;  %v564_v13 = vrot.slane %v11536_v53, %v563_v54  ;;  %v9204_v0 = vcombine.high %v4094_v55, %v4098_v61  ;;  %v4106_v53 = vld [vmem:[%s13460_s3 + $0x7e8] sm:$0xff]  ;;  %v9203_v14 = vcombine.low %v4094_v55, %v4098_v61 }
 0x262   :  { %7023 = vmatpush1.bf16.msra.mxu0 %v9145_v5  ;;  %v4105_v5 = vld [vmem:[%s13460_s3 + $0x7e0] sm:$0xff] }
 0x263   :  { %7187 = vmatpush1.bf16.msra.mxu1 %v9147_v6  ;;  %7024 = vmatprep.subr.bf16.mxu0 %v9154_v7  ;;  %v4102_v6 = vld [vmem:[%s13460_s3 + $0x7c8] sm:$0xff]  ;;  %v9201_v7 = vcombine.low %v4093_v59, %v4097_v60  ;;  %v9210_v17 = vcombine.high %v4101_v2, %v4105_v5 }
 0x264   :  { %7188 = vmatprep.subr.bf16.mxu1 %v9156_v10  ;;  %v9666_v10 = vadd.f32 %v11434_v8, %v564_v13  ;;  %v9212_v57 = vcombine.high %v4102_v6, %v4106_v53  ;;  %v4114_v8 = vld [vmem:[%s13460_s3 + $0x828] sm:$0xff]  ;;  %v9211_v24 = vcombine.low %v4102_v6, %v4106_v53  ;;  %v4153_v13 = vld [vmem:[%s13460_s3 + $0x960] sm:$0xff] }
 0x265   :  { %v4157_v53 = vld [vmem:[%s13460_s3 + $0x980] sm:$0xff] }
 0x266   :  { %7025 = vmatpush1.bf16.msra.mxu0 %v9153_v19  ;;  %v4113_v19 = vld [vmem:[%s13460_s3 + $0x820] sm:$0xff] }
 0x267   :  { %7189 = vmatpush1.bf16.msra.mxu1 %v9155_v20  ;;  %7026 = vmatprep.subr.bf16.mxu0 %v9162_v23  ;;  %v4110_v20 = vld [vmem:[%s13460_s3 + $0x808] sm:$0xff]  ;;  %v9209_v23 = vcombine.low %v4101_v2, %v4105_v5  ;;  %v9218_v26 = vcombine.high %v4109_v18, %v4113_v19 }
 0x268   :  { %7190 = vmatprep.subr.bf16.mxu1 %v9164_v12  ;;  %v3839_v12 = vmax.f32 %v9666_v10, 0.0  ;;  %v9220_v27 = vcombine.high %v4110_v20, %v4114_v8  ;;  %v9219_v33 = vcombine.low %v4110_v20, %v4114_v8  ;;  %v4158_v10 = vld [vmem:[%s13460_s3 + $0x988] sm:$0xff]  ;;  %v4165_v20 = vld [vmem:[%s13460_s3 + $0x9c0] sm:$0xff] }
 0x269   :  { %v4169_v8 = vld [vmem:[%s13460_s3 + $0x9e0] sm:$0xff] }
 0x26a   :  { %7027 = vmatpush1.bf16.msra.mxu0 %v9161_v28  ;;  %v4121_v28 = vld [vmem:[%s13460_s3 + $0x860] sm:$0xff]  ;;  %v11991_v22 = vpack.c.bf16 %v3839_v12, %v3839_v12  ;;  %v4170_v12 = vld [vmem:[%s13460_s3 + $0x9e8] sm:$0xff] }
 0x26b   :  { %7191 = vmatpush1.bf16.msra.mxu1 %v9163_v30  ;;  %7028 = vmatprep.subr.bf16.mxu0 %v9170_v21  ;;  %v4118_v30 = vld [vmem:[%s13460_s3 + $0x848] sm:$0xff]  ;;  %v9226_v35 = vcombine.high %v4117_v15, %v4121_v28  ;;  %v9225_v9 = vcombine.low %v4117_v15, %v4121_v28  ;;  %v4173_v28 = vld [vmem:[%s13460_s3 + $0xa00] sm:$0xff] }
 0x26c   :  { %7192 = vmatprep.subr.bf16.mxu1 %v9172_v32  ;;  %v4122_v21 = vld [vmem:[%s13460_s3 + $0x868] sm:$0xff]  ;;  %v9217_v32 = vcombine.low %v4109_v18, %v4113_v19 }
 0x26d   :  { %v9228_v37 = vcombine.high %v4118_v30, %v4122_v21  ;;  %v9227_v31 = vcombine.low %v4118_v30, %v4122_v21  ;;  %v4177_v30 = vld [vmem:[%s13460_s3 + $0xa20] sm:$0xff]  ;;  %v4174_v21 = vld [vmem:[%s13460_s3 + $0xa08] sm:$0xff] }
 0x26e   :  { %7029 = vmatpush1.bf16.msra.mxu0 %v9169_v38  ;;  %v4125_v38 = vld [vmem:[%s13460_s3 + $0x880] sm:$0xff] }
 0x26f   :  { %7193 = vmatpush1.bf16.msra.mxu1 %v9171_v36  ;;  %7030 = vmatprep.subr.bf16.mxu0 %v9178_v40  ;;  %v4129_v36 = vld [vmem:[%s13460_s3 + $0x8a0] sm:$0xff]  ;;  %v4126_v40 = vld [vmem:[%s13460_s3 + $0x888] sm:$0xff] }
 0x270   :  { %7194 = vmatprep.subr.bf16.mxu1 %v9180_v41  ;;  %v4130_v41 = vld [vmem:[%s13460_s3 + $0x8a8] sm:$0xff]  ;;  %v9234_v25 = vcombine.high %v4125_v38, %v4129_v36  ;;  %v9233_v47 = vcombine.low %v4125_v38, %v4129_v36  ;;  %v4181_v36 = vld [vmem:[%s13460_s3 + $0xa40] sm:$0xff] }
 0x271   :  { %v9236_v42 = vcombine.high %v4126_v40, %v4130_v41  ;;  %v9235_v49 = vcombine.low %v4126_v40, %v4130_v41  ;;  %v4185_v40 = vld [vmem:[%s13460_s3 + $0xa60] sm:$0xff]  ;;  %v4182_v41 = vld [vmem:[%s13460_s3 + $0xa48] sm:$0xff] }
 0x272   :  { %7031 = vmatpush1.bf16.msra.mxu0 %v9177_v43  ;;  %v4133_v43 = vld [vmem:[%s13460_s3 + $0x8c0] sm:$0xff] }
 0x273   :  { %7195 = vmatpush1.bf16.msra.mxu1 %v9179_v44  ;;  %7032 = vmatprep.subr.bf16.mxu0 %v9186_v45  ;;  %v4137_v44 = vld [vmem:[%s13460_s3 + $0x8e0] sm:$0xff]  ;;  %v4134_v45 = vld [vmem:[%s13460_s3 + $0x8c8] sm:$0xff] }
 0x274   :  { %7196 = vmatprep.subr.bf16.mxu1 %v9188_v46  ;;  %v4138_v46 = vld [vmem:[%s13460_s3 + $0x8e8] sm:$0xff]  ;;  %v9242_v50 = vcombine.high %v4133_v43, %v4137_v44  ;;  %v9241_v59 = vcombine.low %v4133_v43, %v4137_v44  ;;  %v4189_v44 = vld [vmem:[%s13460_s3 + $0xa80] sm:$0xff] }
 0x275   :  { %v9244_v51 = vcombine.high %v4134_v45, %v4138_v46  ;;  %v9243_v60 = vcombine.low %v4134_v45, %v4138_v46  ;;  %v4193_v45 = vld [vmem:[%s13460_s3 + $0xaa0] sm:$0xff]  ;;  %v4190_v46 = vld [vmem:[%s13460_s3 + $0xa88] sm:$0xff] }
 0x276   :  { %7033 = vmatpush1.bf16.msra.mxu0 %v9185_v52  ;;  %v4141_v52 = vld [vmem:[%s13460_s3 + $0x900] sm:$0xff] }
 0x277   :  { %7197 = vmatpush1.bf16.msra.mxu1 %v9187_v4  ;;  %7034 = vmatprep.subr.bf16.mxu0 %v9194_v56  ;;  %v4145_v4 = vld [vmem:[%s13460_s3 + $0x920] sm:$0xff]  ;;  %v4142_v56 = vld [vmem:[%s13460_s3 + $0x908] sm:$0xff] }
 0x278   :  { %7198 = vmatprep.subr.bf16.mxu1 %v9196_v58  ;;  %v4146_v58 = vld [vmem:[%s13460_s3 + $0x928] sm:$0xff]  ;;  %v9250_v55 = vcombine.high %v4141_v52, %v4145_v4 }
 0x279   :  { %v9252_v61 = vcombine.high %v4142_v56, %v4146_v58  ;;  %v9251_v2 = vcombine.low %v4142_v56, %v4146_v58  ;;  %v4201_v56 = vld [vmem:[%s13460_s3 + $0xae0] sm:$0xff]  ;;  %v4198_v58 = vld [vmem:[%s13460_s3 + $0xac8] sm:$0xff] }
 0x27a   :  { %7035 = vmatpush1.bf16.msra.mxu0 %v9193_v62  ;;  %v4149_v62 = vld [vmem:[%s13460_s3 + $0x940] sm:$0xff] }
 0x27b   :  { %7199 = vmatpush1.bf16.msra.mxu1 %v9195_v39  ;;  %7036 = vmatprep.subr.bf16.mxu0 %v9202_v63  ;;  %v4150_v39 = vld [vmem:[%s13460_s3 + $0x948] sm:$0xff]  ;;  %v9258_v5 = vcombine.high %v4149_v62, %v4153_v13 }
 0x27c   :  { %7200 = vmatprep.subr.bf16.mxu1 %v9204_v0  ;;  %v4154_v63 = vld [vmem:[%s13460_s3 + $0x968] sm:$0xff]  ;;  %v9249_v0 = vcombine.low %v4141_v52, %v4145_v4  ;;  %v4197_v4 = vld [vmem:[%s13460_s3 + $0xac0] sm:$0xff] }
 0x27d   :  { %v9260_v6 = vcombine.high %v4150_v39, %v4154_v63 }
 0x27e   :  { %7037 = vmatpush1.bf16.msra.mxu0 %v9201_v7  ;;  %v4161_v7 = vld [vmem:[%s13460_s3 + $0x9a0] sm:$0xff] }
 0x27f   :  { %7201 = vmatpush1.bf16.msra.mxu1 %v9203_v14  ;;  %7038 = vmatprep.subr.bf16.mxu0 %v9210_v17  ;;  %v4162_v14 = vld [vmem:[%s13460_s3 + $0x9a8] sm:$0xff]  ;;  %v9257_v17 = vcombine.low %v4149_v62, %v4153_v13  ;;  %v9266_v18 = vcombine.high %v4157_v53, %v4161_v7  ;;  %v4205_v13 = vld [vmem:[%s13460_s3 + $0xb00] sm:$0xff] }
 0x280   :  { %7202 = vmatprep.subr.bf16.mxu1 %v9212_v57  ;;  %v9259_v57 = vcombine.low %v4150_v39, %v4154_v63  ;;  %v9268_v19 = vcombine.high %v4158_v10, %v4162_v14  ;;  %v4209_v39 = vld [vmem:[%s13460_s3 + $0xb20] sm:$0xff]  ;;  %v4206_v63 = vld [vmem:[%s13460_s3 + $0xb08] sm:$0xff] }
 0x282   :  { %7039 = vmatpush1.bf16.msra.mxu0 %v9209_v23  ;;  %v4166_v23 = vld [vmem:[%s13460_s3 + $0x9c8] sm:$0xff] }
 0x283   :  { %7203 = vmatpush1.bf16.msra.mxu1 %v9211_v24  ;;  %7049 = vmatprep.subr.bf16.mxu0 %v9218_v26  ;;  %v9265_v24 = vcombine.low %v4157_v53, %v4161_v7  ;;  %v9267_v26 = vcombine.low %v4158_v10, %v4162_v14  ;;  %v9276_v15 = vcombine.high %v4166_v23, %v4170_v12  ;;  %v4213_v7 = vld [vmem:[%s13460_s3 + $0xb40] sm:$0xff]  ;;  %v4214_v14 = vld [vmem:[%s13460_s3 + $0xb48] sm:$0xff] }
 0x284   :  { %7213 = vmatprep.subr.bf16.mxu1 %v9220_v27  ;;  %v9274_v27 = vcombine.high %v4165_v20, %v4169_v8  ;;  %v4217_v10 = vld [vmem:[%s13460_s3 + $0xb60] sm:$0xff] }
 0x285   :  { %7041 = vmatmul.mubr.bf16.vlgmr.msra.gmra.mrb[8].mxu0 %v11991_v22 }
 0x286   :  { %7205 = vmatmul.mubr.bf16.vlgmr.msra.gmra.mrb[8].mxu1 %v11991_v22  ;;  %7050 = vmatpush1.bf16.msra.mxu0 %v9217_v32  ;;  %v4178_v32 = vld [vmem:[%s13460_s3 + $0xa28] sm:$0xff] }
 0x287   :  { %7214 = vmatpush1.bf16.msra.mxu1 %v9219_v33  ;;  %7051 = vmatprep.subr.bf16.mxu0 %v9226_v35  ;;  %v9273_v33 = vcombine.low %v4165_v20, %v4169_v8  ;;  %v9275_v35 = vcombine.low %v4166_v23, %v4170_v12  ;;  %v9284_v38 = vcombine.high %v4174_v21, %v4178_v32  ;;  %v4221_v8 = vld [vmem:[%s13460_s3 + $0xb80] sm:$0xff]  ;;  %v4222_v12 = vld [vmem:[%s13460_s3 + $0xb88] sm:$0xff] }
 0x288   :  { %7215 = vmatprep.subr.bf16.mxu1 %v9228_v37  ;;  %v9282_v37 = vcombine.high %v4173_v28, %v4177_v30  ;;  %v4225_v23 = vld [vmem:[%s13460_s3 + $0xba0] sm:$0xff] }
 0x28a   :  { %7052 = vmatpush1.bf16.msra.mxu0 %v9225_v9  ;;  %v4186_v9 = vld [vmem:[%s13460_s3 + $0xa68] sm:$0xff] }
 0x28b   :  { %7216 = vmatpush1.bf16.msra.mxu1 %v9227_v31  ;;  %7053 = vmatprep.subr.bf16.mxu0 %v9234_v25  ;;  %v9281_v31 = vcombine.low %v4173_v28, %v4177_v30  ;;  %v9283_v25 = vcombine.low %v4174_v21, %v4178_v32  ;;  %v9292_v43 = vcombine.high %v4182_v41, %v4186_v9  ;;  %v4229_v30 = vld [vmem:[%s13460_s3 + $0xbc0] sm:$0xff]  ;;  %v4230_v32 = vld [vmem:[%s13460_s3 + $0xbc8] sm:$0xff] }
 0x28c   :  { %7217 = vmatprep.subr.bf16.mxu1 %v9236_v42  ;;  %v9290_v42 = vcombine.high %v4181_v36, %v4185_v40  ;;  %v4233_v21 = vld [vmem:[%s13460_s3 + $0xbe0] sm:$0xff] }
 0x28e   :  { %7054 = vmatpush1.bf16.msra.mxu0 %v9233_v47  ;;  %v4194_v47 = vld [vmem:[%s13460_s3 + $0xaa8] sm:$0xff] }
 0x28f   :  { %7218 = vmatpush1.bf16.msra.mxu1 %v9235_v49  ;;  %7055 = vmatprep.subr.bf16.mxu0 %v9242_v50  ;;  %v9289_v49 = vcombine.low %v4181_v36, %v4185_v40  ;;  %v9291_v50 = vcombine.low %v4182_v41, %v4186_v9  ;;  %v9300_v52 = vcombine.high %v4190_v46, %v4194_v47  ;;  %v4237_v40 = vld [vmem:[%s13460_s3 + $0xc00] sm:$0xff]  ;;  %v4238_v9 = vld [vmem:[%s13460_s3 + $0xc08] sm:$0xff] }
 0x290   :  { %7219 = vmatprep.subr.bf16.mxu1 %v9244_v51  ;;  %v9298_v51 = vcombine.high %v4189_v44, %v4193_v45  ;;  %v4241_v41 = vld [vmem:[%s13460_s3 + $0xc20] sm:$0xff] }
 0x292   :  { %7056 = vmatpush1.bf16.msra.mxu0 %v9241_v59  ;;  %v4202_v59 = vld [vmem:[%s13460_s3 + $0xae8] sm:$0xff] }
 0x293   :  { %7220 = vmatpush1.bf16.msra.mxu1 %v9243_v60  ;;  %7057 = vmatprep.subr.bf16.mxu0 %v9250_v55  ;;  %v9297_v60 = vcombine.low %v4189_v44, %v4193_v45  ;;  %v9299_v55 = vcombine.low %v4190_v46, %v4194_v47  ;;  %v9308_v62 = vcombine.high %v4198_v58, %v4202_v59  ;;  %v571_v45 = vsub.s32 4, %v11512_v1 }
 0x294   :  { %7221 = vmatprep.subr.bf16.mxu1 %v9252_v61  ;;  %v9306_v61 = vcombine.high %v4197_v4, %v4201_v56  ;;  %v575_v46 = vsub.s32 5, %v11512_v1  ;;  %v583_v47 = vsub.s32 7, %v11512_v1 }
 0x296   :  { %7058 = vmatpush1.bf16.msra.mxu0 %v9249_v0  ;;  %v4210_v0 = vld [vmem:[%s13460_s3 + $0xb28] sm:$0xff] }
 0x297   :  { %7222 = vmatpush1.bf16.msra.mxu1 %v9251_v2  ;;  %7059 = vmatprep.subr.bf16.mxu0 %v9258_v5  ;;  %v9305_v2 = vcombine.low %v4197_v4, %v4201_v56  ;;  %v9307_v5 = vcombine.low %v4198_v58, %v4202_v59  ;;  %v9316_v53 = vcombine.high %v4206_v63, %v4210_v0 }
 0x298   :  { %7223 = vmatprep.subr.bf16.mxu1 %v9260_v6  ;;  %v9314_v6 = vcombine.high %v4205_v13, %v4209_v39 }
 0x29a   :  { %7060 = vmatpush1.bf16.msra.mxu0 %v9257_v17  ;;  %v4218_v17 = vld [vmem:[%s13460_s3 + $0xb68] sm:$0xff] }
 0x29b   :  { %7224 = vmatpush1.bf16.msra.mxu1 %v9259_v57  ;;  %7061 = vmatprep.subr.bf16.mxu0 %v9266_v18  ;;  %v9313_v57 = vcombine.low %v4205_v13, %v4209_v39  ;;  %v9315_v18 = vcombine.low %v4206_v63, %v4210_v0  ;;  %v9324_v20 = vcombine.high %v4214_v14, %v4218_v17 }
 0x29c   :  { %7225 = vmatprep.subr.bf16.mxu1 %v9268_v19  ;;  %v9322_v19 = vcombine.high %v4213_v7, %v4217_v10 }
 0x29e   :  { %7062 = vmatpush1.bf16.msra.mxu0 %v9265_v24  ;;  %v4226_v24 = vld [vmem:[%s13460_s3 + $0xba8] sm:$0xff] }
 0x29f   :  { %7226 = vmatpush1.bf16.msra.mxu1 %v9267_v26  ;;  %7063 = vmatprep.subr.bf16.mxu0 %v9274_v27  ;;  %v9321_v26 = vcombine.low %v4213_v7, %v4217_v10  ;;  %v9323_v27 = vcombine.low %v4214_v14, %v4218_v17  ;;  %v9332_v28 = vcombine.high %v4222_v12, %v4226_v24  ;;  %v4246_v7 = vld [vmem:[%s13460_s3 + $0xc48] sm:$0xff] }
 0x2a0   :  { %7227 = vmatprep.subr.bf16.mxu1 %v9276_v15  ;;  %v9330_v15 = vcombine.high %v4221_v8, %v4225_v23  ;;  %v4250_v10 = vld [vmem:[%s13460_s3 + $0xc68] sm:$0xff]  ;;  %v9345_v17 = vcombine.low %v4237_v40, %v4241_v41 }
 0x2a2   :  { %7064 = vmatpush1.bf16.msra.mxu0 %v9273_v33  ;;  %v4234_v33 = vld [vmem:[%s13460_s3 + $0xbe8] sm:$0xff] }
 0x2a3   :  { %7228 = vmatpush1.bf16.msra.mxu1 %v9275_v35  ;;  %7065 = vmatprep.subr.bf16.mxu0 %v9282_v37  ;;  %v9329_v35 = vcombine.low %v4221_v8, %v4225_v23  ;;  %v9331_v37 = vcombine.low %v4222_v12, %v4226_v24  ;;  %v9340_v36 = vcombine.high %v4230_v32, %v4234_v33  ;;  %v4257_v23 = vld [vmem:[%s13460_s3 + $0xca0] sm:$0xff]  ;;  %v4254_v12 = vld [vmem:[%s13460_s3 + $0xc88] sm:$0xff] }
 0x2a4   :  { %7229 = vmatprep.subr.bf16.mxu1 %v9284_v38  ;;  %v9338_v38 = vcombine.high %v4229_v30, %v4233_v21  ;;  %v9356_v8 = vcombine.high %v4246_v7, %v4250_v10  ;;  %v4258_v24 = vld [vmem:[%s13460_s3 + $0xca8] sm:$0xff] }
 0x2a6   :  { %7066 = vmatpush1.bf16.msra.mxu0 %v9281_v31  ;;  %v4242_v31 = vld [vmem:[%s13460_s3 + $0xc28] sm:$0xff] }
 0x2a7   :  { %7230 = vmatpush1.bf16.msra.mxu1 %v9283_v25  ;;  %7067 = vmatprep.subr.bf16.mxu0 %v9290_v42  ;;  %v9337_v25 = vcombine.low %v4229_v30, %v4233_v21  ;;  %v9339_v42 = vcombine.low %v4230_v32, %v4234_v33  ;;  %v9348_v44 = vcombine.high %v4238_v9, %v4242_v31  ;;  %v4261_v21 = vld [vmem:[%s13460_s3 + $0xcc0] sm:$0xff]  ;;  %v4262_v33 = vld [vmem:[%s13460_s3 + $0xcc8] sm:$0xff] }
 0x2a8   :  { %7231 = vmatprep.subr.bf16.mxu1 %v9292_v43  ;;  %v9346_v43 = vcombine.high %v4237_v40, %v4241_v41  ;;  %v9364_v30 = vcombine.high %v4254_v12, %v4258_v24  ;;  %v4265_v32 = vld [vmem:[%s13460_s3 + $0xce0] sm:$0xff] }
 0x2a9   :  { %v4269_v41 = vld [vmem:[%s13460_s3 + $0xd00] sm:$0xff] }
 0x2aa   :  { %7068 = vmatpush1.bf16.msra.mxu0 %v9289_v49  ;;  %v12181_v49 = vld [vmem:[%s13459_s2] sm:$0xff] }
 0x2ab   :  { %7232 = vmatpush1.bf16.msra.mxu1 %v9291_v50  ;;  %7069 = vmatprep.subr.bf16.mxu0 %v9298_v51  ;;  %v572_v50 = vrot.slane %v12181_v49, %v571_v45  ;;  %v576_v51 = vrot.slane %v12181_v49, %v575_v46 }
 0x2ac   :  { %7233 = vmatprep.subr.bf16.mxu1 %v9300_v52  ;;  %v584_v52 = vrot.slane %v12181_v49, %v583_v47 }
 0x2ae   :  { %7070 = vmatpush1.bf16.msra.mxu0 %v9297_v60 }
 0x2af   :  { %7234 = vmatpush1.bf16.msra.mxu1 %v9299_v55  ;;  %7071 = vmatprep.subr.bf16.mxu0 %v9306_v61 }
 0x2b0   :  { %7235 = vmatprep.subr.bf16.mxu1 %v9308_v62 }
 0x2b2   :  { %7072 = vmatpush1.bf16.msra.mxu0 %v9305_v2 }
 0x2b3   :  { %7236 = vmatpush1.bf16.msra.mxu1 %v9307_v5  ;;  %7073 = vmatprep.subr.bf16.mxu0 %v9314_v6  ;;  %v4245_v5 = vld [vmem:[%s13460_s3 + $0xc40] sm:$0xff] }
 0x2b4   :  { %7237 = vmatprep.subr.bf16.mxu1 %v9316_v53  ;;  %v4249_v53 = vld [vmem:[%s13460_s3 + $0xc60] sm:$0xff] }
 0x2b6   :  { %7074 = vmatpush1.bf16.msra.mxu0 %v9313_v57  ;;  %v9347_v57 = vcombine.low %v4238_v9, %v4242_v31  ;;  %v4273_v9 = vld [vmem:[%s13460_s3 + $0xd20] sm:$0xff]  ;;  %v4270_v31 = vld [vmem:[%s13460_s3 + $0xd08] sm:$0xff] }
 0x2b7   :  { %7238 = vmatpush1.bf16.msra.mxu1 %v9315_v18  ;;  %7075 = vmatprep.subr.bf16.mxu0 %v9322_v19  ;;  %v4253_v19 = vld [vmem:[%s13460_s3 + $0xc80] sm:$0xff] }
 0x2b8   :  { %7239 = vmatprep.subr.bf16.mxu1 %v9324_v20  ;;  %v9354_v20 = vcombine.high %v4245_v5, %v4249_v53 }
 0x2ba   :  { %7076 = vmatpush1.bf16.msra.mxu0 %v9321_v26 }
 0x2bb   :  { %7240 = vmatpush1.bf16.msra.mxu1 %v9323_v27  ;;  %7077 = vmatprep.subr.bf16.mxu0 %v9330_v15  ;;  %v9353_v27 = vcombine.low %v4245_v5, %v4249_v53  ;;  %v9355_v15 = vcombine.low %v4246_v7, %v4250_v10  ;;  %v4293_v53 = vld [vmem:[%s13460_s3 + $0xdc0] sm:$0xff]  ;;  %v4294_v10 = vld [vmem:[%s13460_s3 + $0xdc8] sm:$0xff] }
 0x2bc   :  { %7241 = vmatprep.subr.bf16.mxu1 %v9332_v28  ;;  %v9362_v28 = vcombine.high %v4253_v19, %v4257_v23  ;;  %v4297_v7 = vld [vmem:[%s13460_s3 + $0xde0] sm:$0xff] }
 0x2be   :  { %7078 = vmatpush1.bf16.msra.mxu0 %v9329_v35  ;;  %v4266_v35 = vld [vmem:[%s13460_s3 + $0xce8] sm:$0xff] }
 0x2bf   :  { %7242 = vmatpush1.bf16.msra.mxu1 %v9331_v37  ;;  %7079 = vmatprep.subr.bf16.mxu0 %v9338_v38  ;;  %v9361_v37 = vcombine.low %v4253_v19, %v4257_v23  ;;  %v9363_v38 = vcombine.low %v4254_v12, %v4258_v24  ;;  %v9372_v40 = vcombine.high %v4262_v33, %v4266_v35  ;;  %v4301_v23 = vld [vmem:[%s13460_s3 + $0xe00] sm:$0xff]  ;;  %v4302_v24 = vld [vmem:[%s13460_s3 + $0xe08] sm:$0xff] }
 0x2c0   :  { %7243 = vmatprep.subr.bf16.mxu1 %v9340_v36  ;;  %v9370_v36 = vcombine.high %v4261_v21, %v4265_v32  ;;  %v4305_v12 = vld [vmem:[%s13460_s3 + $0xe20] sm:$0xff] }
 0x2c2   :  { %7080 = vmatpush1.bf16.msra.mxu0 %v9337_v25  ;;  %v4274_v25 = vld [vmem:[%s13460_s3 + $0xd28] sm:$0xff] }
 0x2c3   :  { %7244 = vmatpush1.bf16.msra.mxu1 %v9339_v42  ;;  %7090 = vmatprep.subr.bf16.mxu0 %v9346_v43  ;;  %v9369_v42 = vcombine.low %v4261_v21, %v4265_v32  ;;  %v9371_v43 = vcombine.low %v4262_v33, %v4266_v35  ;;  %v4309_v32 = vld [vmem:[%s13460_s3 + $0xe40] sm:$0xff]  ;;  %v4310_v35 = vld [vmem:[%s13460_s3 + $0xe48] sm:$0xff] }
 0x2c4   :  { %7254 = vmatprep.subr.bf16.mxu1 %v9348_v44  ;;  %v9378_v44 = vcombine.high %v4269_v41, %v4273_v9  ;;  %v4313_v33 = vld [vmem:[%s13460_s3 + $0xe60] sm:$0xff] }
 0x2d8   :  { %v3666_v4 = vpop.f32.mrb[4].mxu0  ;;  %v12192_v58 = vpop.f32.mrb[4].mxu1 }
 0x2d9   :  { %v9668_v56 = vadd.f32 %v3666_v4, %v572_v50  ;;  %v3668_v59 = vpop.f32.mrb[5].mxu0  ;;  %v3832_v55 = vpop.f32.mrb[5].mxu1  ;;  %v9380_v50 = vcombine.high %v4270_v31, %v4274_v25  ;;  %v4278_v4 = vld [vmem:[%s13460_s3 + $0xd48] sm:$0xff] }
 0x2da   :  { %v9669_v60 = vadd.f32 %v3668_v59, %v576_v51  ;;  %v3670_v61 = vpop.f32.mrb[6].mxu0  ;;  %v9671_v13 = vadd.f32 %v3832_v55, %v584_v52  ;;  %v3834_v39 = vpop.f32.mrb[6].mxu1  ;;  %v4277_v51 = vld [vmem:[%s13460_s3 + $0xd40] sm:$0xff]  ;;  %v9377_v59 = vcombine.low %v4269_v41, %v4273_v9 }
 0x2db   :  { %v3841_v62 = vmax.f32 %v9668_v56, 0.0  ;;  %v3671_v63 = vpop.f32.mrb[7].mxu0  ;;  %v3835_v2 = vpop.f32.mrb[7].mxu1  ;;  %v4281_v52 = vld [vmem:[%s13460_s3 + $0xd60] sm:$0xff]  ;;  %v4282_v56 = vld [vmem:[%s13460_s3 + $0xd68] sm:$0xff] }
 0x2dc   :  { %v3842_v0 = vmax.f32 %v9669_v60, 0.0  ;;  %v3844_v6 = vmax.f32 %v9671_v13, 0.0  ;;  %v9379_v60 = vcombine.low %v4270_v31, %v4274_v25  ;;  %v9386_v55 = vcombine.high %v4277_v51, %v4281_v52  ;;  %v4289_v13 = vld [vmem:[%s13460_s3 + $0xda0] sm:$0xff]  ;;  %v4286_v39 = vld [vmem:[%s13460_s3 + $0xd88] sm:$0xff] }
 0x2dd   :  { %v12208_v18 = vpack.c.bf16 %v3841_v62, %v3841_v62  ;;  %v9388_v61 = vcombine.high %v4278_v4, %v4282_v56  ;;  %v4285_v62 = vld [vmem:[%s13460_s3 + $0xd80] sm:$0xff]  ;;  %v4290_v63 = vld [vmem:[%s13460_s3 + $0xda8] sm:$0xff]  ;;  %v9387_v2 = vcombine.low %v4278_v4, %v4282_v56 }
 0x2de   :  { %v12206_v14 = vpack.c.bf16 %v3842_v0, %v3842_v0  ;;  %v12224_v26 = vpack.c.bf16 %v3844_v6, %v3844_v6  ;;  %v9385_v0 = vcombine.low %v4277_v51, %v4281_v52  ;;  %v9394_v5 = vcombine.high %v4285_v62, %v4289_v13  ;;  %v4317_v9 = vld [vmem:[%s13460_s3 + $0xe80] sm:$0xff]  ;;  %v4318_v25 = vld [vmem:[%s13460_s3 + $0xe88] sm:$0xff] }
 0x2df   :  { %v9396_v6 = vcombine.high %v4286_v39, %v4290_v63  ;;  %v9395_v19 = vcombine.low %v4286_v39, %v4290_v63  ;;  %v4321_v31 = vld [vmem:[%s13460_s3 + $0xea0] sm:$0xff]  ;;  %v4326_v56 = vld [vmem:[%s13460_s3 + $0xec8] sm:$0xff] }
 0x2e0   :  { %7081 = vmatprep.mubr.bf16.mxu0 %v12206_v14  ;;  %7245 = vmatprep.mubr.bf16.mxu1 %v12206_v14  ;;  %v4325_v52 = vld [vmem:[%s13460_s3 + $0xec0] sm:$0xff]  ;;  %v4334_v63 = vld [vmem:[%s13460_s3 + $0xf08] sm:$0xff] }
 0x2e1   :  { %7082 = vmatmul.mubr.bf16.vlgmr.msra.gmra.mrb[8].mxu0 %v12208_v18  ;;  %7246 = vmatmul.mubr.bf16.vlgmr.msra.gmra.mrb[8].mxu1 %v12208_v18  ;;  %v4329_v4 = vld [vmem:[%s13460_s3 + $0xee0] sm:$0xff] }
 0x2e2   :  { %7091 = vmatpush1.bf16.msra.mxu0 %v9345_v17  ;;  %7255 = vmatpush1.bf16.msra.mxu1 %v9347_v57  ;;  %v4298_v17 = vld [vmem:[%s13460_s3 + $0xde8] sm:$0xff]  ;;  %v9393_v57 = vcombine.low %v4285_v62, %v4289_v13  ;;  %v4333_v13 = vld [vmem:[%s13460_s3 + $0xf00] sm:$0xff] }
 0x2e3   :  { %7122 = vmatprep.mubr.bf16.mxu0 %v12224_v26  ;;  %7286 = vmatprep.mubr.bf16.mxu1 %v12224_v26  ;;  %v4337_v39 = vld [vmem:[%s13460_s3 + $0xf20] sm:$0xff] }
 0x2e4   :  { %7092 = vmatprep.subr.bf16.mxu0 %v9354_v20  ;;  %7256 = vmatprep.subr.bf16.mxu1 %v9356_v8  ;;  %v9402_v20 = vcombine.high %v4293_v53, %v4297_v7  ;;  %v9404_v8 = vcombine.high %v4294_v10, %v4298_v17 }
 0x2e6   :  { %7093 = vmatpush1.bf16.msra.mxu0 %v9353_v27  ;;  %7257 = vmatpush1.bf16.msra.mxu1 %v9355_v15  ;;  %v4306_v27 = vld [vmem:[%s13460_s3 + $0xe28] sm:$0xff]  ;;  %v9401_v15 = vcombine.low %v4293_v53, %v4297_v7  ;;  %v4341_v7 = vld [vmem:[%s13460_s3 + $0xf40] sm:$0xff] }
 0x2e7   :  { %7094 = vmatprep.subr.bf16.mxu0 %v9362_v28  ;;  %7258 = vmatprep.subr.bf16.mxu1 %v9364_v30  ;;  %v9403_v28 = vcombine.low %v4294_v10, %v4298_v17  ;;  %v9410_v30 = vcombine.high %v4301_v23, %v4305_v12  ;;  %v9412_v21 = vcombine.high %v4302_v24, %v4306_v27  ;;  %v4345_v10 = vld [vmem:[%s13460_s3 + $0xf60] sm:$0xff]  ;;  %v4342_v17 = vld [vmem:[%s13460_s3 + $0xf48] sm:$0xff] }
 0x2ea   :  { %7095 = vmatpush1.bf16.msra.mxu0 %v9361_v37  ;;  %7259 = vmatpush1.bf16.msra.mxu1 %v9363_v38  ;;  %v4314_v37 = vld [vmem:[%s13460_s3 + $0xe68] sm:$0xff]  ;;  %v9409_v38 = vcombine.low %v4301_v23, %v4305_v12  ;;  %v9450_v23 = vcombine.high %v4341_v7, %v4345_v10 }
 0x2eb   :  { %7096 = vmatprep.subr.bf16.mxu0 %v9370_v36  ;;  %7260 = vmatprep.subr.bf16.mxu1 %v9372_v40  ;;  %v9411_v36 = vcombine.low %v4302_v24, %v4306_v27  ;;  %v9418_v40 = vcombine.high %v4309_v32, %v4313_v33  ;;  %v9420_v41 = vcombine.high %v4310_v35, %v4314_v37  ;;  %v4349_v24 = vld [vmem:[%s13460_s3 + $0xf80] sm:$0xff] }
 0x2ec   :  { %v4353_v27 = vld [vmem:[%s13460_s3 + $0xfa0] sm:$0xff] }
 0x2ee   :  { %7097 = vmatpush1.bf16.msra.mxu0 %v9369_v42  ;;  %7261 = vmatpush1.bf16.msra.mxu1 %v9371_v43  ;;  %v4322_v42 = vld [vmem:[%s13460_s3 + $0xea8] sm:$0xff]  ;;  %v9417_v43 = vcombine.low %v4309_v32, %v4313_v33  ;;  %v9458_v33 = vcombine.high %v4349_v24, %v4353_v27 }
 0x2ef   :  { %7098 = vmatprep.subr.bf16.mxu0 %v9378_v44  ;;  %7262 = vmatprep.subr.bf16.mxu1 %v9380_v50  ;;  %v9419_v44 = vcombine.low %v4310_v35, %v4314_v37  ;;  %v9426_v50 = vcombine.high %v4317_v9, %v4321_v31  ;;  %v9428_v51 = vcombine.high %v4318_v25, %v4322_v42  ;;  %v4357_v37 = vld [vmem:[%s13460_s3 + $0xfc0] sm:$0xff] }
 0x2f2   :  { %7099 = vmatpush1.bf16.msra.mxu0 %v9377_v59  ;;  %7263 = vmatpush1.bf16.msra.mxu1 %v9379_v60  ;;  %v4330_v59 = vld [vmem:[%s13460_s3 + $0xee8] sm:$0xff]  ;;  %v9425_v60 = vcombine.low %v4317_v9, %v4321_v31 }
 0x2f3   :  { %7100 = vmatprep.subr.bf16.mxu0 %v9386_v55  ;;  %7264 = vmatprep.subr.bf16.mxu1 %v9388_v61  ;;  %v9427_v55 = vcombine.low %v4318_v25, %v4322_v42  ;;  %v9434_v61 = vcombine.high %v4325_v52, %v4329_v4  ;;  %v9436_v62 = vcombine.high %v4326_v56, %v4330_v59  ;;  %v3855_v42 = vld [vmem:[%s13460_s3 + $0x10] sm:$0xff] }
 0x2f6   :  { %7101 = vmatpush1.bf16.msra.mxu0 %v9385_v0  ;;  %7265 = vmatpush1.bf16.msra.mxu1 %v9387_v2  ;;  %v4338_v0 = vld [vmem:[%s13460_s3 + $0xf28] sm:$0xff]  ;;  %v9433_v2 = vcombine.low %v4325_v52, %v4329_v4 }
 0x2f7   :  { %7102 = vmatprep.subr.bf16.mxu0 %v9394_v5  ;;  %7266 = vmatprep.subr.bf16.mxu1 %v9396_v6  ;;  %v9435_v5 = vcombine.low %v4326_v56, %v4330_v59  ;;  %v9442_v6 = vcombine.high %v4333_v13, %v4337_v39  ;;  %v9444_v53 = vcombine.high %v4334_v63, %v4338_v0  ;;  %v3863_v59 = vld [vmem:[%s13460_s3 + $0x50] sm:$0xff] }
 0x2fa   :  { %7103 = vmatpush1.bf16.msra.mxu0 %v9393_v57  ;;  %7267 = vmatpush1.bf16.msra.mxu1 %v9395_v19  ;;  %v4346_v57 = vld [vmem:[%s13460_s3 + $0xf68] sm:$0xff]  ;;  %v9441_v19 = vcombine.low %v4333_v13, %v4337_v39 }
 0x2fb   :  { %7104 = vmatprep.subr.bf16.mxu0 %v9402_v20  ;;  %7268 = vmatprep.subr.bf16.mxu1 %v9404_v8  ;;  %v9443_v20 = vcombine.low %v4334_v63, %v4338_v0  ;;  %v579_v8 = vsub.s32 6, %v11512_v1  ;;  %v9452_v12 = vcombine.high %v4342_v17, %v4346_v57  ;;  %v9850_v1 = vld [vmem:[%s13463_s7] sm:$0xff]  }
 0x2fd   :  { %v580_v32 = vrot.slane %v12181_v49, %v579_v8  ;;  %v4362_v49 = vld [vmem:[%s13460_s3 + $0xfe8] sm:$0xff] }
 0x2fe   :  { %7105 = vmatpush1.bf16.msra.mxu0 %v9401_v15  ;;  %7269 = vmatpush1.bf16.msra.mxu1 %v9403_v28  ;;  %v4350_v15 = vld [vmem:[%s13460_s3 + $0xf88] sm:$0xff] }
 0x2ff   :  { %7106 = vmatprep.subr.bf16.mxu0 %v9410_v30  ;;  %7270 = vmatprep.subr.bf16.mxu1 %v9412_v21  ;;  %v4354_v28 = vld [vmem:[%s13460_s3 + $0xfa8] sm:$0xff]  ;;  %v9449_v30 = vcombine.low %v4341_v7, %v4345_v10  ;;  %v9451_v21 = vcombine.low %v4342_v17, %v4346_v57  ;;  %v9670_v9 = vadd.f32 %v12192_v58, %v580_v32  ;;  %v3860_v58 = vld [vmem:[%s13460_s3 + $0x38] sm:$0xff] }
 0x300   :  { %v9460_v35 = vcombine.high %v4350_v15, %v4354_v28  ;;  %v3892_v32 = vld [vmem:[%s13460_s3 + $0x138] sm:$0xff] }
 0x301   :  { %v3843_v52 = vmax.f32 %v9670_v9, 0.0 }
 0x302   :  { %7107 = vmatpush1.bf16.msra.mxu0 %v9409_v38  ;;  %7271 = vmatpush1.bf16.msra.mxu1 %v9411_v36  ;;  %v4361_v38 = vld [vmem:[%s13460_s3 + $0xfe0] sm:$0xff]  ;;  %v4358_v36 = vld [vmem:[%s13460_s3 + $0xfc8] sm:$0xff] }
 0x303   :  { %7108 = vmatprep.subr.bf16.mxu0 %v9418_v40  ;;  %7272 = vmatprep.subr.bf16.mxu1 %v9420_v41  ;;  %v9457_v40 = vcombine.low %v4349_v24, %v4353_v27  ;;  %v9459_v41 = vcombine.low %v4350_v15, %v4354_v28  ;;  %v9466_v31 = vcombine.high %v4357_v37, %v4361_v38  ;;  %v3887_v28 = vld [vmem:[%s13460_s3 + $0x110] sm:$0xff] }
 0x304   :  { %v9468_v25 = vcombine.high %v4358_v36, %v4362_v49  ;;  %v12415_v13 = vpack.c.bf16 %v3843_v52, %v3843_v52 }
 0x306   :  { %7109 = vmatpush1.bf16.msra.mxu0 %v9417_v43  ;;  %7273 = vmatpush1.bf16.msra.mxu1 %v9419_v44  ;;  %v3859_v43 = vld [vmem:[%s13460_s3 + $0x30] sm:$0xff]  ;;  %v3856_v44 = vld [vmem:[%s13460_s3 + $0x18] sm:$0xff] }
 0x307   :  { %7110 = vmatprep.subr.bf16.mxu0 %v9426_v50  ;;  %7274 = vmatprep.subr.bf16.mxu1 %v9428_v51  ;;  %v9465_v50 = vcombine.low %v4357_v37, %v4361_v38  ;;  %v9467_v51 = vcombine.low %v4358_v36, %v4362_v49  ;;  %v8966_v4 = vcombine.high %v3855_v42, %v3859_v43  ;;  %v3895_v36 = vld [vmem:[%s13460_s3 + $0x150] sm:$0xff] }
 0x308   :  { %v8968_v56 = vcombine.high %v3856_v44, %v3860_v58  ;;  %v8967_v39 = vcombine.low %v3856_v44, %v3860_v58  ;;  %v3899_v49 = vld [vmem:[%s13460_s3 + $0x170] sm:$0xff]  ;;  %v3904_v58 = vld [vmem:[%s13460_s3 + $0x198] sm:$0xff] }
 0x309   :  { %v3907_v44 = vld [vmem:[%s13460_s3 + $0x1b0] sm:$0xff] }
 0x30a   :  { %7111 = vmatpush1.bf16.msra.mxu0 %v9425_v60  ;;  %7275 = vmatpush1.bf16.msra.mxu1 %v9427_v55  ;;  %v3867_v60 = vld [vmem:[%s13460_s3 + $0x70] sm:$0xff]  ;;  %v3864_v55 = vld [vmem:[%s13460_s3 + $0x58] sm:$0xff] }
 0x30b   :  { %7112 = vmatprep.subr.bf16.mxu0 %v9434_v61  ;;  %7276 = vmatprep.subr.bf16.mxu1 %v9436_v62  ;;  %v3868_v61 = vld [vmem:[%s13460_s3 + $0x78] sm:$0xff]  ;;  %v8965_v62 = vcombine.low %v3855_v42, %v3859_v43  ;;  %v8974_v63 = vcombine.high %v3863_v59, %v3867_v60  ;;  %v8973_v7 = vcombine.low %v3863_v59, %v3867_v60  ;;  %v3903_v43 = vld [vmem:[%s13460_s3 + $0x190] sm:$0xff] }
 0x30c   :  { %v8976_v0 = vcombine.high %v3864_v55, %v3868_v61  ;;  %v8975_v10 = vcombine.low %v3864_v55, %v3868_v61  ;;  %v3911_v59 = vld [vmem:[%s13460_s3 + $0x1d0] sm:$0xff]  ;;  %v3912_v55 = vld [vmem:[%s13460_s3 + $0x1d8] sm:$0xff] }
 0x30d   :  { %v3915_v60 = vld [vmem:[%s13460_s3 + $0x1f0] sm:$0xff]  ;;  %v3916_v61 = vld [vmem:[%s13460_s3 + $0x1f8] sm:$0xff] }
 0x30e   :  { %7113 = vmatpush1.bf16.msra.mxu0 %v9433_v2  ;;  %7277 = vmatpush1.bf16.msra.mxu1 %v9435_v5  ;;  %v3871_v2 = vld [vmem:[%s13460_s3 + $0x90] sm:$0xff] }
 0x30f   :  { %7114 = vmatprep.subr.bf16.mxu0 %v9442_v6  ;;  %7278 = vmatprep.subr.bf16.mxu1 %v9444_v53  ;;  %v3875_v5 = vld [vmem:[%s13460_s3 + $0xb0] sm:$0xff]  ;;  %v3872_v6 = vld [vmem:[%s13460_s3 + $0x98] sm:$0xff] }
 0x310   :  { %v3876_v53 = vld [vmem:[%s13460_s3 + $0xb8] sm:$0xff]  ;;  %v8982_v17 = vcombine.high %v3871_v2, %v3875_v5 }
 0x311   :  { %v8984_v57 = vcombine.high %v3872_v6, %v3876_v53  ;;  %v8983_v24 = vcombine.low %v3872_v6, %v3876_v53  ;;  %v3920_v6 = vld [vmem:[%s13460_s3 + $0x218] sm:$0xff] }
 0x312   :  { %7115 = vmatpush1.bf16.msra.mxu0 %v9441_v19  ;;  %7279 = vmatpush1.bf16.msra.mxu1 %v9443_v20  ;;  %v3879_v19 = vld [vmem:[%s13460_s3 + $0xd0] sm:$0xff]  ;;  %v3924_v53 = vld [vmem:[%s13460_s3 + $0x238] sm:$0xff] }
 0x313   :  { %7116 = vmatprep.subr.bf16.mxu0 %v9450_v23  ;;  %7280 = vmatprep.subr.bf16.mxu1 %v9452_v12  ;;  %v3883_v20 = vld [vmem:[%s13460_s3 + $0xf0] sm:$0xff]  ;;  %v3880_v23 = vld [vmem:[%s13460_s3 + $0xd8] sm:$0xff]  ;;  %v8981_v12 = vcombine.low %v3871_v2, %v3875_v5 }
 0x314   :  { %v8990_v27 = vcombine.high %v3879_v19, %v3883_v20  ;;  %v3919_v2 = vld [vmem:[%s13460_s3 + $0x210] sm:$0xff] }
 0x315   :  { %v3923_v5 = vld [vmem:[%s13460_s3 + $0x230] sm:$0xff] }
 0x316   :  { %7117 = vmatpush1.bf16.msra.mxu0 %v9449_v30  ;;  %7281 = vmatpush1.bf16.msra.mxu1 %v9451_v21  ;;  %v3891_v30 = vld [vmem:[%s13460_s3 + $0x130] sm:$0xff]  ;;  %v3888_v21 = vld [vmem:[%s13460_s3 + $0x118] sm:$0xff] }
 0x317   :  { %7118 = vmatprep.subr.bf16.mxu0 %v9458_v33  ;;  %7282 = vmatprep.subr.bf16.mxu1 %v9460_v35  ;;  %v8989_v33 = vcombine.low %v3879_v19, %v3883_v20  ;;  %v8998_v37 = vcombine.high %v3887_v28, %v3891_v30  ;;  %v9000_v38 = vcombine.high %v3888_v21, %v3892_v32  ;;  %v3927_v19 = vld [vmem:[%s13460_s3 + $0x250] sm:$0xff] }
 0x318   :  { %v8997_v9 = vcombine.low %v3887_v28, %v3891_v30  ;;  %v3931_v20 = vld [vmem:[%s13460_s3 + $0x270] sm:$0xff] }
 0x319   :  { %v3935_v28 = vld [vmem:[%s13460_s3 + $0x290] sm:$0xff] }
 0x31a   :  { %7119 = vmatpush1.bf16.msra.mxu0 %v9457_v40  ;;  %7283 = vmatpush1.bf16.msra.mxu1 %v9459_v41  ;;  %v3896_v40 = vld [vmem:[%s13460_s3 + $0x158] sm:$0xff]  ;;  %v3939_v30 = vld [vmem:[%s13460_s3 + $0x2b0] sm:$0xff] }
 0x31b   :  { %7120 = vmatprep.subr.bf16.mxu0 %v9466_v31  ;;  %7284 = vmatprep.subr.bf16.mxu1 %v9468_v25  ;;  %v3900_v41 = vld [vmem:[%s13460_s3 + $0x178] sm:$0xff]  ;;  %v8999_v31 = vcombine.low %v3888_v21, %v3892_v32  ;;  %v9006_v25 = vcombine.high %v3895_v36, %v3899_v49 }
 0x31c   :  { %v9008_v42 = vcombine.high %v3896_v40, %v3900_v41  ;;  %v9007_v52 = vcombine.low %v3896_v40, %v3900_v41  ;;  %v3936_v21 = vld [vmem:[%s13460_s3 + $0x298] sm:$0xff] }
 0x31d   :  { %v3940_v32 = vld [vmem:[%s13460_s3 + $0x2b8] sm:$0xff] }
 0x31e   :  { %7121 = vmatpush1.bf16.msra.mxu0 %v9465_v50  ;;  %7285 = vmatpush1.bf16.msra.mxu1 %v9467_v51  ;;  %v3908_v50 = vld [vmem:[%s13460_s3 + $0x1b8] sm:$0xff]  ;;  %v9005_v51 = vcombine.low %v3895_v36, %v3899_v49  ;;  %v3943_v36 = vld [vmem:[%s13460_s3 + $0x2d0] sm:$0xff] }
 0x31f   :  { %7295 = vmatprep.subr.bf16.mxu0 %v8966_v4  ;;  %7459 = vmatprep.subr.bf16.mxu1 %v8968_v56  ;;  %v9014_v4 = vcombine.high %v3903_v43, %v3907_v44  ;;  %v9016_v56 = vcombine.high %v3904_v58, %v3908_v50  ;;  %v3947_v49 = vld [vmem:[%s13460_s3 + $0x2f0] sm:$0xff]  ;;  %v3944_v40 = vld [vmem:[%s13460_s3 + $0x2d8] sm:$0xff] }
 0x320   :  { %v3948_v41 = vld [vmem:[%s13460_s3 + $0x2f8] sm:$0xff] }
 0x321   :  { %7123 = vmatmul.mubr.bf16.vlgmr.msra.gmra.mrb[8].mxu0 %v12415_v13  ;;  %7287 = vmatmul.mubr.bf16.vlgmr.msra.gmra.mrb[8].mxu1 %v12415_v13 }
 0x322   :  { %7296 = vmatpush1.bf16.msra.mxu0 %v8965_v62  ;;  %7327 = vmatprep.mubr.bf16.mxu0 %v11584_v48  ;;  %v9013_v62 = vcombine.low %v3903_v43, %v3907_v44  ;;  %v3951_v43 = vld [vmem:[%s13460_s3 + $0x310] sm:$0xff] }
 0x323   :  { %7460 = vmatpush1.bf16.msra.mxu1 %v8967_v39  ;;  %7491 = vmatprep.mubr.bf16.mxu1 %v11584_v48  ;;  %v3884_v48 = vld [vmem:[%s13460_s3 + $0xf8] sm:$0xff]  ;;  %v9015_v39 = vcombine.low %v3904_v58, %v3908_v50  ;;  %v3955_v44 = vld [vmem:[%s13460_s3 + $0x330] sm:$0xff] }
 0x324   :  { %7297 = vmatprep.subr.bf16.mxu0 %v8974_v63  ;;  %7461 = vmatprep.subr.bf16.mxu1 %v8976_v0  ;;  %v8992_v15 = vcombine.high %v3880_v23, %v3884_v48  ;;  %v8991_v35 = vcombine.low %v3880_v23, %v3884_v48  ;;  %v9022_v63 = vcombine.high %v3911_v59, %v3915_v60  ;;  %v3928_v23 = vld [vmem:[%s13460_s3 + $0x258] sm:$0xff] }
 0x325   :  { %v9024_v0 = vcombine.high %v3912_v55, %v3916_v61  ;;  %v3932_v48 = vld [vmem:[%s13460_s3 + $0x278] sm:$0xff] }
 0x326   :  { %7298 = vmatpush1.bf16.msra.mxu0 %v8973_v7  ;;  %v9021_v7 = vcombine.low %v3911_v59, %v3915_v60  ;;  %v3952_v58 = vld [vmem:[%s13460_s3 + $0x318] sm:$0xff]  ;;  %v3959_v59 = vld [vmem:[%s13460_s3 + $0x350] sm:$0xff] }
 0x327   :  { %7462 = vmatpush1.bf16.msra.mxu1 %v8975_v10  ;;  %7299 = vmatprep.subr.bf16.mxu0 %v8982_v17  ;;  %v9023_v10 = vcombine.low %v3912_v55, %v3916_v61  ;;  %v9030_v17 = vcombine.high %v3919_v2, %v3923_v5  ;;  %v3956_v50 = vld [vmem:[%s13460_s3 + $0x338] sm:$0xff]  ;;  %v3963_v60 = vld [vmem:[%s13460_s3 + $0x370] sm:$0xff] }
 0x328   :  { %7463 = vmatprep.subr.bf16.mxu1 %v8984_v57  ;;  %v9032_v57 = vcombine.high %v3920_v6, %v3924_v53  ;;  %v3960_v55 = vld [vmem:[%s13460_s3 + $0x358] sm:$0xff] }
 0x329   :  { %v3964_v61 = vld [vmem:[%s13460_s3 + $0x378] sm:$0xff] }
 0x32a   :  { %7300 = vmatpush1.bf16.msra.mxu0 %v8981_v12  ;;  %v9029_v12 = vcombine.low %v3919_v2, %v3923_v5  ;;  %v3967_v2 = vld [vmem:[%s13460_s3 + $0x390] sm:$0xff] }
 0x32b   :  { %7464 = vmatpush1.bf16.msra.mxu1 %v8983_v24  ;;  %7301 = vmatprep.subr.bf16.mxu0 %v8990_v27  ;;  %v9031_v24 = vcombine.low %v3920_v6, %v3924_v53  ;;  %v9038_v27 = vcombine.high %v3927_v19, %v3931_v20  ;;  %v3971_v5 = vld [vmem:[%s13460_s3 + $0x3b0] sm:$0xff]  ;;  %v3968_v6 = vld [vmem:[%s13460_s3 + $0x398] sm:$0xff] }
 0x32c   :  { %7465 = vmatprep.subr.bf16.mxu1 %v8992_v15  ;;  %v9040_v15 = vcombine.high %v3928_v23, %v3932_v48  ;;  %v3972_v53 = vld [vmem:[%s13460_s3 + $0x3b8] sm:$0xff] }
 0x32e   :  { %7302 = vmatpush1.bf16.msra.mxu0 %v8989_v33  ;;  %v9037_v33 = vcombine.low %v3927_v19, %v3931_v20  ;;  %v3975_v19 = vld [vmem:[%s13460_s3 + $0x3d0] sm:$0xff] }
 0x32f   :  { %7466 = vmatpush1.bf16.msra.mxu1 %v8991_v35  ;;  %7303 = vmatprep.subr.bf16.mxu0 %v8998_v37  ;;  %v9039_v35 = vcombine.low %v3928_v23, %v3932_v48  ;;  %v9046_v37 = vcombine.high %v3935_v28, %v3939_v30  ;;  %v3979_v20 = vld [vmem:[%s13460_s3 + $0x3f0] sm:$0xff]  ;;  %v3976_v23 = vld [vmem:[%s13460_s3 + $0x3d8] sm:$0xff] }
 0x330   :  { %7467 = vmatprep.subr.bf16.mxu1 %v9000_v38  ;;  %v9048_v38 = vcombine.high %v3936_v21, %v3940_v32  ;;  %v3980_v48 = vld [vmem:[%s13460_s3 + $0x3f8] sm:$0xff] }
 0x332   :  { %7304 = vmatpush1.bf16.msra.mxu0 %v8997_v9  ;;  %v9045_v9 = vcombine.low %v3935_v28, %v3939_v30  ;;  %v3983_v28 = vld [vmem:[%s13460_s3 + $0x410] sm:$0xff] }
 0x333   :  { %7468 = vmatpush1.bf16.msra.mxu1 %v8999_v31  ;;  %7305 = vmatprep.subr.bf16.mxu0 %v9006_v25  ;;  %v9047_v31 = vcombine.low %v3936_v21, %v3940_v32  ;;  %v9054_v25 = vcombine.high %v3943_v36, %v3947_v49  ;;  %v3987_v30 = vld [vmem:[%s13460_s3 + $0x430] sm:$0xff]  ;;  %v3984_v21 = vld [vmem:[%s13460_s3 + $0x418] sm:$0xff] }
 0x334   :  { %7469 = vmatprep.subr.bf16.mxu1 %v9008_v42  ;;  %v9056_v42 = vcombine.high %v3944_v40, %v3948_v41  ;;  %v3988_v32 = vld [vmem:[%s13460_s3 + $0x438] sm:$0xff] }
 0x336   :  { %7306 = vmatpush1.bf16.msra.mxu0 %v9005_v51  ;;  %v9053_v51 = vcombine.low %v3943_v36, %v3947_v49  ;;  %v3991_v36 = vld [vmem:[%s13460_s3 + $0x450] sm:$0xff] }
 0x337   :  { %7470 = vmatpush1.bf16.msra.mxu1 %v9007_v52  ;;  %7307 = vmatprep.subr.bf16.mxu0 %v9014_v4  ;;  %v9055_v52 = vcombine.low %v3944_v40, %v3948_v41  ;;  %v9062_v4 = vcombine.high %v3951_v43, %v3955_v44  ;;  %v3995_v49 = vld [vmem:[%s13460_s3 + $0x470] sm:$0xff]  ;;  %v9093_v40 = vcombine.low %v3983_v28, %v3987_v30  ;;  %v3992_v41 = vld [vmem:[%s13460_s3 + $0x458] sm:$0xff] }
 0x338   :  { %7471 = vmatprep.subr.bf16.mxu1 %v9016_v56  ;;  %v9064_v56 = vcombine.high %v3952_v58, %v3956_v50 }
 0x33a   :  { %7308 = vmatpush1.bf16.msra.mxu0 %v9013_v62  ;;  %v9061_v62 = vcombine.low %v3951_v43, %v3955_v44  ;;  %v4003_v43 = vld [vmem:[%s13460_s3 + $0x4b0] sm:$0xff] }
 0x33b   :  { %7472 = vmatpush1.bf16.msra.mxu1 %v9015_v39  ;;  %7309 = vmatprep.subr.bf16.mxu0 %v9022_v63  ;;  %v9063_v39 = vcombine.low %v3952_v58, %v3956_v50  ;;  %v9070_v63 = vcombine.high %v3959_v59, %v3963_v60  ;;  %v4000_v58 = vld [vmem:[%s13460_s3 + $0x498] sm:$0xff] }
 0x33c   :  { %7473 = vmatprep.subr.bf16.mxu1 %v9024_v0  ;;  %v9072_v0 = vcombine.high %v3960_v55, %v3964_v61  ;;  %v4004_v50 = vld [vmem:[%s13460_s3 + $0x4b8] sm:$0xff] }
 0x33e   :  { %7310 = vmatpush1.bf16.msra.mxu0 %v9021_v7  ;;  %v9069_v7 = vcombine.low %v3959_v59, %v3963_v60  ;;  %v4007_v59 = vld [vmem:[%s13460_s3 + $0x4d0] sm:$0xff] }
 0x33f   :  { %7474 = vmatpush1.bf16.msra.mxu1 %v9023_v10  ;;  %7311 = vmatprep.subr.bf16.mxu0 %v9030_v17  ;;  %v9071_v10 = vcombine.low %v3960_v55, %v3964_v61  ;;  %v9078_v17 = vcombine.high %v3967_v2, %v3971_v5  ;;  %v4011_v60 = vld [vmem:[%s13460_s3 + $0x4f0] sm:$0xff]  ;;  %v4012_v55 = vld [vmem:[%s13460_s3 + $0x4f8] sm:$0xff]  ;;  %v9111_v61 = vcombine.low %v4000_v58, %v4004_v50 }
 0x340   :  { %7475 = vmatprep.subr.bf16.mxu1 %v9032_v57  ;;  %v9080_v57 = vcombine.high %v3968_v6, %v3972_v53 }
 0x342   :  { %7312 = vmatpush1.bf16.msra.mxu0 %v9029_v12  ;;  %v9077_v12 = vcombine.low %v3967_v2, %v3971_v5  ;;  %v4016_v2 = vld [vmem:[%s13460_s3 + $0x518] sm:$0xff] }
 0x343   :  { %7476 = vmatpush1.bf16.msra.mxu1 %v9031_v24  ;;  %7313 = vmatprep.subr.bf16.mxu0 %v9038_v27  ;;  %v9079_v24 = vcombine.low %v3968_v6, %v3972_v53  ;;  %v9086_v27 = vcombine.high %v3975_v19, %v3979_v20  ;;  %v4020_v5 = vld [vmem:[%s13460_s3 + $0x538] sm:$0xff]  ;;  %v9117_v6 = vcombine.low %v4007_v59, %v4011_v60 }
 0x344   :  { %7477 = vmatprep.subr.bf16.mxu1 %v9040_v15  ;;  %v9088_v15 = vcombine.high %v3976_v23, %v3980_v48 }
 0x346   :  { %7314 = vmatpush1.bf16.msra.mxu0 %v9037_v33  ;;  %v9085_v33 = vcombine.low %v3975_v19, %v3979_v20  ;;  %v4024_v19 = vld [vmem:[%s13460_s3 + $0x558] sm:$0xff] }
 0x347   :  { %7478 = vmatpush1.bf16.msra.mxu1 %v9039_v35  ;;  %7315 = vmatprep.subr.bf16.mxu0 %v9046_v37  ;;  %v9087_v35 = vcombine.low %v3976_v23, %v3980_v48  ;;  %v9094_v37 = vcombine.high %v3983_v28, %v3987_v30  ;;  %v4028_v20 = vld [vmem:[%s13460_s3 + $0x578] sm:$0xff]  ;;  %v9127_v48 = vcombine.low %v4016_v2, %v4020_v5 }
 0x348   :  { %7479 = vmatprep.subr.bf16.mxu1 %v9048_v38  ;;  %v9096_v38 = vcombine.high %v3984_v21, %v3988_v32  ;;  %v4032_v28 = vld [vmem:[%s13460_s3 + $0x598] sm:$0xff] }
 0x349   :  { %v4036_v30 = vld [vmem:[%s13460_s3 + $0x5b8] sm:$0xff] }
 0x34a   :  { %7316 = vmatpush1.bf16.msra.mxu0 %v9045_v9  ;;  %v3996_v9 = vld [vmem:[%s13460_s3 + $0x478] sm:$0xff] }
 0x34b   :  { %7480 = vmatpush1.bf16.msra.mxu1 %v9047_v31  ;;  %7317 = vmatprep.subr.bf16.mxu0 %v9054_v25  ;;  %v9095_v31 = vcombine.low %v3984_v21, %v3988_v32  ;;  %v9102_v25 = vcombine.high %v3991_v36, %v3995_v49  ;;  %v9104_v44 = vcombine.high %v3992_v41, %v3996_v9 }
 0x34c   :  { %7481 = vmatprep.subr.bf16.mxu1 %v9056_v42  ;;  %v3999_v42 = vld [vmem:[%s13460_s3 + $0x490] sm:$0xff]  ;;  %v9135_v32 = vcombine.low %v4024_v19, %v4028_v20 }
 0x34e   :  { %7318 = vmatpush1.bf16.msra.mxu0 %v9053_v51  ;;  %v9101_v51 = vcombine.low %v3991_v36, %v3995_v49  ;;  %v4040_v36 = vld [vmem:[%s13460_s3 + $0x5d8] sm:$0xff] }
 0x34f   :  { %7482 = vmatpush1.bf16.msra.mxu1 %v9055_v52  ;;  %7319 = vmatprep.subr.bf16.mxu0 %v9062_v4  ;;  %v9103_v52 = vcombine.low %v3992_v41, %v3996_v9  ;;  %v9110_v4 = vcombine.high %v3999_v42, %v4003_v43  ;;  %v4044_v49 = vld [vmem:[%s13460_s3 + $0x5f8] sm:$0xff]  ;;  %v9143_v41 = vcombine.low %v4032_v28, %v4036_v30 }
 0x350   :  { %7483 = vmatprep.subr.bf16.mxu1 %v9064_v56  ;;  %v9112_v56 = vcombine.high %v4000_v58, %v4004_v50  ;;  %v9151_v50 = vcombine.low %v4040_v36, %v4044_v49 }
 0x352   :  { %7320 = vmatpush1.bf16.msra.mxu0 %v9061_v62  ;;  %v9118_v62 = vcombine.high %v4007_v59, %v4011_v60  ;;  %v4056_v59 = vld [vmem:[%s13460_s3 + $0x658] sm:$0xff] }
 0x353   :  { %7484 = vmatpush1.bf16.msra.mxu1 %v9063_v39  ;;  %7321 = vmatprep.subr.bf16.mxu0 %v9070_v63  ;;  %v4015_v63 = vld [vmem:[%s13460_s3 + $0x510] sm:$0xff]  ;;  %v4060_v60 = vld [vmem:[%s13460_s3 + $0x678] sm:$0xff] }
 0x354   :  { %7485 = vmatprep.subr.bf16.mxu1 %v9072_v0  ;;  %v4019_v0 = vld [vmem:[%s13460_s3 + $0x530] sm:$0xff] }
 0x355   :  { %v9125_v23 = vcombine.low %v4015_v63, %v4019_v0 }
 0x356   :  { %7322 = vmatpush1.bf16.msra.mxu0 %v9069_v7  ;;  %v9126_v7 = vcombine.high %v4015_v63, %v4019_v0  ;;  %v4064_v63 = vld [vmem:[%s13460_s3 + $0x698] sm:$0xff] }
 0x357   :  { %7486 = vmatpush1.bf16.msra.mxu1 %v9071_v10  ;;  %7323 = vmatprep.subr.bf16.mxu0 %v9078_v17  ;;  %v9128_v10 = vcombine.high %v4016_v2, %v4020_v5  ;;  %v4023_v17 = vld [vmem:[%s13460_s3 + $0x550] sm:$0xff]  ;;  %v4068_v0 = vld [vmem:[%s13460_s3 + $0x6b8] sm:$0xff]  ;;  %v9167_v5 = vcombine.low %v4056_v59, %v4060_v60 }
 0x358   :  { %7487 = vmatprep.subr.bf16.mxu1 %v9080_v57  ;;  %v4027_v57 = vld [vmem:[%s13460_s3 + $0x570] sm:$0xff] }
 0x359   :  { %v9133_v21 = vcombine.low %v4023_v17, %v4027_v57 }
 0x35a   :  { %7324 = vmatpush1.bf16.msra.mxu0 %v9077_v12  ;;  %v9134_v12 = vcombine.high %v4023_v17, %v4027_v57  ;;  %v4072_v17 = vld [vmem:[%s13460_s3 + $0x6d8] sm:$0xff] }
 0x35b   :  { %7488 = vmatpush1.bf16.msra.mxu1 %v9079_v24  ;;  %7325 = vmatprep.subr.bf16.mxu0 %v9086_v27  ;;  %v9136_v24 = vcombine.high %v4024_v19, %v4028_v20  ;;  %v4031_v27 = vld [vmem:[%s13460_s3 + $0x590] sm:$0xff]  ;;  %v4076_v57 = vld [vmem:[%s13460_s3 + $0x6f8] sm:$0xff]  ;;  %v9175_v20 = vcombine.low %v4064_v63, %v4068_v0 }
 0x35c   :  { %7489 = vmatprep.subr.bf16.mxu1 %v9088_v15  ;;  %v4035_v15 = vld [vmem:[%s13460_s3 + $0x5b0] sm:$0xff] }
 0x35e   :  { %7326 = vmatpush1.bf16.msra.mxu0 %v9085_v33  ;;  %v9142_v33 = vcombine.high %v4031_v27, %v4035_v15 }
 0x35f   :  { %7490 = vmatpush1.bf16.msra.mxu1 %v9087_v35  ;;  %7336 = vmatprep.subr.bf16.mxu0 %v9094_v37  ;;  %v9144_v35 = vcombine.high %v4032_v28, %v4036_v30  ;;  %v4039_v37 = vld [vmem:[%s13460_s3 + $0x5d0] sm:$0xff]  ;;  %v9183_v30 = vcombine.low %v4072_v17, %v4076_v57 }
 0x360   :  { %7500 = vmatprep.subr.bf16.mxu1 %v9096_v38  ;;  %v4043_v38 = vld [vmem:[%s13460_s3 + $0x5f0] sm:$0xff] }
 0x361   :  { %7328 = vmatmul.mubr.bf16.vlgmr.msra.gmra.mrb[12].mxu0 %v11786_v3  ;;  %v9150_v9 = vcombine.high %v4039_v37, %v4043_v38  ;;  %v9149_v58 = vcombine.low %v4039_v37, %v4043_v38  ;;  %v4088_v37 = vld [vmem:[%s13460_s3 + $0x758] sm:$0xff] }
 0x362   :  { %7492 = vmatmul.mubr.bf16.vlgmr.msra.gmra.mrb[12].mxu1 %v11786_v3  ;;  %7337 = vmatpush1.bf16.msra.mxu0 %v9093_v40  ;;  %v4008_v3 = vld [vmem:[%s13460_s3 + $0x4d8] sm:$0xff]  ;;  %v9141_v40 = vcombine.low %v4031_v27, %v4035_v15 }
 0x363   :  { %7368 = vmatprep.mubr.bf16.mxu0 %v11794_v11  ;;  %7501 = vmatpush1.bf16.msra.mxu1 %v9095_v31  ;;  %v9120_v39 = vcombine.high %v4008_v3, %v4012_v55  ;;  %v9119_v53 = vcombine.low %v4008_v3, %v4012_v55  ;;  %v9152_v31 = vcombine.high %v4040_v36, %v4044_v49  ;;  %v4080_v27 = vld [vmem:[%s13460_s3 + $0x718] sm:$0xff] }
 0x364   :  { %7532 = vmatprep.mubr.bf16.mxu1 %v11794_v11  ;;  %7338 = vmatprep.subr.bf16.mxu0 %v9102_v25  ;;  %v9109_v11 = vcombine.low %v3999_v42, %v4003_v43  ;;  %v4047_v25 = vld [vmem:[%s13460_s3 + $0x610] sm:$0xff]  ;;  %v4048_v43 = vld [vmem:[%s13460_s3 + $0x618] sm:$0xff] }
 0x365   :  { %7502 = vmatprep.subr.bf16.mxu1 %v9104_v44  ;;  %v4051_v42 = vld [vmem:[%s13460_s3 + $0x630] sm:$0xff]  ;;  %v4052_v44 = vld [vmem:[%s13460_s3 + $0x638] sm:$0xff] }
 0x366   :  { %7339 = vmatpush1.bf16.msra.mxu0 %v9101_v51  ;;  %v9158_v51 = vcombine.high %v4047_v25, %v4051_v42  ;;  %v9157_v3 = vcombine.low %v4047_v25, %v4051_v42  ;;  %v9159_v55 = vcombine.low %v4048_v43, %v4052_v44  ;;  %v4084_v15 = vld [vmem:[%s13460_s3 + $0x738] sm:$0xff] }
 0x367   :  { %7503 = vmatpush1.bf16.msra.mxu1 %v9103_v52  ;;  %7340 = vmatprep.subr.bf16.mxu0 %v9110_v4  ;;  %v9160_v52 = vcombine.high %v4048_v43, %v4052_v44  ;;  %v4055_v4 = vld [vmem:[%s13460_s3 + $0x650] sm:$0xff]  ;;  %v4092_v38 = vld [vmem:[%s13460_s3 + $0x778] sm:$0xff]  ;;  %v9191_v49 = vcombine.low %v4080_v27, %v4084_v15 }
 0x368   :  { %7504 = vmatprep.subr.bf16.mxu1 %v9112_v56  ;;  %v4059_v56 = vld [vmem:[%s13460_s3 + $0x670] sm:$0xff]  ;;  %v4096_v25 = vld [vmem:[%s13460_s3 + $0x798] sm:$0xff]  ;;  %v9199_v44 = vcombine.low %v4088_v37, %v4092_v38 }
 0x369   :  { %v9165_v2 = vcombine.low %v4055_v4, %v4059_v56  ;;  %v4100_v42 = vld [vmem:[%s13460_s3 + $0x7b8] sm:$0xff] }
 0x36a   :  { %7341 = vmatpush1.bf16.msra.mxu0 %v9109_v11  ;;  %v9166_v11 = vcombine.high %v4055_v4, %v4059_v56  ;;  %v4104_v4 = vld [vmem:[%s13460_s3 + $0x7d8] sm:$0xff] }
 0x36b   :  { %7505 = vmatpush1.bf16.msra.mxu1 %v9111_v61  ;;  %7342 = vmatprep.subr.bf16.mxu0 %v9118_v62  ;;  %v9168_v61 = vcombine.high %v4056_v59, %v4060_v60  ;;  %v4063_v62 = vld [vmem:[%s13460_s3 + $0x690] sm:$0xff]  ;;  %v4108_v56 = vld [vmem:[%s13460_s3 + $0x7f8] sm:$0xff]  ;;  %v9207_v60 = vcombine.low %v4096_v25, %v4100_v42 }
 0x36c   :  { %7506 = vmatprep.subr.bf16.mxu1 %v9120_v39  ;;  %v4067_v39 = vld [vmem:[%s13460_s3 + $0x6b0] sm:$0xff] }
 0x36d   :  { %v9173_v19 = vcombine.low %v4063_v62, %v4067_v39 }
 0x36e   :  { %7343 = vmatpush1.bf16.msra.mxu0 %v9117_v6  ;;  %v9174_v6 = vcombine.high %v4063_v62, %v4067_v39  ;;  %v4112_v62 = vld [vmem:[%s13460_s3 + $0x818] sm:$0xff] }
 0x36f   :  { %7507 = vmatpush1.bf16.msra.mxu1 %v9119_v53  ;;  %7344 = vmatprep.subr.bf16.mxu0 %v9126_v7  ;;  %v9176_v53 = vcombine.high %v4064_v63, %v4068_v0  ;;  %v4071_v7 = vld [vmem:[%s13460_s3 + $0x6d0] sm:$0xff]  ;;  %v4116_v39 = vld [vmem:[%s13460_s3 + $0x838] sm:$0xff]  ;;  %v9215_v0 = vcombine.low %v4104_v4, %v4108_v56 }
 0x370   :  { %7508 = vmatprep.subr.bf16.mxu1 %v9128_v10  ;;  %v4075_v10 = vld [vmem:[%s13460_s3 + $0x6f0] sm:$0xff] }
 0x371   :  { %v9181_v28 = vcombine.low %v4071_v7, %v4075_v10 }
 0x372   :  { %7345 = vmatpush1.bf16.msra.mxu0 %v9125_v23  ;;  %v9182_v23 = vcombine.high %v4071_v7, %v4075_v10  ;;  %v4120_v10 = vld [vmem:[%s13460_s3 + $0x858] sm:$0xff] }
 0x373   :  { %7509 = vmatpush1.bf16.msra.mxu1 %v9127_v48  ;;  %7346 = vmatprep.subr.bf16.mxu0 %v9134_v12  ;;  %v9184_v48 = vcombine.high %v4072_v17, %v4076_v57  ;;  %v4079_v12 = vld [vmem:[%s13460_s3 + $0x710] sm:$0xff]  ;;  %v4124_v17 = vld [vmem:[%s13460_s3 + $0x878] sm:$0xff]  ;;  %v9223_v57 = vcombine.low %v4112_v62, %v4116_v39 }
 0x374   :  { %7510 = vmatprep.subr.bf16.mxu1 %v9136_v24  ;;  %v4083_v24 = vld [vmem:[%s13460_s3 + $0x730] sm:$0xff] }
 0x375   :  { %v9189_v36 = vcombine.low %v4079_v12, %v4083_v24 }
 0x376   :  { %7347 = vmatpush1.bf16.msra.mxu0 %v9133_v21  ;;  %v9190_v21 = vcombine.high %v4079_v12, %v4083_v24  ;;  %v9232_v12 = vcombine.high %v4120_v10, %v4124_v17  ;;  %v4132_v24 = vld [vmem:[%s13460_s3 + $0x8b8] sm:$0xff] }
 0x377   :  { %7511 = vmatpush1.bf16.msra.mxu1 %v9135_v32  ;;  %7348 = vmatprep.subr.bf16.mxu0 %v9142_v33  ;;  %v9192_v32 = vcombine.high %v4080_v27, %v4084_v15  ;;  %v4087_v33 = vld [vmem:[%s13460_s3 + $0x750] sm:$0xff] }
 0x378   :  { %7512 = vmatprep.subr.bf16.mxu1 %v9144_v35  ;;  %v4091_v35 = vld [vmem:[%s13460_s3 + $0x770] sm:$0xff] }
 0x379   :  { %v9197_v43 = vcombine.low %v4087_v33, %v4091_v35  ;;  %v4135_v15 = vld [vmem:[%s13460_s3 + $0x8d0] sm:$0xff] }
 0x37a   :  { %7349 = vmatpush1.bf16.msra.mxu0 %v9141_v40  ;;  %v9198_v40 = vcombine.high %v4087_v33, %v4091_v35  ;;  %v4140_v33 = vld [vmem:[%s13460_s3 + $0x8f8] sm:$0xff] }
 0x37b   :  { %7513 = vmatpush1.bf16.msra.mxu1 %v9143_v41  ;;  %7350 = vmatprep.subr.bf16.mxu0 %v9150_v9  ;;  %v9200_v41 = vcombine.high %v4088_v37, %v4092_v38  ;;  %v4095_v9 = vld [vmem:[%s13460_s3 + $0x790] sm:$0xff] }
 0x37c   :  { %7514 = vmatprep.subr.bf16.mxu1 %v9152_v31  ;;  %v4099_v31 = vld [vmem:[%s13460_s3 + $0x7b0] sm:$0xff] }
 0x37d   :  { %v9205_v59 = vcombine.low %v4095_v9, %v4099_v31  ;;  %v4143_v37 = vld [vmem:[%s13460_s3 + $0x910] sm:$0xff] }
 0x37e   :  { %7351 = vmatpush1.bf16.msra.mxu0 %v9149_v58  ;;  %v9206_v58 = vcombine.high %v4095_v9, %v4099_v31  ;;  %v4151_v31 = vld [vmem:[%s13460_s3 + $0x950] sm:$0xff] }
 0x37f   :  { %7515 = vmatpush1.bf16.msra.mxu1 %v9151_v50  ;;  %7352 = vmatprep.subr.bf16.mxu0 %v9158_v51  ;;  %v9208_v50 = vcombine.high %v4096_v25, %v4100_v42  ;;  %v4103_v51 = vld [vmem:[%s13460_s3 + $0x7d0] sm:$0xff] }
 0x380   :  { %7516 = vmatprep.subr.bf16.mxu1 %v9160_v52  ;;  %v4107_v52 = vld [vmem:[%s13460_s3 + $0x7f0] sm:$0xff] }
 0x381   :  { %v9213_v63 = vcombine.low %v4103_v51, %v4107_v52 }
 0x382   :  { %7353 = vmatpush1.bf16.msra.mxu0 %v9157_v3  ;;  %v9214_v3 = vcombine.high %v4103_v51, %v4107_v52  ;;  %v4159_v52 = vld [vmem:[%s13460_s3 + $0x990] sm:$0xff] }
 0x383   :  { %7517 = vmatpush1.bf16.msra.mxu1 %v9159_v55  ;;  %7354 = vmatprep.subr.bf16.mxu0 %v9166_v11  ;;  %v9216_v55 = vcombine.high %v4104_v4, %v4108_v56  ;;  %v4111_v11 = vld [vmem:[%s13460_s3 + $0x810] sm:$0xff] }
 0x384   :  { %7518 = vmatprep.subr.bf16.mxu1 %v9168_v61  ;;  %v4115_v61 = vld [vmem:[%s13460_s3 + $0x830] sm:$0xff] }
 0x385   :  { %v9221_v7 = vcombine.low %v4111_v11, %v4115_v61 }
 0x386   :  { %7355 = vmatpush1.bf16.msra.mxu0 %v9165_v2  ;;  %v9222_v2 = vcombine.high %v4111_v11, %v4115_v61  ;;  %v4167_v61 = vld [vmem:[%s13460_s3 + $0x9d0] sm:$0xff] }
 0x387   :  { %7519 = vmatpush1.bf16.msra.mxu1 %v9167_v5  ;;  %7356 = vmatprep.subr.bf16.mxu0 %v9174_v6  ;;  %v9224_v5 = vcombine.high %v4112_v62, %v4116_v39  ;;  %v4119_v6 = vld [vmem:[%s13460_s3 + $0x850] sm:$0xff] }
 0x388   :  { %7520 = vmatprep.subr.bf16.mxu1 %v9176_v53  ;;  %v4123_v53 = vld [vmem:[%s13460_s3 + $0x870] sm:$0xff] }
 0x389   :  { %v9229_v27 = vcombine.low %v4119_v6, %v4123_v53 }
 0x38a   :  { %7357 = vmatpush1.bf16.msra.mxu0 %v9173_v19  ;;  %v9230_v19 = vcombine.high %v4119_v6, %v4123_v53  ;;  %v4175_v53 = vld [vmem:[%s13460_s3 + $0xa10] sm:$0xff] }
 0x38b   :  { %7521 = vmatpush1.bf16.msra.mxu1 %v9175_v20  ;;  %7358 = vmatprep.subr.bf16.mxu0 %v9182_v23  ;;  %v4127_v20 = vld [vmem:[%s13460_s3 + $0x890] sm:$0xff] }
 0x38c   :  { %7522 = vmatprep.subr.bf16.mxu1 %v9184_v48  ;;  %v4131_v23 = vld [vmem:[%s13460_s3 + $0x8b0] sm:$0xff]  ;;  %v4128_v48 = vld [vmem:[%s13460_s3 + $0x898] sm:$0xff] }
 0x38d   :  { %v9237_v35 = vcombine.low %v4127_v20, %v4131_v23 }
 0x38e   :  { %7359 = vmatpush1.bf16.msra.mxu0 %v9181_v28  ;;  %v9231_v28 = vcombine.low %v4120_v10, %v4124_v17  ;;  %v4179_v17 = vld [vmem:[%s13460_s3 + $0xa30] sm:$0xff] }
 0x38f   :  { %7523 = vmatpush1.bf16.msra.mxu1 %v9183_v30  ;;  %7360 = vmatprep.subr.bf16.mxu0 %v9190_v21  ;;  %v9238_v30 = vcombine.high %v4127_v20, %v4131_v23  ;;  %v4139_v21 = vld [vmem:[%s13460_s3 + $0x8f0] sm:$0xff]  ;;  %v4180_v20 = vld [vmem:[%s13460_s3 + $0xa38] sm:$0xff] }
 0x390   :  { %7524 = vmatprep.subr.bf16.mxu1 %v9192_v32  ;;  %v9240_v32 = vcombine.high %v4128_v48, %v4132_v24  ;;  %v9246_v38 = vcombine.high %v4135_v15, %v4139_v21  ;;  %v9245_v9 = vcombine.low %v4135_v15, %v4139_v21  ;;  %v9285_v21 = vcombine.low %v4175_v53, %v4179_v17 }
 0x392   :  { %7361 = vmatpush1.bf16.msra.mxu0 %v9189_v36  ;;  %v4147_v36 = vld [vmem:[%s13460_s3 + $0x930] sm:$0xff] }
 0x393   :  { %7525 = vmatpush1.bf16.msra.mxu1 %v9191_v49  ;;  %7362 = vmatprep.subr.bf16.mxu0 %v9198_v40  ;;  %v4144_v40 = vld [vmem:[%s13460_s3 + $0x918] sm:$0xff]  ;;  %v9254_v42 = vcombine.high %v4143_v37, %v4147_v36  ;;  %v9253_v51 = vcombine.low %v4143_v37, %v4147_v36 }
 0x394   :  { %7526 = vmatprep.subr.bf16.mxu1 %v9200_v41  ;;  %v4148_v41 = vld [vmem:[%s13460_s3 + $0x938] sm:$0xff] }
 0x395   :  { %v9255_v4 = vcombine.low %v4144_v40, %v4148_v41  ;;  %v4192_v37 = vld [vmem:[%s13460_s3 + $0xa98] sm:$0xff] }
 0x396   :  { %7363 = vmatpush1.bf16.msra.mxu0 %v9197_v43  ;;  %v4155_v43 = vld [vmem:[%s13460_s3 + $0x970] sm:$0xff] }
 0x397   :  { %7527 = vmatpush1.bf16.msra.mxu1 %v9199_v44  ;;  %7364 = vmatprep.subr.bf16.mxu0 %v9206_v58  ;;  %v9256_v44 = vcombine.high %v4144_v40, %v4148_v41  ;;  %v4152_v58 = vld [vmem:[%s13460_s3 + $0x958] sm:$0xff]  ;;  %v9262_v56 = vcombine.high %v4151_v31, %v4155_v43  ;;  %v9261_v11 = vcombine.low %v4151_v31, %v4155_v43 }
 0x398   :  { %7528 = vmatprep.subr.bf16.mxu1 %v9208_v50  ;;  %v4156_v50 = vld [vmem:[%s13460_s3 + $0x978] sm:$0xff] }
 0x399   :  { %v9263_v62 = vcombine.low %v4152_v58, %v4156_v50 }
 0x39a   :  { %7365 = vmatpush1.bf16.msra.mxu0 %v9205_v59  ;;  %v4163_v59 = vld [vmem:[%s13460_s3 + $0x9b0] sm:$0xff] }
 0x39b   :  { %7529 = vmatpush1.bf16.msra.mxu1 %v9207_v60  ;;  %7366 = vmatprep.subr.bf16.mxu0 %v9214_v3  ;;  %v9264_v60 = vcombine.high %v4152_v58, %v4156_v50  ;;  %v4160_v3 = vld [vmem:[%s13460_s3 + $0x998] sm:$0xff]  ;;  %v9270_v39 = vcombine.high %v4159_v52, %v4163_v59  ;;  %v9269_v6 = vcombine.low %v4159_v52, %v4163_v59 }
 0x39c   :  { %7530 = vmatprep.subr.bf16.mxu1 %v9216_v55  ;;  %v4164_v55 = vld [vmem:[%s13460_s3 + $0x9b8] sm:$0xff] }
 0x39e   :  { %7367 = vmatpush1.bf16.msra.mxu0 %v9213_v63  ;;  %v4171_v63 = vld [vmem:[%s13460_s3 + $0x9f0] sm:$0xff] }
 0x39f   :  { %7531 = vmatpush1.bf16.msra.mxu1 %v9215_v0  ;;  %7377 = vmatprep.subr.bf16.mxu0 %v9222_v2  ;;  %v9272_v0 = vcombine.high %v4160_v3, %v4164_v55  ;;  %v4168_v2 = vld [vmem:[%s13460_s3 + $0x9d8] sm:$0xff]  ;;  %v9278_v10 = vcombine.high %v4167_v61, %v4171_v63  ;;  %v9277_v23 = vcombine.low %v4167_v61, %v4171_v63 }
 0x3a0   :  { %7541 = vmatprep.subr.bf16.mxu1 %v9224_v5  ;;  %v4172_v5 = vld [vmem:[%s13460_s3 + $0x9f8] sm:$0xff] }
 0x3a1   :  { %7369 = vmatmul.mubr.bf16.vlgmr.msra.gmra.mrb[12].mxu0 %v11991_v22 }
 0x3a2   :  { %7533 = vmatmul.mubr.bf16.vlgmr.msra.gmra.mrb[12].mxu1 %v11991_v22  ;;  %7378 = vmatpush1.bf16.msra.mxu0 %v9221_v7  ;;  %v4136_v22 = vld [vmem:[%s13460_s3 + $0x8d8] sm:$0xff]  ;;  %v9271_v7 = vcombine.low %v4160_v3, %v4164_v55 }
 0x3a3   :  { %7409 = vmatprep.mubr.bf16.mxu0 %v12206_v14  ;;  %7542 = vmatpush1.bf16.msra.mxu1 %v9223_v57  ;;  %v9248_v49 = vcombine.high %v4136_v22, %v4140_v33  ;;  %v9247_v25 = vcombine.low %v4136_v22, %v4140_v33  ;;  %v9280_v57 = vcombine.high %v4168_v2, %v4172_v5  ;;  %v4195_v22 = vld [vmem:[%s13460_s3 + $0xab0] sm:$0xff] }
 0x3a4   :  { %7573 = vmatprep.mubr.bf16.mxu1 %v12206_v14  ;;  %7379 = vmatprep.subr.bf16.mxu0 %v9230_v19  ;;  %v9239_v14 = vcombine.low %v4128_v48, %v4132_v24  ;;  %v4176_v19 = vld [vmem:[%s13460_s3 + $0xa18] sm:$0xff]  ;;  %v4183_v48 = vld [vmem:[%s13460_s3 + $0xa50] sm:$0xff]  ;;  %v9286_v24 = vcombine.high %v4175_v53, %v4179_v17 }
 0x3a5   :  { %7543 = vmatprep.subr.bf16.mxu1 %v9232_v12  ;;  %v9279_v12 = vcombine.low %v4168_v2, %v4172_v5  ;;  %v9288_v15 = vcombine.high %v4176_v19, %v4180_v20  ;;  %v9287_v33 = vcombine.low %v4176_v19, %v4180_v20 }
 0x3a6   :  { %7380 = vmatpush1.bf16.msra.mxu0 %v9229_v27  ;;  %v4187_v27 = vld [vmem:[%s13460_s3 + $0xa70] sm:$0xff] }
 0x3a7   :  { %7544 = vmatpush1.bf16.msra.mxu1 %v9231_v28  ;;  %7381 = vmatprep.subr.bf16.mxu0 %v9238_v30  ;;  %v4184_v28 = vld [vmem:[%s13460_s3 + $0xa58] sm:$0xff]  ;;  %v9293_v36 = vcombine.low %v4183_v48, %v4187_v27 }
 0x3a8   :  { %7545 = vmatprep.subr.bf16.mxu1 %v9240_v32  ;;  %v4188_v30 = vld [vmem:[%s13460_s3 + $0xa78] sm:$0xff]  ;;  %v4191_v32 = vld [vmem:[%s13460_s3 + $0xa90] sm:$0xff] }
 0x3a9   :  { %v9295_v40 = vcombine.low %v4184_v28, %v4188_v30  ;;  %v9302_v41 = vcombine.high %v4191_v32, %v4195_v22  ;;  %v9301_v43 = vcombine.low %v4191_v32, %v4195_v22  ;;  %v4240_v32 = vld [vmem:[%s13460_s3 + $0xc18] sm:$0xff] }
 0x3aa   :  { %7382 = vmatpush1.bf16.msra.mxu0 %v9237_v35  ;;  %v9294_v35 = vcombine.high %v4183_v48, %v4187_v27 }
 0x3ab   :  { %7546 = vmatpush1.bf16.msra.mxu1 %v9239_v14  ;;  %7383 = vmatprep.subr.bf16.mxu0 %v9246_v38  ;;  %v9296_v14 = vcombine.high %v4184_v28, %v4188_v30  ;;  %v4196_v38 = vld [vmem:[%s13460_s3 + $0xab8] sm:$0xff]  ;;  %v4243_v28 = vld [vmem:[%s13460_s3 + $0xc30] sm:$0xff] }
 0x3ac   :  { %7547 = vmatprep.subr.bf16.mxu1 %v9248_v49  ;;  %v4199_v49 = vld [vmem:[%s13460_s3 + $0xad0] sm:$0xff]  ;;  %v9304_v31 = vcombine.high %v4192_v37, %v4196_v38  ;;  %v9303_v58 = vcombine.low %v4192_v37, %v4196_v38 }
 0x3ad   :  { %v4247_v38 = vld [vmem:[%s13460_s3 + $0xc50] sm:$0xff] }
 0x3ae   :  { %7384 = vmatpush1.bf16.msra.mxu0 %v9245_v9  ;;  %v4203_v9 = vld [vmem:[%s13460_s3 + $0xaf0] sm:$0xff] }
 0x3af   :  { %7548 = vmatpush1.bf16.msra.mxu1 %v9247_v25  ;;  %7385 = vmatprep.subr.bf16.mxu0 %v9254_v42  ;;  %v4200_v25 = vld [vmem:[%s13460_s3 + $0xad8] sm:$0xff]  ;;  %v9310_v50 = vcombine.high %v4199_v49, %v4203_v9  ;;  %v9309_v59 = vcombine.low %v4199_v49, %v4203_v9 }
 0x3b0   :  { %7549 = vmatprep.subr.bf16.mxu1 %v9256_v44  ;;  %v4204_v42 = vld [vmem:[%s13460_s3 + $0xaf8] sm:$0xff]  ;;  %v4207_v44 = vld [vmem:[%s13460_s3 + $0xb10] sm:$0xff] }
 0x3b1   :  { %v9312_v52 = vcombine.high %v4200_v25, %v4204_v42  ;;  %v9311_v3 = vcombine.low %v4200_v25, %v4204_v42  ;;  %v4252_v9 = vld [vmem:[%s13460_s3 + $0xc78] sm:$0xff]  ;;  %v4255_v42 = vld [vmem:[%s13460_s3 + $0xc90] sm:$0xff] }
 0x3b2   :  { %7386 = vmatpush1.bf16.msra.mxu0 %v9253_v51  ;;  %v4211_v51 = vld [vmem:[%s13460_s3 + $0xb30] sm:$0xff] }
 0x3b3   :  { %7550 = vmatpush1.bf16.msra.mxu1 %v9255_v4  ;;  %7387 = vmatprep.subr.bf16.mxu0 %v9262_v56  ;;  %v4208_v4 = vld [vmem:[%s13460_s3 + $0xb18] sm:$0xff]  ;;  %v9318_v55 = vcombine.high %v4207_v44, %v4211_v51  ;;  %v9317_v63 = vcombine.low %v4207_v44, %v4211_v51 }
 0x3b4   :  { %7551 = vmatprep.subr.bf16.mxu1 %v9264_v60  ;;  %v4212_v56 = vld [vmem:[%s13460_s3 + $0xb38] sm:$0xff]  ;;  %v4215_v60 = vld [vmem:[%s13460_s3 + $0xb50] sm:$0xff] }
 0x3b5   :  { %v9320_v61 = vcombine.high %v4208_v4, %v4212_v56  ;;  %v9319_v2 = vcombine.low %v4208_v4, %v4212_v56 }
 0x3b6   :  { %7388 = vmatpush1.bf16.msra.mxu0 %v9261_v11  ;;  %v4219_v11 = vld [vmem:[%s13460_s3 + $0xb70] sm:$0xff] }
 0x3b7   :  { %7552 = vmatpush1.bf16.msra.mxu1 %v9263_v62  ;;  %7389 = vmatprep.subr.bf16.mxu0 %v9270_v39  ;;  %v4216_v62 = vld [vmem:[%s13460_s3 + $0xb58] sm:$0xff]  ;;  %v9326_v5 = vcombine.high %v4215_v60, %v4219_v11  ;;  %v9325_v17 = vcombine.low %v4215_v60, %v4219_v11  ;;  %v4267_v60 = vld [vmem:[%s13460_s3 + $0xcf0] sm:$0xff] }
 0x3b8   :  { %7553 = vmatprep.subr.bf16.mxu1 %v9272_v0  ;;  %v4220_v39 = vld [vmem:[%s13460_s3 + $0xb78] sm:$0xff]  ;;  %v4223_v0 = vld [vmem:[%s13460_s3 + $0xb90] sm:$0xff] }
 0x3b9   :  { %v9328_v53 = vcombine.high %v4216_v62, %v4220_v39  ;;  %v9327_v19 = vcombine.low %v4216_v62, %v4220_v39  ;;  %v4271_v62 = vld [vmem:[%s13460_s3 + $0xd10] sm:$0xff] }
 0x3ba   :  { %7390 = vmatpush1.bf16.msra.mxu0 %v9269_v6  ;;  %v4227_v6 = vld [vmem:[%s13460_s3 + $0xbb0] sm:$0xff] }
 0x3bb   :  { %7554 = vmatpush1.bf16.msra.mxu1 %v9271_v7  ;;  %7391 = vmatprep.subr.bf16.mxu0 %v9278_v10  ;;  %v4224_v7 = vld [vmem:[%s13460_s3 + $0xb98] sm:$0xff]  ;;  %v9334_v20 = vcombine.high %v4223_v0, %v4227_v6  ;;  %v9333_v27 = vcombine.low %v4223_v0, %v4227_v6  ;;  %v4275_v39 = vld [vmem:[%s13460_s3 + $0xd30] sm:$0xff] }
 0x3bc   :  { %7555 = vmatprep.subr.bf16.mxu1 %v9280_v57  ;;  %v4228_v10 = vld [vmem:[%s13460_s3 + $0xbb8] sm:$0xff]  ;;  %v4231_v57 = vld [vmem:[%s13460_s3 + $0xbd0] sm:$0xff]  ;;  %v9382_v6 = vcombine.high %v4271_v62, %v4275_v39 }
 0x3bd   :  { %v9336_v48 = vcombine.high %v4224_v7, %v4228_v10  ;;  %v9335_v30 = vcombine.low %v4224_v7, %v4228_v10  ;;  %v4276_v0 = vld [vmem:[%s13460_s3 + $0xd38] sm:$0xff]  ;;  %v4279_v7 = vld [vmem:[%s13460_s3 + $0xd50] sm:$0xff] }
 0x3be   :  { %7392 = vmatpush1.bf16.msra.mxu0 %v9277_v23  ;;  %v4235_v23 = vld [vmem:[%s13460_s3 + $0xbf0] sm:$0xff] }
 0x3bf   :  { %7556 = vmatpush1.bf16.msra.mxu1 %v9279_v12  ;;  %7393 = vmatprep.subr.bf16.mxu0 %v9286_v24  ;;  %v4232_v12 = vld [vmem:[%s13460_s3 + $0xbd8] sm:$0xff]  ;;  %v4283_v10 = vld [vmem:[%s13460_s3 + $0xd70] sm:$0xff] }
 0x3c0   :  { %7557 = vmatprep.subr.bf16.mxu1 %v9288_v15  ;;  %v4236_v24 = vld [vmem:[%s13460_s3 + $0xbf8] sm:$0xff]  ;;  %v4239_v15 = vld [vmem:[%s13460_s3 + $0xc10] sm:$0xff] }
 0x3c1   :  { %v9344_v22 = vcombine.high %v4232_v12, %v4236_v24  ;;  %v9343_v37 = vcombine.low %v4232_v12, %v4236_v24  ;;  %v4287_v12 = vld [vmem:[%s13460_s3 + $0xd90] sm:$0xff] }
 0x3c2   :  { %7394 = vmatpush1.bf16.msra.mxu0 %v9285_v21  ;;  %v9342_v21 = vcombine.high %v4231_v57, %v4235_v23  ;;  %v4291_v24 = vld [vmem:[%s13460_s3 + $0xdb0] sm:$0xff] }
 0x3c3   :  { %7558 = vmatpush1.bf16.msra.mxu1 %v9287_v33  ;;  %7395 = vmatprep.subr.bf16.mxu0 %v9294_v35  ;;  %v4244_v33 = vld [vmem:[%s13460_s3 + $0xc38] sm:$0xff]  ;;  %v9341_v35 = vcombine.low %v4231_v57, %v4235_v23  ;;  %v9390_v23 = vcombine.high %v4279_v7, %v4283_v10 }
 0x3c4   :  { %7559 = vmatprep.subr.bf16.mxu1 %v9296_v14  ;;  %v9350_v14 = vcombine.high %v4239_v15, %v4243_v28  ;;  %v9352_v49 = vcombine.high %v4240_v32, %v4244_v33  ;;  %v4284_v57 = vld [vmem:[%s13460_s3 + $0xd78] sm:$0xff] }
 0x3c6   :  { %7396 = vmatpush1.bf16.msra.mxu0 %v9293_v36  ;;  %v4251_v36 = vld [vmem:[%s13460_s3 + $0xc70] sm:$0xff] }
 0x3c7   :  { %7560 = vmatpush1.bf16.msra.mxu1 %v9295_v40  ;;  %7397 = vmatprep.subr.bf16.mxu0 %v9302_v41  ;;  %v9349_v40 = vcombine.low %v4239_v15, %v4243_v28  ;;  %v4248_v41 = vld [vmem:[%s13460_s3 + $0xc58] sm:$0xff]  ;;  %v9358_v25 = vcombine.high %v4247_v38, %v4251_v36  ;;  %v9357_v51 = vcombine.low %v4247_v38, %v4251_v36 }
 0x3c8   :  { %7561 = vmatprep.subr.bf16.mxu1 %v9304_v31  ;;  %v9351_v31 = vcombine.low %v4240_v32, %v4244_v33  ;;  %v9360_v44 = vcombine.high %v4248_v41, %v4252_v9  ;;  %v4292_v15 = vld [vmem:[%s13460_s3 + $0xdb8] sm:$0xff]  ;;  %v9389_v28 = vcombine.low %v4279_v7, %v4283_v10 }
 0x3c9   :  { %v4296_v36 = vld [vmem:[%s13460_s3 + $0xdd8] sm:$0xff] }
 0x3ca   :  { %7398 = vmatpush1.bf16.msra.mxu0 %v9301_v43  ;;  %v4259_v43 = vld [vmem:[%s13460_s3 + $0xcb0] sm:$0xff] }
 0x3cb   :  { %7562 = vmatpush1.bf16.msra.mxu1 %v9303_v58  ;;  %7399 = vmatprep.subr.bf16.mxu0 %v9310_v50  ;;  %v4256_v58 = vld [vmem:[%s13460_s3 + $0xc98] sm:$0xff]  ;;  %v9366_v4 = vcombine.high %v4255_v42, %v4259_v43 }
 0x3cc   :  { %7563 = vmatprep.subr.bf16.mxu1 %v9312_v52  ;;  %v4260_v50 = vld [vmem:[%s13460_s3 + $0xcb8] sm:$0xff]  ;;  %v9359_v52 = vcombine.low %v4248_v41, %v4252_v9  ;;  %v9397_v9 = vcombine.low %v4287_v12, %v4291_v24 }
 0x3cd   :  { %v9368_v56 = vcombine.high %v4256_v58, %v4260_v50 }
 0x3ce   :  { %7400 = vmatpush1.bf16.msra.mxu0 %v9309_v59  ;;  %v4263_v59 = vld [vmem:[%s13460_s3 + $0xcd0] sm:$0xff] }
 0x3cf   :  { %7564 = vmatpush1.bf16.msra.mxu1 %v9311_v3  ;;  %7401 = vmatprep.subr.bf16.mxu0 %v9318_v55  ;;  %v4268_v3 = vld [vmem:[%s13460_s3 + $0xcf8] sm:$0xff]  ;;  %v9367_v55 = vcombine.low %v4256_v58, %v4260_v50  ;;  %v9374_v11 = vcombine.high %v4263_v59, %v4267_v60  ;;  %v4303_v58 = vld [vmem:[%s13460_s3 + $0xe10] sm:$0xff] }
 0x3d0   :  { %7565 = vmatprep.subr.bf16.mxu1 %v9320_v61  ;;  %v4307_v50 = vld [vmem:[%s13460_s3 + $0xe30] sm:$0xff] }
 0x3d2   :  { %7402 = vmatpush1.bf16.msra.mxu0 %v9317_v63  ;;  %v4272_v63 = vld [vmem:[%s13460_s3 + $0xd18] sm:$0xff] }
 0x3d3   :  { %7566 = vmatpush1.bf16.msra.mxu1 %v9319_v2  ;;  %7403 = vmatprep.subr.bf16.mxu0 %v9326_v5  ;;  %v9373_v2 = vcombine.low %v4263_v59, %v4267_v60  ;;  %v9414_v59 = vcombine.high %v4303_v58, %v4307_v50 }
 0x3d4   :  { %7567 = vmatprep.subr.bf16.mxu1 %v9328_v53  ;;  %v9384_v53 = vcombine.high %v4272_v63, %v4276_v0 }
 0x3d6   :  { %7404 = vmatpush1.bf16.msra.mxu0 %v9325_v17  ;;  %v4280_v17 = vld [vmem:[%s13460_s3 + $0xd58] sm:$0xff] }
 0x3d7   :  { %7568 = vmatpush1.bf16.msra.mxu1 %v9327_v19  ;;  %7405 = vmatprep.subr.bf16.mxu0 %v9334_v20  ;;  %v9381_v19 = vcombine.low %v4271_v62, %v4275_v39  ;;  %v9383_v20 = vcombine.low %v4272_v63, %v4276_v0  ;;  %v4319_v63 = vld [vmem:[%s13460_s3 + $0xe90] sm:$0xff] }
 0x3d8   :  { %7569 = vmatprep.subr.bf16.mxu1 %v9336_v48  ;;  %v9392_v48 = vcombine.high %v4280_v17, %v4284_v57  ;;  %v4323_v0 = vld [vmem:[%s13460_s3 + $0xeb0] sm:$0xff] }
 0x3d9   :  { %v9430_v7 = vcombine.high %v4319_v63, %v4323_v0 }
 0x3da   :  { %7406 = vmatpush1.bf16.msra.mxu0 %v9333_v27  ;;  %v4288_v27 = vld [vmem:[%s13460_s3 + $0xd98] sm:$0xff] }
 0x3db   :  { %7570 = vmatpush1.bf16.msra.mxu1 %v9335_v30  ;;  %7407 = vmatprep.subr.bf16.mxu0 %v9342_v21  ;;  %v9391_v30 = vcombine.low %v4280_v17, %v4284_v57  ;;  %v9398_v21 = vcombine.high %v4287_v12, %v4291_v24  ;;  %v9400_v33 = vcombine.high %v4288_v27, %v4292_v15  ;;  %v4327_v17 = vld [vmem:[%s13460_s3 + $0xed0] sm:$0xff] }
 0x3dc   :  { %7571 = vmatprep.subr.bf16.mxu1 %v9344_v22  ;;  %v4331_v57 = vld [vmem:[%s13460_s3 + $0xef0] sm:$0xff] }
 0x3dd   :  { %v9438_v12 = vcombine.high %v4327_v17, %v4331_v57 }
 0x3de   :  { %7408 = vmatpush1.bf16.msra.mxu0 %v9341_v35  ;;  %v4295_v35 = vld [vmem:[%s13460_s3 + $0xdd0] sm:$0xff] }
 0x3df   :  { %7572 = vmatpush1.bf16.msra.mxu1 %v9343_v37  ;;  %7418 = vmatprep.subr.bf16.mxu0 %v9350_v14  ;;  %v4299_v37 = vld [vmem:[%s13460_s3 + $0xdf0] sm:$0xff] }
 0x3e0   :  { %7582 = vmatprep.subr.bf16.mxu1 %v9352_v49  ;;  %v4300_v49 = vld [vmem:[%s13460_s3 + $0xdf8] sm:$0xff] }
 0x3e1   :  { %7410 = vmatmul.mubr.bf16.vlgmr.msra.gmra.mrb[12].mxu0 %v12208_v18 }
 0x3e2   :  { %7574 = vmatmul.mubr.bf16.vlgmr.msra.gmra.mrb[12].mxu1 %v12208_v18  ;;  %7419 = vmatpush1.bf16.msra.mxu0 %v9349_v40  ;;  %v4264_v18 = vld [vmem:[%s13460_s3 + $0xcd8] sm:$0xff] }
 0x3e3   :  { %7450 = vmatprep.mubr.bf16.mxu0 %v12224_v26  ;;  %7583 = vmatpush1.bf16.msra.mxu1 %v9351_v31  ;;  %v9376_v61 = vcombine.high %v4264_v18, %v4268_v3  ;;  %v9375_v5 = vcombine.low %v4264_v18, %v4268_v3  ;;  %v4311_v18 = vld [vmem:[%s13460_s3 + $0xe50] sm:$0xff] }
 0x3e4   :  { %7614 = vmatprep.mubr.bf16.mxu1 %v12224_v26  ;;  %7420 = vmatprep.subr.bf16.mxu0 %v9358_v25  ;;  %v9365_v26 = vcombine.low %v4255_v42, %v4259_v43  ;;  %v9399_v42 = vcombine.low %v4288_v27, %v4292_v15  ;;  %v9406_v43 = vcombine.high %v4295_v35, %v4299_v37  ;;  %v4315_v3 = vld [vmem:[%s13460_s3 + $0xe70] sm:$0xff] }
 0x3e5   :  { %7584 = vmatprep.subr.bf16.mxu1 %v9360_v44  ;;  %v9408_v44 = vcombine.high %v4296_v36, %v4300_v49  ;;  %v9422_v62 = vcombine.high %v4311_v18, %v4315_v3  ;;  %v4335_v27 = vld [vmem:[%s13460_s3 + $0xf10] sm:$0xff] }
 0x3e6   :  { %7421 = vmatpush1.bf16.msra.mxu0 %v9357_v51  ;;  %v4304_v51 = vld [vmem:[%s13460_s3 + $0xe18] sm:$0xff]  ;;  %v4339_v15 = vld [vmem:[%s13460_s3 + $0xf30] sm:$0xff] }
 0x3e7   :  { %7585 = vmatpush1.bf16.msra.mxu1 %v9359_v52  ;;  %7422 = vmatprep.subr.bf16.mxu0 %v9366_v4  ;;  %v4308_v52 = vld [vmem:[%s13460_s3 + $0xe38] sm:$0xff]  ;;  %v9405_v4 = vcombine.low %v4295_v35, %v4299_v37  ;;  %v9446_v35 = vcombine.high %v4335_v27, %v4339_v15 }
 0x3e8   :  { %7586 = vmatprep.subr.bf16.mxu1 %v9368_v56  ;;  %v9407_v56 = vcombine.low %v4296_v36, %v4300_v49  ;;  %v9416_v60 = vcombine.high %v4304_v51, %v4308_v52  ;;  %v4343_v36 = vld [vmem:[%s13460_s3 + $0xf50] sm:$0xff] }
 0x3e9   :  { %v4347_v49 = vld [vmem:[%s13460_s3 + $0xf70] sm:$0xff] }
 0x3ea   :  { %7423 = vmatpush1.bf16.msra.mxu0 %v9365_v26  ;;  %v4312_v26 = vld [vmem:[%s13460_s3 + $0xe58] sm:$0xff] }
 0x3eb   :  { %7587 = vmatpush1.bf16.msra.mxu1 %v9367_v55  ;;  %7424 = vmatprep.subr.bf16.mxu0 %v9374_v11  ;;  %v4316_v55 = vld [vmem:[%s13460_s3 + $0xe78] sm:$0xff]  ;;  %v9413_v11 = vcombine.low %v4303_v58, %v4307_v50 }
 0x3ec   :  { %7588 = vmatprep.subr.bf16.mxu1 %v9376_v61  ;;  %v9415_v61 = vcombine.low %v4304_v51, %v4308_v52  ;;  %v9424_v39 = vcombine.high %v4312_v26, %v4316_v55  ;;  %v4352_v58 = vld [vmem:[%s13460_s3 + $0xf98] sm:$0xff]  ;;  %v13176_v51 = vld [vmem:[%s13462_s4] sm:$0xff]  ;;  %v9453_v52 = vcombine.low %v4343_v36, %v4347_v49 }
 0x3ed   :  { %v4356_v50 = vld [vmem:[%s13460_s3 + $0xfb8] sm:$0xff] }
 0x3ee   :  { %7425 = vmatpush1.bf16.msra.mxu0 %v9373_v2  ;;  %v4320_v2 = vld [vmem:[%s13460_s3 + $0xe98] sm:$0xff] }
 0x3ef   :  { %7589 = vmatpush1.bf16.msra.mxu1 %v9375_v5  ;;  %7426 = vmatprep.subr.bf16.mxu0 %v9382_v6  ;;  %v4324_v5 = vld [vmem:[%s13460_s3 + $0xeb8] sm:$0xff]  ;;  %v9421_v6 = vcombine.low %v4311_v18, %v4315_v3  ;;  %v4363_v18 = vld [vmem:[%s13460_s3 + $0xff0] sm:$0xff]  ;;  %v4374_v3 = vrot.slane %v13176_v51, %v559_v16 }
 0x3f0   :  { %7590 = vmatprep.subr.bf16.mxu1 %v9384_v53  ;;  %v9423_v53 = vcombine.low %v4312_v26, %v4316_v55  ;;  %v9432_v10 = vcombine.high %v4320_v2, %v4324_v5  ;;  %v4360_v26 = vld [vmem:[%s13460_s3 + $0xfd8] sm:$0xff] }
 0x3f1   :  { %v4364_v55 = vld [vmem:[%s13460_s3 + $0xff8] sm:$0xff] }
 0x3f2   :  { %7427 = vmatpush1.bf16.msra.mxu0 %v9381_v19  ;;  %v4328_v19 = vld [vmem:[%s13460_s3 + $0xed8] sm:$0xff]  ;;  %v9472_v16 = vcombine.high %v4360_v26, %v4364_v55 }
 0x3f3   :  { %7591 = vmatpush1.bf16.msra.mxu1 %v9383_v20  ;;  %7428 = vmatprep.subr.bf16.mxu0 %v9390_v23  ;;  %v4332_v20 = vld [vmem:[%s13460_s3 + $0xef8] sm:$0xff]  ;;  %v9429_v23 = vcombine.low %v4319_v63, %v4323_v0 }
 0x3f4   :  { %v13069_v32 = vpop.f32.mrb[8].mxu0  ;;  %v13071_v22 = vpop.f32.mrb[8].mxu1  ;;  %7592 = vmatprep.subr.bf16.mxu1 %v9392_v48  ;;  %v9431_v48 = vcombine.low %v4320_v2, %v4324_v5  ;;  %v9440_v24 = vcombine.high %v4328_v19, %v4332_v20  ;;  %v9471_v5 = vcombine.low %v4360_v26, %v4364_v55  ;;  %v9822_v26 = vld [vmem:[%s13461_s5 + $0x148] sm:$0xff]  }
 0x3f5   :  { %v13079_v14 = vpop.f32.mrb[9].mxu0  ;;  %v13081_v38 = vpop.f32.mrb[9].mxu1 }
 0x3f6   :  { %v7128_v40 = vpop.f32.mrb[10].mxu0  ;;  %v7292_v41 = vpop.f32.mrb[10].mxu1  ;;  %7429 = vmatpush1.bf16.msra.mxu0 %v9389_v28  ;;  %v4336_v28 = vld [vmem:[%s13460_s3 + $0xf18] sm:$0xff]  ;;  %v9673_v63 = vadd.f32 %v13079_v14, %v4374_v3  ;;  %v9788_v14 = vld [vmem:[%s13461_s5] sm:$0xff]  }
 0x3f7   :  { %7593 = vmatpush1.bf16.msra.mxu1 %v9391_v30  ;;  %v7129_v31 = vpop.f32.mrb[11].mxu0  ;;  %v7293_v25 = vpop.f32.mrb[11].mxu1  ;;  %7430 = vmatprep.subr.bf16.mxu0 %v9398_v21  ;;  %v4340_v30 = vld [vmem:[%s13460_s3 + $0xf38] sm:$0xff]  ;;  %v9437_v21 = vcombine.low %v4327_v17, %v4331_v57  ;;  %v9791_v57 = vld [vmem:[%s13461_s5 + $0xc8] sm:$0xff]   ;;  %v9821_v3 = vld [vmem:[%s13461_s5 + $0x180] sm:$0xff]  }
 0x3f8   :  { %7594 = vmatprep.subr.bf16.mxu1 %v9400_v33  ;;  %v9439_v33 = vcombine.low %v4328_v19, %v4332_v20  ;;  %v9448_v37 = vcombine.high %v4336_v28, %v4340_v30  ;;  %v4344_v40 = vld [vmem:[%s13460_s3 + $0xf58] sm:$0xff]  ;;  %v9447_v31 = vcombine.low %v4336_v28, %v4340_v30  ;;  %v9454_v25 = vcombine.high %v4343_v36, %v4347_v49  ;;  %v9792_v20 = vld [vmem:[%s13461_s5 + $0x8] sm:$0xff]  }
 0x3f9   :  { %v4348_v41 = vld [vmem:[%s13460_s3 + $0xf78] sm:$0xff]  ;;  %v9806_v36 = vld [vmem:[%s13461_s5 + $0x68] sm:$0xff]  }
 0x3fa   :  { %7431 = vmatpush1.bf16.msra.mxu0 %v9397_v9  ;;  %v9445_v9 = vcombine.low %v4335_v27, %v4339_v15  ;;  %v9798_v27 = vld [vmem:[%s13461_s5 + $0x58] sm:$0xff]   ;;  %v9807_v49 = vld [vmem:[%s13461_s5 + $0xe8] sm:$0xff]  }
 0x3fb   :  { %7595 = vmatpush1.bf16.msra.mxu1 %v9399_v42  ;;  %7432 = vmatprep.subr.bf16.mxu0 %v9406_v43  ;;  %v9456_v42 = vcombine.high %v4344_v40, %v4348_v41  ;;  %v4351_v43 = vld [vmem:[%s13460_s3 + $0xf90] sm:$0xff]  ;;  %v9799_v15 = vld [vmem:[%s13461_s5 + $0xd8] sm:$0xff]  }
 0x3fc   :  { %7596 = vmatprep.subr.bf16.mxu1 %v9408_v44  ;;  %v4355_v44 = vld [vmem:[%s13460_s3 + $0xfb0] sm:$0xff]  ;;  %v9800_v28 = vld [vmem:[%s13461_s5 + $0x18] sm:$0xff]  }
 0x3fd   :  { %v9801_v30 = vld [vmem:[%s13461_s5 + $0x98] sm:$0xff]  }
 0x3fe   :  { %7433 = vmatpush1.bf16.msra.mxu0 %v9405_v4  ;;  %v9455_v4 = vcombine.low %v4344_v40, %v4348_v41  ;;  %v9808_v40 = vld [vmem:[%s13461_s5 + $0x28] sm:$0xff]   ;;  %v4370_v41 = vrot.slane %v13176_v51, %v555_v29  ;;  %v9812_v29 = vld [vmem:[%s13461_s5 + $0x30] sm:$0xff]  }
 0x3ff   :  { %7597 = vmatpush1.bf16.msra.mxu1 %v9407_v56  ;;  %7434 = vmatprep.subr.bf16.mxu0 %v9414_v59  ;;  %v9462_v56 = vcombine.high %v4351_v43, %v4355_v44  ;;  %v9464_v59 = vcombine.high %v4352_v58, %v4356_v50 }
 0x400   :  { %7598 = vmatprep.subr.bf16.mxu1 %v9416_v60  ;;  %v4359_v60 = vld [vmem:[%s13460_s3 + $0xfd0] sm:$0xff] }
 0x401   :  { %v9469_v2 = vcombine.low %v4359_v60, %v4363_v18 }
 0x402   :  { %7435 = vmatpush1.bf16.msra.mxu0 %v9413_v11  ;;  %v4382_v11 = vrot.slane %v13176_v51, %v567_v34  ;;  %v9786_v34 = vld [vmem:[%s13461_s5 + $0x40] sm:$0xff]  }
 0x403   :  { %7599 = vmatpush1.bf16.msra.mxu1 %v9415_v61  ;;  %7436 = vmatprep.subr.bf16.mxu0 %v9422_v62  ;;  %v9461_v61 = vcombine.low %v4351_v43, %v4355_v44  ;;  %v9463_v62 = vcombine.low %v4352_v58, %v4356_v50  ;;  %v9672_v43 = vadd.f32 %v13069_v32, %v4370_v41  ;;  %v9813_v44 = vld [vmem:[%s13461_s5 + $0xb0] sm:$0xff]   ;;  %v9815_v50 = vld [vmem:[%s13461_s5 + $0xf8] sm:$0xff]  }
 0x404   :  { %7600 = vmatprep.subr.bf16.mxu1 %v9424_v39  ;;  %v9470_v39 = vcombine.high %v4359_v60, %v4363_v18  ;;  %v9675_v0 = vadd.f32 %v13081_v38, %v4382_v11  ;;  %v9789_v38 = vld [vmem:[%s13461_s5 + $0x80] sm:$0xff]   ;;  %v9816_v32 = vld [vmem:[%s13461_s5 + $0x38] sm:$0xff]   ;;  %v9823_v11 = vld [vmem:[%s13461_s5 + $0x1c8] sm:$0xff]  }
 0x405   :  { %v9820_v60 = vld [vmem:[%s13461_s5 + $0x100] sm:$0xff]  }
 0x406   :  { %7437 = vmatpush1.bf16.msra.mxu0 %v9421_v6  ;;  %v9787_v6 = vld [vmem:[%s13461_s5 + $0xc0] sm:$0xff]  }
 0x407   :  { %7601 = vmatpush1.bf16.msra.mxu1 %v9423_v53  ;;  %7438 = vmatprep.subr.bf16.mxu0 %v9430_v7  ;;  %v7624_v53 = vmax.f32 %v9673_v63, 0.0  ;;  %v7626_v7 = vmax.f32 %v9675_v0, 0.0  ;;  %v9828_v63 = vld [vmem:[%s13461_s5 + $0x110] sm:$0xff]  }
 0x408   :  { %7602 = vmatprep.subr.bf16.mxu1 %v9432_v10  ;;  %v9790_v10 = vld [vmem:[%s13461_s5 + $0x48] sm:$0xff]   ;;  %v9829_v0 = vld [vmem:[%s13461_s5 + $0x190] sm:$0xff]  }
 0x409   :  { %v7632_v17 = vpack.c.bf16 %v7624_v53, %v7624_v53  ;;  %v7634_v19 = vpack.c.bf16 %v7626_v7, %v7626_v7  ;;  %v9834_v53 = vld [vmem:[%s13461_s5 + $0x160] sm:$0xff]  }
 0x40a   :  { %7439 = vmatpush1.bf16.msra.mxu0 %v9429_v23  ;;  %v9793_v23 = vld [vmem:[%s13461_s5 + $0x88] sm:$0xff]   ;;  %v9835_v7 = vld [vmem:[%s13461_s5 + $0x1e0] sm:$0xff]  }
 0x40b   :  { %7603 = vmatpush1.bf16.msra.mxu1 %v9431_v48  ;;  %7440 = vmatprep.subr.bf16.mxu0 %v9438_v12  ;;  %v9794_v48 = vld [vmem:[%s13461_s5 + $0x50] sm:$0xff]  }
 0x40c   :  { %7604 = vmatprep.subr.bf16.mxu1 %v9440_v24  ;;  %v9796_v12 = vld [vmem:[%s13461_s5 + $0x10] sm:$0xff]  }
 0x40d   :  { %v9797_v24 = vld [vmem:[%s13461_s5 + $0x90] sm:$0xff]  }
 0x40e   :  { %7441 = vmatpush1.bf16.msra.mxu0 %v9437_v21  ;;  %v9802_v21 = vld [vmem:[%s13461_s5 + $0x60] sm:$0xff]  }
 0x40f   :  { %7605 = vmatpush1.bf16.msra.mxu1 %v9439_v33  ;;  %7442 = vmatprep.subr.bf16.mxu0 %v9446_v35  ;;  %v9803_v33 = vld [vmem:[%s13461_s5 + $0xe0] sm:$0xff]  }
 0x410   :  { %7606 = vmatprep.subr.bf16.mxu1 %v9448_v37  ;;  %v9804_v35 = vld [vmem:[%s13461_s5 + $0x20] sm:$0xff]  }
 0x411   :  { %v9805_v37 = vld [vmem:[%s13461_s5 + $0xa0] sm:$0xff]  }
 0x412   :  { %7443 = vmatpush1.bf16.msra.mxu0 %v9445_v9  ;;  %v9809_v9 = vld [vmem:[%s13461_s5 + $0xa8] sm:$0xff]  }
 0x413   :  { %7607 = vmatpush1.bf16.msra.mxu1 %v9447_v31  ;;  %7444 = vmatprep.subr.bf16.mxu0 %v9454_v25  ;;  %v9810_v31 = vld [vmem:[%s13461_s5 + $0x70] sm:$0xff]   ;;  %v4378_v25 = vrot.slane %v13176_v51, %v563_v54  ;;  %v9814_v54 = vld [vmem:[%s13461_s5 + $0x78] sm:$0xff]  }
 0x414   :  { %7608 = vmatprep.subr.bf16.mxu1 %v9456_v42  ;;  %v9811_v42 = vld [vmem:[%s13461_s5 + $0xf0] sm:$0xff]  }
 0x415   :  { %v9674_v58 = vadd.f32 %v13071_v22, %v4378_v25  ;;  %v9818_v22 = vld [vmem:[%s13461_s5 + $0x140] sm:$0xff]  }
 0x416   :  { %7445 = vmatpush1.bf16.msra.mxu0 %v9453_v52  ;;  %v7623_v52 = vmax.f32 %v9672_v43, 0.0 }
 0x417   :  { %7609 = vmatpush1.bf16.msra.mxu1 %v9455_v4  ;;  %7446 = vmatprep.subr.bf16.mxu0 %v9462_v56  ;;  %v9817_v4 = vld [vmem:[%s13461_s5 + $0xb8] sm:$0xff]   ;;  %v7625_v56 = vmax.f32 %v9674_v58, 0.0 }
 0x418   :  { %7610 = vmatprep.subr.bf16.mxu1 %v9464_v59  ;;  %v9819_v59 = vld [vmem:[%s13461_s5 + $0x1c0] sm:$0xff]   ;;  %v7631_v18 = vpack.c.bf16 %v7623_v52, %v7623_v52  ;;  %v9852_v52 = vld [vmem:[%s13463_s7 + $0x10] sm:$0xff]  }
 0x419   :  { %v7633_v55 = vpack.c.bf16 %v7625_v56, %v7625_v56 }
 0x41a   :  { %7447 = vmatpush1.bf16.msra.mxu0 %v9461_v61  ;;  %v9824_v61 = vld [vmem:[%s13461_s5 + $0x108] sm:$0xff]  }
 0x41b   :  { %7611 = vmatpush1.bf16.msra.mxu1 %v9463_v62  ;;  %7448 = vmatprep.subr.bf16.mxu0 %v9470_v39  ;;  %v9825_v62 = vld [vmem:[%s13461_s5 + $0x188] sm:$0xff]   ;;  %v9826_v39 = vld [vmem:[%s13461_s5 + $0x150] sm:$0xff]  }
 0x41c   :  { %7612 = vmatprep.subr.bf16.mxu1 %v9472_v16  ;;  %v9827_v16 = vld [vmem:[%s13461_s5 + $0x1d0] sm:$0xff]  }
 0x41e   :  { %7449 = vmatpush1.bf16.msra.mxu0 %v9469_v2  ;;  %v9830_v2 = vld [vmem:[%s13461_s5 + $0x158] sm:$0xff]  }
 0x41f   :  { %7613 = vmatpush1.bf16.msra.mxu1 %v9471_v5  ;;  %9547 = vmatprep.subr.bf16.mxu0 %v9786_v34  ;;  %v9831_v5 = vld [vmem:[%s13461_s5 + $0x1d8] sm:$0xff]  }
 0x420   :  { %9569 = vmatprep.subr.bf16.mxu1 %v9787_v6  ;;  %v9832_v34 = vld [vmem:[%s13461_s5 + $0x118] sm:$0xff]  }
 0x421   :  { %7451 = vmatmul.mubr.bf16.vlgmr.msra.gmra.mrb[12].mxu0 %v12415_v13  ;;  %v9833_v6 = vld [vmem:[%s13461_s5 + $0x198] sm:$0xff]  }
 0x422   :  { %7615 = vmatmul.mubr.bf16.vlgmr.msra.gmra.mrb[12].mxu1 %v12415_v13  ;;  %9548 = vmatpush3.bf16.msra.mxu0 %v9788_v14  ;;  %v9795_v13 = vld [vmem:[%s13461_s5 + $0xd0] sm:$0xff]   ;;  %v9836_v14 = vld [vmem:[%s13461_s5 + $0x120] sm:$0xff]  }
 0x423   :  { %8190 = vmatprep.mubr.bf16.mxu0 %v7632_v17  ;;  %9570 = vmatpush3.bf16.msra.mxu1 %v9789_v38  ;;  %v9837_v38 = vld [vmem:[%s13461_s5 + $0x1a0] sm:$0xff]   ;;  %v9839_v17 = vld [vmem:[%s13461_s5 + $0x1e8] sm:$0xff]  }
 0x424   :  { %8230 = vmatprep.mubr.bf16.mxu1 %v7634_v19  ;;  %9549 = vmatprep.subr.bf16.mxu0 %v9790_v10  ;;  %v9838_v10 = vld [vmem:[%s13461_s5 + $0x168] sm:$0xff]  }
 0x425   :  { %9571 = vmatprep.subr.bf16.mxu1 %v9791_v57  ;;  %v9840_v57 = vld [vmem:[%s13461_s5 + $0x128] sm:$0xff]  }
 0x426   :  { %9550 = vmatpush3.bf16.msra.mxu0 %v9792_v20  ;;  %v9841_v19 = vld [vmem:[%s13461_s5 + $0x1a8] sm:$0xff]   ;;  %v9842_v20 = vld [vmem:[%s13461_s5 + $0x170] sm:$0xff]  }
 0x427   :  { %9572 = vmatpush3.bf16.msra.mxu1 %v9793_v23  ;;  %9551 = vmatprep.subr.bf16.mxu0 %v9794_v48  ;;  %v9843_v23 = vld [vmem:[%s13461_s5 + $0x1f0] sm:$0xff]  }
 0x428   :  { %9573 = vmatprep.subr.bf16.mxu1 %v9795_v13  ;;  %v9844_v48 = vld [vmem:[%s13461_s5 + $0x130] sm:$0xff]  }
 0x429   :  { %v9845_v13 = vld [vmem:[%s13461_s5 + $0x1b0] sm:$0xff]  }
 0x42a   :  { %9552 = vmatpush3.bf16.msra.mxu0 %v9796_v12  ;;  %v9846_v12 = vld [vmem:[%s13461_s5 + $0x178] sm:$0xff]  }
 0x42b   :  { %9574 = vmatpush3.bf16.msra.mxu1 %v9797_v24  ;;  %9553 = vmatprep.subr.bf16.mxu0 %v9798_v27  ;;  %v9847_v24 = vld [vmem:[%s13461_s5 + $0x1f8] sm:$0xff]  }
 0x42c   :  { %9575 = vmatprep.subr.bf16.mxu1 %v9799_v15  ;;  %v9848_v27 = vld [vmem:[%s13461_s5 + $0x138] sm:$0xff]  }
 0x42d   :  { %v9849_v15 = vld [vmem:[%s13461_s5 + $0x1b8] sm:$0xff]  }
 0x42e   :  { %9554 = vmatpush3.bf16.msra.mxu0 %v9800_v28  ;;  %v9859_v28 = vmov 0.0  }
 0x42f   :  { %9576 = vmatpush3.bf16.msra.mxu1 %v9801_v30  ;;  %9555 = vmatprep.subr.bf16.mxu0 %v9802_v21  ;;  %v4386_v30 = vrot.slane %v13176_v51, %v571_v45  ;;  %v4394_v21 = vrot.slane %v13176_v51, %v579_v8 }
 0x430   :  { %9577 = vmatprep.subr.bf16.mxu1 %v9803_v33  ;;  %v4390_v33 = vrot.slane %v13176_v51, %v575_v46 }
 0x432   :  { %9556 = vmatpush3.bf16.msra.mxu0 %v9804_v35  ;;  %v4398_v35 = vrot.slane %v13176_v51, %v583_v47 }
 0x433   :  { %9578 = vmatpush3.bf16.msra.mxu1 %v9805_v37  ;;  %9557 = vmatprep.subr.bf16.mxu0 %v9806_v36 }
 0x434   :  { %9579 = vmatprep.subr.bf16.mxu1 %v9807_v49 }
 0x436   :  { %9558 = vmatpush3.bf16.msra.mxu0 %v9808_v40 }
 0x437   :  { %9580 = vmatpush3.bf16.msra.mxu1 %v9809_v9  ;;  %9559 = vmatprep.subr.bf16.mxu0 %v9810_v31 }
 0x438   :  { %9581 = vmatprep.subr.bf16.mxu1 %v9811_v42 }
 0x43a   :  { %9560 = vmatpush3.bf16.msra.mxu0 %v9812_v29 }
 0x43b   :  { %9582 = vmatpush3.bf16.msra.mxu1 %v9813_v44  ;;  %9561 = vmatprep.subr.bf16.mxu0 %v9814_v54 }
 0x43c   :  { %9583 = vmatprep.subr.bf16.mxu1 %v9815_v50 }
 0x43e   :  { %9562 = vmatpush3.bf16.msra.mxu0 %v9816_v32  ;;  %v9851_v32 = vld [vmem:[%s13463_s7 + $0x8] sm:$0xff]  }
 0x43f   :  { %9584 = vmatpush3.bf16.msra.mxu1 %v9817_v4  ;;  %9591 = vmatprep.subr.bf16.mxu0 %v9818_v22  ;;  %v9853_v4 = vld [vmem:[%s13463_s7 + $0x18] sm:$0xff]   ;;  %v9854_v22 = vld [vmem:[%s13463_s7 + $0x20] sm:$0xff]  }
 0x440   :  { %9613 = vmatprep.subr.bf16.mxu1 %v9819_v59 }
 0x441   :  { %8191 = vmatmul.mubr.bf16.vlgmr.msra.gmra.mrb[16].mxu0 %v7631_v18 }
 0x442   :  { %8231 = vmatmul.mubr.bf16.vlgmr.msra.gmra.mrb[16].mxu1 %v7633_v55  ;;  %9592 = vmatpush3.bf16.msra.mxu0 %v9820_v60  ;;  %v9473_v60 = vld [vmem:[%s13464_s6] ss:$0 sm:$0xff] }
 0x443   :  { %9614 = vmatpush3.bf16.msra.mxu1 %v9821_v3  ;;  %9593 = vmatprep.subr.bf16.mxu0 %v9822_v26 }
 0x444   :  { %9615 = vmatprep.subr.bf16.mxu1 %v9823_v11 }
 0x446   :  { %9594 = vmatpush3.bf16.msra.mxu0 %v9824_v61 }
 0x447   :  { %9616 = vmatpush3.bf16.msra.mxu1 %v9825_v62  ;;  %9595 = vmatprep.subr.bf16.mxu0 %v9826_v39 }
 0x448   :  { %9617 = vmatprep.subr.bf16.mxu1 %v9827_v16 }
 0x44a   :  { %9596 = vmatpush3.bf16.msra.mxu0 %v9828_v63 }
 0x44b   :  { %9618 = vmatpush3.bf16.msra.mxu1 %v9829_v0  ;;  %9597 = vmatprep.subr.bf16.mxu0 %v9830_v2  ;;  %v9855_v0 = vld [vmem:[%s13463_s7 + $0x28] sm:$0xff]   ;;  %v9856_v2 = vld [vmem:[%s13463_s7 + $0x30] sm:$0xff]  }
 0x44c   :  { %9619 = vmatprep.subr.bf16.mxu1 %v9831_v5  ;;  %v9857_v5 = vld [vmem:[%s13463_s7 + $0x38] sm:$0xff]  }
 0x44e   :  { %9598 = vmatpush3.bf16.msra.mxu0 %v9832_v34 }
 0x44f   :  { %9620 = vmatpush3.bf16.msra.mxu1 %v9833_v6  ;;  %9599 = vmatprep.subr.bf16.mxu0 %v9834_v53 }
 0x450   :  { %9621 = vmatprep.subr.bf16.mxu1 %v9835_v7 }
 0x452   :  { %9600 = vmatpush3.bf16.msra.mxu0 %v9836_v14 }
 0x453   :  { %9622 = vmatpush3.bf16.msra.mxu1 %v9837_v38  ;;  %9601 = vmatprep.subr.bf16.mxu0 %v9838_v10 }
 0x454   :  { %9623 = vmatprep.subr.bf16.mxu1 %v9839_v17 }
 0x456   :  { %9602 = vmatpush3.bf16.msra.mxu0 %v9840_v57 }
 0x457   :  { %9624 = vmatpush3.bf16.msra.mxu1 %v9841_v19  ;;  %9603 = vmatprep.subr.bf16.mxu0 %v9842_v20 }
 0x458   :  { %9625 = vmatprep.subr.bf16.mxu1 %v9843_v23 }
 0x45a   :  { %9604 = vmatpush3.bf16.msra.mxu0 %v9844_v48 }
 0x45b   :  { %9626 = vmatpush3.bf16.msra.mxu1 %v9845_v13  ;;  %9605 = vmatprep.subr.bf16.mxu0 %v9846_v12  ;;  %v9538_v12 = vld [vmem:[%s13466_s8] ss:$0 sm:$0xff] }
 0x45c   :  { %9627 = vmatprep.subr.bf16.mxu1 %v9847_v24 }
 0x45e   :  { %9606 = vmatpush3.bf16.msra.mxu0 %v9848_v27 }
 0x45f   :  { %9628 = vmatpush3.bf16.msra.mxu1 %v9849_v15  ;;  %9644 = vmatprep.subr.bf16.mxu0 %v9859_v28 }
 0x4f4   :  { %v7452_v37 = vpop.f32.mrb[12].mxu0 }
 0x4f5   :  { %v9676_v36 = vadd.f32 %v7452_v37, %v4386_v30  ;;  %v7616_v49 = vpop.f32.mrb[12].mxu1  ;;  %v7454_v40 = vpop.f32.mrb[13].mxu0 }
 0x4f6   :  { %v9678_v41 = vadd.f32 %v7616_v49, %v4394_v21  ;;  %v9677_v9 = vadd.f32 %v7454_v40, %v4390_v33  ;;  %v7618_v31 = vpop.f32.mrb[13].mxu1  ;;  %v7456_v45 = vpop.f32.mrb[14].mxu0 }
 0x4f7   :  { %v7627_v25 = vmax.f32 %v9676_v36, 0.0  ;;  %v9679_v42 = vadd.f32 %v7618_v31, %v4398_v35  ;;  %v7620_v29 = vpop.f32.mrb[14].mxu1  ;;  %v7457_v8 = vpop.f32.mrb[15].mxu0 }
 0x4f8   :  { %v7629_v43 = vmax.f32 %v9678_v41, 0.0  ;;  %v7628_v44 = vmax.f32 %v9677_v9, 0.0  ;;  %v7621_v54 = vpop.f32.mrb[15].mxu1 }
 0x4f9   :  { %v7630_v46 = vmax.f32 %v9679_v42, 0.0  ;;  %v7635_v47 = vpack.c.bf16 %v7627_v25, %v7627_v25 }
 0x4fa   :  { %v7636_v58 = vpack.c.bf16 %v7628_v44, %v7628_v44  ;;  %v7637_v50 = vpack.c.bf16 %v7629_v43, %v7629_v43 }
 0x4fb   :  { %v7638_v51 = vpack.c.bf16 %v7630_v46, %v7630_v46 }
 0x4fc   :  { %8270 = vmatprep.mubr.bf16.mxu0 %v7636_v58 }
 0x4fd   :  { %8310 = vmatprep.mubr.bf16.mxu1 %v7638_v51  ;;  %8271 = vmatmul.mubr.bf16.vlgmr.msra.gmra.mrb[20].mxu0 %v7635_v47 }
 0x4fe   :  { %8311 = vmatmul.mubr.bf16.vlgmr.msra.gmra.mrb[20].mxu1 %v7637_v50  ;;  %9645 = vmatpush3.bf16.msra.mxu0 %v9850_v1 }
 0x4ff   :  { %9646 = vmatprep.subr.bf16.mxu0 %v9859_v28  ;;  %9660 = vmatprep.mubr.msk.bf16.mxu0 %vm9860_vm0, %v9859_v28 }
 0x502   :  { %9647 = vmatpush3.bf16.msra.mxu0 %v9851_v32 }
 0x503   :  { %9648 = vmatprep.subr.bf16.mxu0 %v9859_v28 }
 0x506   :  { %9649 = vmatpush3.bf16.msra.mxu0 %v9852_v52 }
 0x507   :  { %9650 = vmatprep.subr.bf16.mxu0 %v9859_v28 }
 0x50a   :  { %9651 = vmatpush3.bf16.msra.mxu0 %v9853_v4 }
 0x50b   :  { %9652 = vmatprep.subr.bf16.mxu0 %v9859_v28 }
 0x50e   :  { %9653 = vmatpush3.bf16.msra.mxu0 %v9854_v22 }
 0x50f   :  { %9654 = vmatprep.subr.bf16.mxu0 %v9859_v28 }
 0x512   :  { %9655 = vmatpush3.bf16.msra.mxu0 %v9855_v0 }
 0x513   :  { %9656 = vmatprep.subr.bf16.mxu0 %v9859_v28 }
 0x514   :  { %v9563_v56 = vpop.f32.mrb[16].mxu0 }
 0x515   :  { %v9585_v59 = vpop.f32.mrb[16].mxu1  ;;  %v9564_v18 = vpop.f32.mrb[17].mxu0 }
 0x516   :  { %v9565_v3 = vadd.f32 %v9564_v18, %v9563_v56  ;;  %v9586_v26 = vpop.f32.mrb[17].mxu1  ;;  %v9566_v55 = vpop.f32.mrb[18].mxu0  ;;  %9657 = vmatpush3.bf16.msra.mxu0 %v9856_v2 }
 0x517   :  { %v9587_v11 = vadd.f32 %v9586_v26, %v9585_v59  ;;  %v9588_v61 = vpop.f32.mrb[18].mxu1  ;;  %v9567_v62 = vpop.f32.mrb[19].mxu0  ;;  %9658 = vmatprep.subr.bf16.mxu0 %v9859_v28 }
 0x518   :  { %v8193_v39 = vadd.f32 %v9565_v3, %v9473_v60  ;;  %v9589_v16 = vpop.f32.mrb[19].mxu1 }
 0x51a   :  { %v8233_v63 = vadd.f32 %v9587_v11, %v8193_v39  ;;  %9659 = vmatpush3.bf16.msra.mxu0 %v9857_v5 }
 0x5d0   :  { %v9607_v34 = vpop.f32.mrb[20].mxu0 }
 0x5d1   :  { %v9629_v6 = vpop.f32.mrb[20].mxu1  ;;  %v9608_v53 = vpop.f32.mrb[21].mxu0 }
 0x5d2   :  { %v9609_v7 = vadd.f32 %v9608_v53, %v9607_v34  ;;  %v9630_v14 = vpop.f32.mrb[21].mxu1  ;;  %v9610_v38 = vpop.f32.mrb[22].mxu0 }
 0x5d3   :  { %v9631_v10 = vadd.f32 %v9630_v14, %v9629_v6  ;;  %v9632_v17 = vpop.f32.mrb[22].mxu1  ;;  %v9611_v57 = vpop.f32.mrb[23].mxu0 }
 0x5d4   :  { %v8273_v19 = vadd.f32 %v9609_v7, %v8233_v63  ;;  %v9633_v20 = vpop.f32.mrb[23].mxu1 }
 0x5d6   :  { %v8313_v23 = vadd.f32 %v9631_v10, %v8273_v19 }
 0x5d8   :  { %v8318_v48 = vmax.f32 %v8313_v23, 0.0 }
 0x5da   :  { %8319 = vst [vmem:[%s13465_s9] sm:$0xff] %v8318_v48  ;;  %v8320_v13 = vpack.c.bf16 %v8318_v48, %v8318_v48 }
 0x5dc   :  { %9661 = vmatmul.mubr.bf16.vlgmr.msra.gmra.mrb[24].mxu0 %v8320_v13 }
 0x6af   :  { %v8426_v24 = vpop.f32.mrb[24].mxu0 }
 0x6b0   :  { %v8427_v27 = vadd.f32 %v9538_v12, %v8426_v24  ;;  %v9662_v15 = vpop.f32.mrb[25].mxu0 }
 0x6b1   :  { %v8429_v28 = vpop.f32.mrb[26].mxu0 }
 0x6b2   :  { %8432 = vst [vmem:[%s13467_s10] sm:$0xff] %v8427_v27  ;;  %v9663_v30 = vpop.f32.mrb[27].mxu0 }

</bundles_post_ra>
